<compile_context>
chip_gen: v7x
topology: tpu7x:2x2x1
jax: 0.10.0
libtpu: 0.0.40
codegen_flags: <defaults>
</compile_context>

<pallas_src>
import functools

import jax
import jax.numpy as jnp
from jax import lax
from jax.experimental import pallas as pl
from jax.experimental.pallas import tpu as pltpu


def _round_up(x, m):
    return ((x + m - 1) // m) * m


def _gru_recurrence_kernel(gi_ref, whT_ref, bhn_ref, out_ref, h_scratch,
                           *, hidden_size, t_block, unroll, seq_out):
    """Serial GRU recurrence over one (batch-block, time-block) grid cell.

    gi_ref   : (t_block, Bblk, 3Hp) bf16  precomputed x@W_ih^T + b_ih (+ b_hh[r,z])
    whT_ref  : (Hp, 3Hp)            bf16  hidden weights, pre-transposed, gates [r,z,n]
    bhn_ref  : (1, Hp)              f32   n-gate hidden bias (applied inside r*(...))
    out_ref  : (t_block, Bblk, Hp)  f32 if seq_out else (Bblk, Hp) f32
    h_scratch: (Bblk, Hp)           f32   recurrent state, carried across time blocks
    """
    Hp = hidden_size

    @pl.when(pl.program_id(1) == 0)          # first time block of this batch block
    def _():
        h_scratch[...] = jnp.zeros_like(h_scratch)

    whT = whT_ref[...]                       # loaded once per grid step (bf16)
    # Hoist the n-gate bias broadcast out of the unrolled loop (no CSE in-loop).
    bhn = jnp.broadcast_to(bhn_ref[...], h_scratch.shape)

    def body(i, h):
        gi = gi_ref[i].astype(jnp.float32)                      # (Bblk, 3Hp)
        # Per-step hidden matmul: bf16 operands, f32 accumulation on the MXU.
        gh = jnp.dot(h.astype(jnp.bfloat16), whT,
                     preferred_element_type=jnp.float32)         # (Bblk, 3Hp)
        # Fused sigmoid over the contiguous, lane-aligned r||z slab.
        rz = jax.nn.sigmoid(gi[:, :2 * Hp] + gh[:, :2 * Hp])
        r = rz[:, :Hp]
        z = rz[:, Hp:]
        n = jnp.tanh(gi[:, 2 * Hp:] + r * (gh[:, 2 * Hp:] + bhn))
        h_new = (1.0 - z) * n + z * h
        if seq_out:
            out_ref[i] = h_new.astype(out_ref.dtype)
        return h_new

    # TODO(synk): verify in the bundle dump that Mosaic keeps whT staged in the
    # MXU across the unrolled steps; if not, drive it explicitly with
    # pltpu.matmul_push_rhs / matmul_acc_lhs / matmul_pop.
    h_final = lax.fori_loop(0, t_block, body, h_scratch[...], unroll=unroll)
    h_scratch[...] = h_final
    if not seq_out:
        out_ref[...] = h_final.astype(out_ref.dtype)


def _select_t_block(seq_len, b_block, hp, seq_out, budget_bytes=48 * 2 ** 20):
    """Largest t_block whose (double-buffered) block footprint fits the VMEM budget."""
    w_bytes = hp * 3 * hp * 2 + 8 * 128 * 4      # single-buffered bf16 whT + bhn tile
    scratch = b_block * hp * 4
    t = 64
    while t > 8:
        gi_b = 2 * t * b_block * 3 * hp * 2      # double-buffered bf16 gi block
        out_b = 2 * (t if seq_out else 1) * b_block * hp * 4
        if w_bytes + scratch + gi_b + out_b <= budget_bytes:
            break
        t //= 2
    return max(1, min(t, seq_len))


def gru_layer(x, w_ih, w_hh, b_ih, b_hh, *, num_batch_blocks=1, seq_out=True,
              t_block=None, single_buffer_weights=True):
    """One GRU layer. x: (S, B, E) f32.

    Returns the per-step hidden states (S, B, Hp) f32 if seq_out, else only the
    final hidden state (B, Hp) f32. Hp is H padded to a multiple of 128.
    """
    S, B, E = x.shape
    H = w_hh.shape[1]
    Hp = _round_up(H, 128)                       # lane-dense gate slices / stores

    # --- Pad gate-structured params once (PyTorch gate order [r, z, n]) ---
    w_ih3 = jnp.pad(w_ih.reshape(3, H, E), ((0, 0), (0, Hp - H), (0, 0)))
    w_hh3 = jnp.pad(w_hh.reshape(3, H, H), ((0, 0), (0, Hp - H), (0, Hp - H)))
    b_ih3 = jnp.pad(b_ih.reshape(3, H), ((0, 0), (0, Hp - H)))
    b_hh3 = jnp.pad(b_hh.reshape(3, H), ((0, 0), (0, Hp - H)))

    # Fold the r/z hidden biases into the precomputed projection; the n-gate
    # hidden bias must stay in-kernel (n = tanh(gi_n + r*(W_hn h + b_hn))).
    bias_folded = jnp.concatenate(
        [b_ih3[0] + b_hh3[0], b_ih3[1] + b_hh3[1], b_ih3[2]]).astype(jnp.float32)
    bhn = b_hh3[2].reshape(1, Hp).astype(jnp.float32)

    # --- Hoisted input projection for ALL timesteps: one big bf16 MXU matmul ---
    wiT = jnp.transpose(w_ih3, (2, 0, 1)).reshape(E, 3 * Hp).astype(jnp.bfloat16)
    gi = jnp.einsum('sbe,eg->sbg', x.astype(jnp.bfloat16), wiT,
                    preferred_element_type=jnp.float32) + bias_folded
    gi = gi.astype(jnp.bfloat16)                 # streamed to the kernel in bf16

    whT = jnp.transpose(w_hh3, (2, 0, 1)).reshape(Hp, 3 * Hp).astype(jnp.bfloat16)

    # --- Time blocking; pad the tail with exact identity steps (z saturates) ---
    assert B % num_batch_blocks == 0
    b_block = B // num_batch_blocks
    if t_block is None:
        t_block = _select_t_block(S, b_block, Hp, seq_out)
    t_block = max(1, min(t_block, S))
    n_steps = pl.cdiv(S, t_block)
    Sp = n_steps * t_block
    if Sp != S:
        pad = jnp.zeros((Sp - S, B, 3 * Hp), jnp.bfloat16)
        pad = pad.at[:, :, Hp:2 * Hp].set(30000.0)   # z -> 1  =>  h_new == h
        gi = jnp.concatenate([gi, pad], axis=0)

    kernel = functools.partial(_gru_recurrence_kernel, hidden_size=Hp,
                               t_block=t_block, unroll=min(8, t_block),
                               seq_out=seq_out)

    # Constant (index-map) operands: single-buffer them — double buffering the
    # (Hp, 3Hp) weights buys nothing and can blow v7x's 64 MiB VMEM at large H.
    const_kwargs = ({"pipeline_mode": pl.Buffered(1)}
                    if single_buffer_weights else {})
    in_specs = [
        pl.BlockSpec((t_block, b_block, 3 * Hp), lambda b, s: (s, b, 0)),
        pl.BlockSpec((Hp, 3 * Hp), lambda b, s: (0, 0), **const_kwargs),
        pl.BlockSpec((1, Hp), lambda b, s: (0, 0), **const_kwargs),
    ]
    if seq_out:
        out_shape = jax.ShapeDtypeStruct((Sp, B, Hp), jnp.float32)
        out_spec = pl.BlockSpec((t_block, b_block, Hp), lambda b, s: (s, b, 0))
    else:
        # Final-hidden-only output: constant index along the time axis keeps the
        # block resident in VMEM; no per-step HBM writeback.
        out_shape = jax.ShapeDtypeStruct((B, Hp), jnp.float32)
        out_spec = pl.BlockSpec((b_block, Hp), lambda b, s: (b, 0))

    # VMEM budget: 2x gi block + out block(s) + weights + scratch (+ headroom).
    gi_bytes = 2 * t_block * b_block * 3 * Hp * 2
    out_bytes = 2 * (t_block if seq_out else 1) * b_block * Hp * 4
    w_bytes = (1 if single_buffer_weights else 2) * (Hp * 3 * Hp * 2 + 8 * 128 * 4)
    footprint = gi_bytes + out_bytes + w_bytes + b_block * Hp * 4
    vmem_limit = int(min(64 * 2 ** 20, max(32 * 2 ** 20, 2 * footprint)))

    out = pl.pallas_call(
        kernel,
        out_shape=out_shape,
        grid_spec=pltpu.PrefetchScalarGridSpec(
            num_scalar_prefetch=0,
            grid=(num_batch_blocks, n_steps),        # batch blocks x time blocks
            in_specs=in_specs,
            out_specs=out_spec,
            scratch_shapes=[pltpu.VMEM((b_block, Hp), jnp.float32)],
        ),
        compiler_params=pltpu.CompilerParams(
            # Batch blocks are independent (megacore on v7x); time is serial.
            dimension_semantics=("parallel", "arbitrary"),
            vmem_limit_bytes=vmem_limit),
    )(gi, whT, bhn)

    return out[:S] if seq_out else out


def init_params(key, input_size, embedding_size, hidden_size, nr_layers):
    """Deterministic parameter init mirroring nn.Embedding + nn.GRU shapes."""
    keys = jax.random.split(key, 1 + 4 * nr_layers)
    params = {}
    params["embedding"] = jax.random.normal(
        keys[0], (input_size, embedding_size), jnp.float32)  # nn.Embedding weight
    bound = 1.0 / jnp.sqrt(hidden_size)
    layers = []
    for l in range(nr_layers):
        in_dim = embedding_size if l == 0 else hidden_size
        k = keys[1 + 4 * l: 1 + 4 * (l + 1)]
        w_ih = jax.random.uniform(k[0], (3 * hidden_size, in_dim),
                                  jnp.float32, -bound, bound)
        w_hh = jax.random.uniform(k[1], (3 * hidden_size, hidden_size),
                                  jnp.float32, -bound, bound)
        b_ih = jax.random.uniform(k[2], (3 * hidden_size,), jnp.float32, -bound, bound)
        b_hh = jax.random.uniform(k[3], (3 * hidden_size,), jnp.float32, -bound, bound)
        layers.append((w_ih, w_hh, b_ih, b_hh))
    params["layers"] = layers
    return params


def gru_encoder_forward(params, index_vector, *, t_block=None,
                        single_buffer_weights=True):
    """Matches GRUEncoder.forward: returns `hidden` of shape (L, B, H)."""
    emb = jnp.take(params["embedding"], index_vector, axis=0)  # (S, B, E)
    # TODO(synk): train-mode (stochastic) dropout on the embedding / between
    # layers is not implemented; eval-mode identity semantics only.
    S, B, E = emb.shape

    # Pad the batch once to 8 sublanes; with >= 16 rows, split into two blocks so
    # the leading 'parallel' grid axis can be sharded across v7x's 2 TensorCores.
    if _round_up(B, 8) >= 16:
        Bp, num_batch_blocks = _round_up(B, 16), 2
    else:
        Bp, num_batch_blocks = _round_up(B, 8), 1
    x = jnp.pad(emb, ((0, 0), (0, Bp - B), (0, 0))) if Bp != B else emb

    n_layers = len(params["layers"])
    hiddens = []
    for li, (w_ih, w_hh, b_ih, b_hh) in enumerate(params["layers"]):
        H = w_hh.shape[1]
        last = li == n_layers - 1
        out = gru_layer(x, w_ih, w_hh, b_ih, b_hh,
                        num_batch_blocks=num_batch_blocks,
                        seq_out=not last, t_block=t_block,
                        single_buffer_weights=single_buffer_weights)
        if last:
            hiddens.append(out[:, :H])        # (Bp, H): final hidden, last layer
        else:
            hiddens.append(out[-1, :, :H])    # final hidden of this layer
            x = out[..., :H]                  # sequence output feeds the next layer
            # inter-layer dropout (eval) = identity
    hidden = jnp.stack(hiddens, axis=0)       # (L, Bp, H)
    return hidden[:, :B, :]


def _reference_forward_f32(params, index_vector):
    """Pure f32 lax.scan GRU (PyTorch nn.GRU eval semantics)."""
    x = jnp.take(params["embedding"], index_vector, axis=0)
    hiddens = []
    for (w_ih, w_hh, b_ih, b_hh) in params["layers"]:
        H = w_ih.shape[0] // 3
        h0 = jnp.zeros((x.shape[1], H), jnp.float32)

        def step(h, xt, w_ih=w_ih, w_hh=w_hh, b_ih=b_ih, b_hh=b_hh, H=H):
            gi = xt @ w_ih.T + b_ih
            gh = h @ w_hh.T + b_hh
            r = jax.nn.sigmoid(gi[:, :H] + gh[:, :H])
            z = jax.nn.sigmoid(gi[:, H:2 * H] + gh[:, H:2 * H])
            n = jnp.tanh(gi[:, 2 * H:] + r * gh[:, 2 * H:])
            h_new = (1.0 - z) * n + z * h
            return h_new, h_new

        hN, outs = lax.scan(step, h0, x)
        hiddens.append(hN)
        x = outs
    return jnp.stack(hiddens, axis=0)


def _reference_forward_mixed(params, index_vector):
    """lax.scan reference mirroring the kernel's bf16/f32 mixed precision."""
    x = jnp.take(params["embedding"], index_vector, axis=0)
    hiddens = []
    for (w_ih, w_hh, b_ih, b_hh) in params["layers"]:
        H = w_ih.shape[0] // 3
        bias = b_ih + jnp.concatenate([b_hh[:2 * H], jnp.zeros((H,), jnp.float32)])
        gi = jnp.einsum('sbe,eg->sbg', x.astype(jnp.bfloat16),
                        w_ih.T.astype(jnp.bfloat16),
                        preferred_element_type=jnp.float32) + bias
        gi = gi.astype(jnp.bfloat16).astype(jnp.float32)
        whT = w_hh.T.astype(jnp.bfloat16)
        bhn = b_hh[2 * H:]
        h0 = jnp.zeros((x.shape[1], H), jnp.float32)

        def step(h, git, whT=whT, bhn=bhn, H=H):
            gh = jnp.dot(h.astype(jnp.bfloat16), whT,
                         preferred_element_type=jnp.float32)
            r = jax.nn.sigmoid(git[:, :H] + gh[:, :H])
            z = jax.nn.sigmoid(git[:, H:2 * H] + gh[:, H:2 * H])
            n = jnp.tanh(git[:, 2 * H:] + r * (gh[:, 2 * H:] + bhn))
            h_new = (1.0 - z) * n + z * h
            return h_new, h_new

        hN, outs = lax.scan(step, h0, gi)
        hiddens.append(hN)
        x = outs
    return jnp.stack(hiddens, axis=0)


if __name__ == "__main__":
    # Small config: vocab=32, embedding=32, hidden=32, layers=2, dropout=0.1
    input_size, embedding_size, hidden_size, nr_layers = 32, 32, 32, 2
    S, B = 8, 2

    key = jax.random.PRNGKey(0)
    pkey, ikey = jax.random.split(key)
    params = init_params(pkey, input_size, embedding_size, hidden_size, nr_layers)
    index_vector = jax.random.randint(ikey, (S, B), 0, input_size, dtype=jnp.int32)

    fwd = jax.jit(gru_encoder_forward)
    try:
        hidden = jax.block_until_ready(fwd(params, index_vector))
    except Exception:
        # Fallback if single-buffered constant operands (pl.Buffered(1)) are not
        # supported by this jax/Mosaic build: use default double buffering.
        fwd = jax.jit(functools.partial(gru_encoder_forward,
                                        single_buffer_weights=False))
        hidden = jax.block_until_ready(fwd(params, index_vector))

    assert hidden.shape == (nr_layers, B, hidden_size)

    ref_mixed = _reference_forward_mixed(params, index_vector)   # same precision recipe
    ref_f32 = _reference_forward_f32(params, index_vector)        # PyTorch f32 semantics
    assert jnp.allclose(hidden, ref_mixed, atol=5e-3), \
        float(jnp.max(jnp.abs(hidden - ref_mixed)))
    assert jnp.allclose(hidden, ref_f32, atol=5e-2), \
        float(jnp.max(jnp.abs(hidden - ref_f32)))

    print("KERNEL_OK")
</pallas_src>

<mosaic_0001>
module attributes {stable_mosaic.version = 11 : i64} {
  func.func @_gru_recurrence_kernel(%arg0: i32, %arg1: i32, %arg2: memref<8x8x384xbf16, #tpu.memory_space<vmem>>, %arg3: memref<128x384xbf16, #tpu.memory_space<vmem>>, %arg4: memref<1x128xf32, #tpu.memory_space<vmem>>, %arg5: memref<8x8x128xf32, #tpu.memory_space<vmem>>, %arg6: memref<8x128xf32, #tpu.memory_space<vmem>>) attributes {dimension_semantics = [#tpu.dimension_semantics<parallel>, #tpu.dimension_semantics<arbitrary>], iteration_bounds = array<i64: 1, 1>, scalar_prefetch = 0 : i64, scratch_operands = 1 : i64, tpu.core_type = #tpu.core_type<tc>, window_params = [{transform_indices = @transform_0, window_bounds = array<i64: 8, 8, 384>}, {pipeline_mode = #tpu.pipeline_mode<synchronous>, transform_indices = @transform_1, window_bounds = array<i64: 128, 384>}, {pipeline_mode = #tpu.pipeline_mode<synchronous>, transform_indices = @transform_2, window_bounds = array<i64: 1, 128>}, {transform_indices = @transform_3, window_bounds = array<i64: 8, 8, 128>}]} {
    %c0_i32 = arith.constant 0 : i32
    %0 = arith.cmpi eq, %arg1, %c0_i32 : i32
    %1 = arith.extui %0 : i1 to i32
    %c0_i32_0 = arith.constant 0 : i32
    %2 = arith.cmpi ne, %1, %c0_i32_0 : i32
    scf.if %2 {
      %cst_64 = arith.constant 0.000000e+00 : f32
      %257 = vector.broadcast %cst_64 : f32 to vector<8x128xf32>
      %c0_65 = arith.constant 0 : index
      %c0_66 = arith.constant 0 : index
      %258 = vector.load %arg6[%c0_65, %c0_66] : memref<8x128xf32, #tpu.memory_space<vmem>>, vector<8x128xf32>
      tpu.vector_store %arg6[%c0_65, %c0_66], %257 {strides = array<i32>} : memref<8x128xf32, #tpu.memory_space<vmem>>, vector<8x128xf32>,
    } else {
    }
    %c0 = arith.constant 0 : index
    %c0_1 = arith.constant 0 : index
    %3 = vector.load %arg3[%c0, %c0_1] : memref<128x384xbf16, #tpu.memory_space<vmem>>, vector<128x384xbf16>
    %c0_2 = arith.constant 0 : index
    %c0_3 = arith.constant 0 : index
    %4 = vector.load %arg4[%c0_2, %c0_3] : memref<1x128xf32, #tpu.memory_space<vmem>>, vector<1x128xf32>
    %5 = vector.shape_cast %4 : vector<1x128xf32> to vector<1x128xf32>
    %6 = vector.broadcast %5 : vector<1x128xf32> to vector<8x128xf32>
    %c0_4 = arith.constant 0 : index
    %c0_5 = arith.constant 0 : index
    %7 = vector.load %arg6[%c0_4, %c0_5] : memref<8x128xf32, #tpu.memory_space<vmem>>, vector<8x128xf32>
    %c0_i32_6 = arith.constant 0 : i32
    %8 = arith.index_cast %c0_i32_6 : i32 to index
    %c0_7 = arith.constant 0 : index
    %c0_8 = arith.constant 0 : index
    %9 = vector.load %arg2[%8, %c0_7, %c0_8] : memref<8x8x384xbf16, #tpu.memory_space<vmem>>, vector<1x8x384xbf16>
    %10 = vector.shape_cast %9 : vector<1x8x384xbf16> to vector<8x384xbf16>
    %11 = arith.extf %10 : vector<8x384xbf16> to vector<8x384xf32>
    %12 = arith.truncf %7 : vector<8x128xf32> to vector<8x128xbf16>
    %cst = arith.constant dense<0.000000e+00> : vector<8x384xf32>
    %13 = tpu.matmul %12, %3, %cst {dimension_numbers = #tpu.dot_dimension_numbers<[1], [0], [0], [1], [0, 0, 1, 1], [], []>} : vector<8x128xbf16>, vector<128x384xbf16>, vector<8x384xf32> -> vector<8x384xf32>
    %14 = vector.extract_strided_slice %11 {offsets = [0, 0], sizes = [8, 256], strides = [1, 1]} : vector<8x384xf32> to vector<8x256xf32>
    %15 = vector.extract_strided_slice %13 {offsets = [0, 0], sizes = [8, 256], strides = [1, 1]} : vector<8x384xf32> to vector<8x256xf32>
    %16 = arith.addf %14, %15 : vector<8x256xf32>
    %17 = arith.negf %16 : vector<8x256xf32>
    %18 = math.exp %17 : vector<8x256xf32>
    %cst_9 = arith.constant 1.000000e+00 : f32
    %19 = vector.broadcast %cst_9 : f32 to vector<8x256xf32>
    %20 = arith.addf %19, %18 : vector<8x256xf32>
    %21 = arith.divf %19, %20 : vector<8x256xf32>
    %22 = vector.extract_strided_slice %21 {offsets = [0, 0], sizes = [8, 128], strides = [1, 1]} : vector<8x256xf32> to vector<8x128xf32>
    %23 = vector.extract_strided_slice %21 {offsets = [0, 128], sizes = [8, 128], strides = [1, 1]} : vector<8x256xf32> to vector<8x128xf32>
    %24 = vector.extract_strided_slice %11 {offsets = [0, 256], sizes = [8, 128], strides = [1, 1]} : vector<8x384xf32> to vector<8x128xf32>
    %25 = vector.extract_strided_slice %13 {offsets = [0, 256], sizes = [8, 128], strides = [1, 1]} : vector<8x384xf32> to vector<8x128xf32>
    %26 = arith.addf %25, %6 : vector<8x128xf32>
    %27 = arith.mulf %22, %26 : vector<8x128xf32>
    %28 = arith.addf %24, %27 : vector<8x128xf32>
    %29 = math.tanh %28 : vector<8x128xf32>
    %cst_10 = arith.constant 1.000000e+00 : f32
    %30 = vector.broadcast %cst_10 : f32 to vector<8x128xf32>
    %31 = arith.subf %30, %23 : vector<8x128xf32>
    %32 = arith.mulf %31, %29 : vector<8x128xf32>
    %33 = arith.mulf %23, %7 : vector<8x128xf32>
    %34 = arith.addf %32, %33 : vector<8x128xf32>
    %35 = arith.index_cast %c0_i32_6 : i32 to index
    %c0_11 = arith.constant 0 : index
    %c0_12 = arith.constant 0 : index
    %36 = vector.load %arg5[%35, %c0_11, %c0_12] : memref<8x8x128xf32, #tpu.memory_space<vmem>>, vector<1x8x128xf32>
    %37 = vector.shape_cast %36 : vector<1x8x128xf32> to vector<8x128xf32>
    %38 = vector.shape_cast %34 : vector<8x128xf32> to vector<1x8x128xf32>
    tpu.vector_store %arg5[%35, %c0_11, %c0_12], %38 {strides = array<i32>} : memref<8x8x128xf32, #tpu.memory_space<vmem>>, vector<1x8x128xf32>,
    %c1_i32 = arith.constant 1 : i32
    %39 = arith.index_cast %c1_i32 : i32 to index
    %c0_13 = arith.constant 0 : index
    %c0_14 = arith.constant 0 : index
    %40 = vector.load %arg2[%39, %c0_13, %c0_14] : memref<8x8x384xbf16, #tpu.memory_space<vmem>>, vector<1x8x384xbf16>
    %41 = vector.shape_cast %40 : vector<1x8x384xbf16> to vector<8x384xbf16>
    %42 = arith.extf %41 : vector<8x384xbf16> to vector<8x384xf32>
    %43 = arith.truncf %34 : vector<8x128xf32> to vector<8x128xbf16>
    %cst_15 = arith.constant dense<0.000000e+00> : vector<8x384xf32>
    %44 = tpu.matmul %43, %3, %cst_15 {dimension_numbers = #tpu.dot_dimension_numbers<[1], [0], [0], [1], [0, 0, 1, 1], [], []>} : vector<8x128xbf16>, vector<128x384xbf16>, vector<8x384xf32> -> vector<8x384xf32>
    %45 = vector.extract_strided_slice %42 {offsets = [0, 0], sizes = [8, 256], strides = [1, 1]} : vector<8x384xf32> to vector<8x256xf32>
    %46 = vector.extract_strided_slice %44 {offsets = [0, 0], sizes = [8, 256], strides = [1, 1]} : vector<8x384xf32> to vector<8x256xf32>
    %47 = arith.addf %45, %46 : vector<8x256xf32>
    %48 = arith.negf %47 : vector<8x256xf32>
    %49 = math.exp %48 : vector<8x256xf32>
    %cst_16 = arith.constant 1.000000e+00 : f32
    %50 = vector.broadcast %cst_16 : f32 to vector<8x256xf32>
    %51 = arith.addf %50, %49 : vector<8x256xf32>
    %52 = arith.divf %50, %51 : vector<8x256xf32>
    %53 = vector.extract_strided_slice %52 {offsets = [0, 0], sizes = [8, 128], strides = [1, 1]} : vector<8x256xf32> to vector<8x128xf32>
    %54 = vector.extract_strided_slice %52 {offsets = [0, 128], sizes = [8, 128], strides = [1, 1]} : vector<8x256xf32> to vector<8x128xf32>
    %55 = vector.extract_strided_slice %42 {offsets = [0, 256], sizes = [8, 128], strides = [1, 1]} : vector<8x384xf32> to vector<8x128xf32>
    %56 = vector.extract_strided_slice %44 {offsets = [0, 256], sizes = [8, 128], strides = [1, 1]} : vector<8x384xf32> to vector<8x128xf32>
    %57 = arith.addf %56, %6 : vector<8x128xf32>
    %58 = arith.mulf %53, %57 : vector<8x128xf32>
    %59 = arith.addf %55, %58 : vector<8x128xf32>
    %60 = math.tanh %59 : vector<8x128xf32>
    %cst_17 = arith.constant 1.000000e+00 : f32
    %61 = vector.broadcast %cst_17 : f32 to vector<8x128xf32>
    %62 = arith.subf %61, %54 : vector<8x128xf32>
    %63 = arith.mulf %62, %60 : vector<8x128xf32>
    %64 = arith.mulf %54, %34 : vector<8x128xf32>
    %65 = arith.addf %63, %64 : vector<8x128xf32>
    %66 = arith.index_cast %c1_i32 : i32 to index
    %c0_18 = arith.constant 0 : index
    %c0_19 = arith.constant 0 : index
    %67 = vector.load %arg5[%66, %c0_18, %c0_19] : memref<8x8x128xf32, #tpu.memory_space<vmem>>, vector<1x8x128xf32>
    %68 = vector.shape_cast %67 : vector<1x8x128xf32> to vector<8x128xf32>
    %69 = vector.shape_cast %65 : vector<8x128xf32> to vector<1x8x128xf32>
    tpu.vector_store %arg5[%66, %c0_18, %c0_19], %69 {strides = array<i32>} : memref<8x8x128xf32, #tpu.memory_space<vmem>>, vector<1x8x128xf32>,
    %c2_i32 = arith.constant 2 : i32
    %70 = arith.index_cast %c2_i32 : i32 to index
    %c0_20 = arith.constant 0 : index
    %c0_21 = arith.constant 0 : index
    %71 = vector.load %arg2[%70, %c0_20, %c0_21] : memref<8x8x384xbf16, #tpu.memory_space<vmem>>, vector<1x8x384xbf16>
    %72 = vector.shape_cast %71 : vector<1x8x384xbf16> to vector<8x384xbf16>
    %73 = arith.extf %72 : vector<8x384xbf16> to vector<8x384xf32>
    %74 = arith.truncf %65 : vector<8x128xf32> to vector<8x128xbf16>
    %cst_22 = arith.constant dense<0.000000e+00> : vector<8x384xf32>
    %75 = tpu.matmul %74, %3, %cst_22 {dimension_numbers = #tpu.dot_dimension_numbers<[1], [0], [0], [1], [0, 0, 1, 1], [], []>} : vector<8x128xbf16>, vector<128x384xbf16>, vector<8x384xf32> -> vector<8x384xf32>
    %76 = vector.extract_strided_slice %73 {offsets = [0, 0], sizes = [8, 256], strides = [1, 1]} : vector<8x384xf32> to vector<8x256xf32>
    %77 = vector.extract_strided_slice %75 {offsets = [0, 0], sizes = [8, 256], strides = [1, 1]} : vector<8x384xf32> to vector<8x256xf32>
    %78 = arith.addf %76, %77 : vector<8x256xf32>
    %79 = arith.negf %78 : vector<8x256xf32>
    %80 = math.exp %79 : vector<8x256xf32>
    %cst_23 = arith.constant 1.000000e+00 : f32
    %81 = vector.broadcast %cst_23 : f32 to vector<8x256xf32>
    %82 = arith.addf %81, %80 : vector<8x256xf32>
    %83 = arith.divf %81, %82 : vector<8x256xf32>
    %84 = vector.extract_strided_slice %83 {offsets = [0, 0], sizes = [8, 128], strides = [1, 1]} : vector<8x256xf32> to vector<8x128xf32>
    %85 = vector.extract_strided_slice %83 {offsets = [0, 128], sizes = [8, 128], strides = [1, 1]} : vector<8x256xf32> to vector<8x128xf32>
    %86 = vector.extract_strided_slice %73 {offsets = [0, 256], sizes = [8, 128], strides = [1, 1]} : vector<8x384xf32> to vector<8x128xf32>
    %87 = vector.extract_strided_slice %75 {offsets = [0, 256], sizes = [8, 128], strides = [1, 1]} : vector<8x384xf32> to vector<8x128xf32>
    %88 = arith.addf %87, %6 : vector<8x128xf32>
    %89 = arith.mulf %84, %88 : vector<8x128xf32>
    %90 = arith.addf %86, %89 : vector<8x128xf32>
    %91 = math.tanh %90 : vector<8x128xf32>
    %cst_24 = arith.constant 1.000000e+00 : f32
    %92 = vector.broadcast %cst_24 : f32 to vector<8x128xf32>
    %93 = arith.subf %92, %85 : vector<8x128xf32>
    %94 = arith.mulf %93, %91 : vector<8x128xf32>
    %95 = arith.mulf %85, %65 : vector<8x128xf32>
    %96 = arith.addf %94, %95 : vector<8x128xf32>
    %97 = arith.index_cast %c2_i32 : i32 to index
    %c0_25 = arith.constant 0 : index
    %c0_26 = arith.constant 0 : index
    %98 = vector.load %arg5[%97, %c0_25, %c0_26] : memref<8x8x128xf32, #tpu.memory_space<vmem>>, vector<1x8x128xf32>
    %99 = vector.shape_cast %98 : vector<1x8x128xf32> to vector<8x128xf32>
    %100 = vector.shape_cast %96 : vector<8x128xf32> to vector<1x8x128xf32>
    tpu.vector_store %arg5[%97, %c0_25, %c0_26], %100 {strides = array<i32>} : memref<8x8x128xf32, #tpu.memory_space<vmem>>, vector<1x8x128xf32>,
    %c3_i32 = arith.constant 3 : i32
    %101 = arith.index_cast %c3_i32 : i32 to index
    %c0_27 = arith.constant 0 : index
    %c0_28 = arith.constant 0 : index
    %102 = vector.load %arg2[%101, %c0_27, %c0_28] : memref<8x8x384xbf16, #tpu.memory_space<vmem>>, vector<1x8x384xbf16>
    %103 = vector.shape_cast %102 : vector<1x8x384xbf16> to vector<8x384xbf16>
    %104 = arith.extf %103 : vector<8x384xbf16> to vector<8x384xf32>
    %105 = arith.truncf %96 : vector<8x128xf32> to vector<8x128xbf16>
    %cst_29 = arith.constant dense<0.000000e+00> : vector<8x384xf32>
    %106 = tpu.matmul %105, %3, %cst_29 {dimension_numbers = #tpu.dot_dimension_numbers<[1], [0], [0], [1], [0, 0, 1, 1], [], []>} : vector<8x128xbf16>, vector<128x384xbf16>, vector<8x384xf32> -> vector<8x384xf32>
    %107 = vector.extract_strided_slice %104 {offsets = [0, 0], sizes = [8, 256], strides = [1, 1]} : vector<8x384xf32> to vector<8x256xf32>
    %108 = vector.extract_strided_slice %106 {offsets = [0, 0], sizes = [8, 256], strides = [1, 1]} : vector<8x384xf32> to vector<8x256xf32>
    %109 = arith.addf %107, %108 : vector<8x256xf32>
    %110 = arith.negf %109 : vector<8x256xf32>
    %111 = math.exp %110 : vector<8x256xf32>
    %cst_30 = arith.constant 1.000000e+00 : f32
    %112 = vector.broadcast %cst_30 : f32 to vector<8x256xf32>
    %113 = arith.addf %112, %111 : vector<8x256xf32>
    %114 = arith.divf %112, %113 : vector<8x256xf32>
    %115 = vector.extract_strided_slice %114 {offsets = [0, 0], sizes = [8, 128], strides = [1, 1]} : vector<8x256xf32> to vector<8x128xf32>
    %116 = vector.extract_strided_slice %114 {offsets = [0, 128], sizes = [8, 128], strides = [1, 1]} : vector<8x256xf32> to vector<8x128xf32>
    %117 = vector.extract_strided_slice %104 {offsets = [0, 256], sizes = [8, 128], strides = [1, 1]} : vector<8x384xf32> to vector<8x128xf32>
    %118 = vector.extract_strided_slice %106 {offsets = [0, 256], sizes = [8, 128], strides = [1, 1]} : vector<8x384xf32> to vector<8x128xf32>
    %119 = arith.addf %118, %6 : vector<8x128xf32>
    %120 = arith.mulf %115, %119 : vector<8x128xf32>
    %121 = arith.addf %117, %120 : vector<8x128xf32>
    %122 = math.tanh %121 : vector<8x128xf32>
    %cst_31 = arith.constant 1.000000e+00 : f32
    %123 = vector.broadcast %cst_31 : f32 to vector<8x128xf32>
    %124 = arith.subf %123, %116 : vector<8x128xf32>
    %125 = arith.mulf %124, %122 : vector<8x128xf32>
    %126 = arith.mulf %116, %96 : vector<8x128xf32>
    %127 = arith.addf %125, %126 : vector<8x128xf32>
    %128 = arith.index_cast %c3_i32 : i32 to index
    %c0_32 = arith.constant 0 : index
    %c0_33 = arith.constant 0 : index
    %129 = vector.load %arg5[%128, %c0_32, %c0_33] : memref<8x8x128xf32, #tpu.memory_space<vmem>>, vector<1x8x128xf32>
    %130 = vector.shape_cast %129 : vector<1x8x128xf32> to vector<8x128xf32>
    %131 = vector.shape_cast %127 : vector<8x128xf32> to vector<1x8x128xf32>
    tpu.vector_store %arg5[%128, %c0_32, %c0_33], %131 {strides = array<i32>} : memref<8x8x128xf32, #tpu.memory_space<vmem>>, vector<1x8x128xf32>,
    %c4_i32 = arith.constant 4 : i32
    %132 = arith.index_cast %c4_i32 : i32 to index
    %c0_34 = arith.constant 0 : index
    %c0_35 = arith.constant 0 : index
    %133 = vector.load %arg2[%132, %c0_34, %c0_35] : memref<8x8x384xbf16, #tpu.memory_space<vmem>>, vector<1x8x384xbf16>
    %134 = vector.shape_cast %133 : vector<1x8x384xbf16> to vector<8x384xbf16>
    %135 = arith.extf %134 : vector<8x384xbf16> to vector<8x384xf32>
    %136 = arith.truncf %127 : vector<8x128xf32> to vector<8x128xbf16>
    %cst_36 = arith.constant dense<0.000000e+00> : vector<8x384xf32>
    %137 = tpu.matmul %136, %3, %cst_36 {dimension_numbers = #tpu.dot_dimension_numbers<[1], [0], [0], [1], [0, 0, 1, 1], [], []>} : vector<8x128xbf16>, vector<128x384xbf16>, vector<8x384xf32> -> vector<8x384xf32>
    %138 = vector.extract_strided_slice %135 {offsets = [0, 0], sizes = [8, 256], strides = [1, 1]} : vector<8x384xf32> to vector<8x256xf32>
    %139 = vector.extract_strided_slice %137 {offsets = [0, 0], sizes = [8, 256], strides = [1, 1]} : vector<8x384xf32> to vector<8x256xf32>
    %140 = arith.addf %138, %139 : vector<8x256xf32>
    %141 = arith.negf %140 : vector<8x256xf32>
    %142 = math.exp %141 : vector<8x256xf32>
    %cst_37 = arith.constant 1.000000e+00 : f32
    %143 = vector.broadcast %cst_37 : f32 to vector<8x256xf32>
    %144 = arith.addf %143, %142 : vector<8x256xf32>
    %145 = arith.divf %143, %144 : vector<8x256xf32>
    %146 = vector.extract_strided_slice %145 {offsets = [0, 0], sizes = [8, 128], strides = [1, 1]} : vector<8x256xf32> to vector<8x128xf32>
    %147 = vector.extract_strided_slice %145 {offsets = [0, 128], sizes = [8, 128], strides = [1, 1]} : vector<8x256xf32> to vector<8x128xf32>
    %148 = vector.extract_strided_slice %135 {offsets = [0, 256], sizes = [8, 128], strides = [1, 1]} : vector<8x384xf32> to vector<8x128xf32>
    %149 = vector.extract_strided_slice %137 {offsets = [0, 256], sizes = [8, 128], strides = [1, 1]} : vector<8x384xf32> to vector<8x128xf32>
    %150 = arith.addf %149, %6 : vector<8x128xf32>
    %151 = arith.mulf %146, %150 : vector<8x128xf32>
    %152 = arith.addf %148, %151 : vector<8x128xf32>
    %153 = math.tanh %152 : vector<8x128xf32>
    %cst_38 = arith.constant 1.000000e+00 : f32
    %154 = vector.broadcast %cst_38 : f32 to vector<8x128xf32>
    %155 = arith.subf %154, %147 : vector<8x128xf32>
    %156 = arith.mulf %155, %153 : vector<8x128xf32>
    %157 = arith.mulf %147, %127 : vector<8x128xf32>
    %158 = arith.addf %156, %157 : vector<8x128xf32>
    %159 = arith.index_cast %c4_i32 : i32 to index
    %c0_39 = arith.constant 0 : index
    %c0_40 = arith.constant 0 : index
    %160 = vector.load %arg5[%159, %c0_39, %c0_40] : memref<8x8x128xf32, #tpu.memory_space<vmem>>, vector<1x8x128xf32>
    %161 = vector.shape_cast %160 : vector<1x8x128xf32> to vector<8x128xf32>
    %162 = vector.shape_cast %158 : vector<8x128xf32> to vector<1x8x128xf32>
    tpu.vector_store %arg5[%159, %c0_39, %c0_40], %162 {strides = array<i32>} : memref<8x8x128xf32, #tpu.memory_space<vmem>>, vector<1x8x128xf32>,
    %c5_i32 = arith.constant 5 : i32
    %163 = arith.index_cast %c5_i32 : i32 to index
    %c0_41 = arith.constant 0 : index
    %c0_42 = arith.constant 0 : index
    %164 = vector.load %arg2[%163, %c0_41, %c0_42] : memref<8x8x384xbf16, #tpu.memory_space<vmem>>, vector<1x8x384xbf16>
    %165 = vector.shape_cast %164 : vector<1x8x384xbf16> to vector<8x384xbf16>
    %166 = arith.extf %165 : vector<8x384xbf16> to vector<8x384xf32>
    %167 = arith.truncf %158 : vector<8x128xf32> to vector<8x128xbf16>
    %cst_43 = arith.constant dense<0.000000e+00> : vector<8x384xf32>
    %168 = tpu.matmul %167, %3, %cst_43 {dimension_numbers = #tpu.dot_dimension_numbers<[1], [0], [0], [1], [0, 0, 1, 1], [], []>} : vector<8x128xbf16>, vector<128x384xbf16>, vector<8x384xf32> -> vector<8x384xf32>
    %169 = vector.extract_strided_slice %166 {offsets = [0, 0], sizes = [8, 256], strides = [1, 1]} : vector<8x384xf32> to vector<8x256xf32>
    %170 = vector.extract_strided_slice %168 {offsets = [0, 0], sizes = [8, 256], strides = [1, 1]} : vector<8x384xf32> to vector<8x256xf32>
    %171 = arith.addf %169, %170 : vector<8x256xf32>
    %172 = arith.negf %171 : vector<8x256xf32>
    %173 = math.exp %172 : vector<8x256xf32>
    %cst_44 = arith.constant 1.000000e+00 : f32
    %174 = vector.broadcast %cst_44 : f32 to vector<8x256xf32>
    %175 = arith.addf %174, %173 : vector<8x256xf32>
    %176 = arith.divf %174, %175 : vector<8x256xf32>
    %177 = vector.extract_strided_slice %176 {offsets = [0, 0], sizes = [8, 128], strides = [1, 1]} : vector<8x256xf32> to vector<8x128xf32>
    %178 = vector.extract_strided_slice %176 {offsets = [0, 128], sizes = [8, 128], strides = [1, 1]} : vector<8x256xf32> to vector<8x128xf32>
    %179 = vector.extract_strided_slice %166 {offsets = [0, 256], sizes = [8, 128], strides = [1, 1]} : vector<8x384xf32> to vector<8x128xf32>
    %180 = vector.extract_strided_slice %168 {offsets = [0, 256], sizes = [8, 128], strides = [1, 1]} : vector<8x384xf32> to vector<8x128xf32>
    %181 = arith.addf %180, %6 : vector<8x128xf32>
    %182 = arith.mulf %177, %181 : vector<8x128xf32>
    %183 = arith.addf %179, %182 : vector<8x128xf32>
    %184 = math.tanh %183 : vector<8x128xf32>
    %cst_45 = arith.constant 1.000000e+00 : f32
    %185 = vector.broadcast %cst_45 : f32 to vector<8x128xf32>
    %186 = arith.subf %185, %178 : vector<8x128xf32>
    %187 = arith.mulf %186, %184 : vector<8x128xf32>
    %188 = arith.mulf %178, %158 : vector<8x128xf32>
    %189 = arith.addf %187, %188 : vector<8x128xf32>
    %190 = arith.index_cast %c5_i32 : i32 to index
    %c0_46 = arith.constant 0 : index
    %c0_47 = arith.constant 0 : index
    %191 = vector.load %arg5[%190, %c0_46, %c0_47] : memref<8x8x128xf32, #tpu.memory_space<vmem>>, vector<1x8x128xf32>
    %192 = vector.shape_cast %191 : vector<1x8x128xf32> to vector<8x128xf32>
    %193 = vector.shape_cast %189 : vector<8x128xf32> to vector<1x8x128xf32>
    tpu.vector_store %arg5[%190, %c0_46, %c0_47], %193 {strides = array<i32>} : memref<8x8x128xf32, #tpu.memory_space<vmem>>, vector<1x8x128xf32>,
    %c6_i32 = arith.constant 6 : i32
    %194 = arith.index_cast %c6_i32 : i32 to index
    %c0_48 = arith.constant 0 : index
    %c0_49 = arith.constant 0 : index
    %195 = vector.load %arg2[%194, %c0_48, %c0_49] : memref<8x8x384xbf16, #tpu.memory_space<vmem>>, vector<1x8x384xbf16>
    %196 = vector.shape_cast %195 : vector<1x8x384xbf16> to vector<8x384xbf16>
    %197 = arith.extf %196 : vector<8x384xbf16> to vector<8x384xf32>
    %198 = arith.truncf %189 : vector<8x128xf32> to vector<8x128xbf16>
    %cst_50 = arith.constant dense<0.000000e+00> : vector<8x384xf32>
    %199 = tpu.matmul %198, %3, %cst_50 {dimension_numbers = #tpu.dot_dimension_numbers<[1], [0], [0], [1], [0, 0, 1, 1], [], []>} : vector<8x128xbf16>, vector<128x384xbf16>, vector<8x384xf32> -> vector<8x384xf32>
    %200 = vector.extract_strided_slice %197 {offsets = [0, 0], sizes = [8, 256], strides = [1, 1]} : vector<8x384xf32> to vector<8x256xf32>
    %201 = vector.extract_strided_slice %199 {offsets = [0, 0], sizes = [8, 256], strides = [1, 1]} : vector<8x384xf32> to vector<8x256xf32>
    %202 = arith.addf %200, %201 : vector<8x256xf32>
    %203 = arith.negf %202 : vector<8x256xf32>
    %204 = math.exp %203 : vector<8x256xf32>
    %cst_51 = arith.constant 1.000000e+00 : f32
    %205 = vector.broadcast %cst_51 : f32 to vector<8x256xf32>
    %206 = arith.addf %205, %204 : vector<8x256xf32>
    %207 = arith.divf %205, %206 : vector<8x256xf32>
    %208 = vector.extract_strided_slice %207 {offsets = [0, 0], sizes = [8, 128], strides = [1, 1]} : vector<8x256xf32> to vector<8x128xf32>
    %209 = vector.extract_strided_slice %207 {offsets = [0, 128], sizes = [8, 128], strides = [1, 1]} : vector<8x256xf32> to vector<8x128xf32>
    %210 = vector.extract_strided_slice %197 {offsets = [0, 256], sizes = [8, 128], strides = [1, 1]} : vector<8x384xf32> to vector<8x128xf32>
    %211 = vector.extract_strided_slice %199 {offsets = [0, 256], sizes = [8, 128], strides = [1, 1]} : vector<8x384xf32> to vector<8x128xf32>
    %212 = arith.addf %211, %6 : vector<8x128xf32>
    %213 = arith.mulf %208, %212 : vector<8x128xf32>
    %214 = arith.addf %210, %213 : vector<8x128xf32>
    %215 = math.tanh %214 : vector<8x128xf32>
    %cst_52 = arith.constant 1.000000e+00 : f32
    %216 = vector.broadcast %cst_52 : f32 to vector<8x128xf32>
    %217 = arith.subf %216, %209 : vector<8x128xf32>
    %218 = arith.mulf %217, %215 : vector<8x128xf32>
    %219 = arith.mulf %209, %189 : vector<8x128xf32>
    %220 = arith.addf %218, %219 : vector<8x128xf32>
    %221 = arith.index_cast %c6_i32 : i32 to index
    %c0_53 = arith.constant 0 : index
    %c0_54 = arith.constant 0 : index
    %222 = vector.load %arg5[%221, %c0_53, %c0_54] : memref<8x8x128xf32, #tpu.memory_space<vmem>>, vector<1x8x128xf32>
    %223 = vector.shape_cast %222 : vector<1x8x128xf32> to vector<8x128xf32>
    %224 = vector.shape_cast %220 : vector<8x128xf32> to vector<1x8x128xf32>
    tpu.vector_store %arg5[%221, %c0_53, %c0_54], %224 {strides = array<i32>} : memref<8x8x128xf32, #tpu.memory_space<vmem>>, vector<1x8x128xf32>,
    %c7_i32 = arith.constant 7 : i32
    %225 = arith.index_cast %c7_i32 : i32 to index
    %c0_55 = arith.constant 0 : index
    %c0_56 = arith.constant 0 : index
    %226 = vector.load %arg2[%225, %c0_55, %c0_56] : memref<8x8x384xbf16, #tpu.memory_space<vmem>>, vector<1x8x384xbf16>
    %227 = vector.shape_cast %226 : vector<1x8x384xbf16> to vector<8x384xbf16>
    %228 = arith.extf %227 : vector<8x384xbf16> to vector<8x384xf32>
    %229 = arith.truncf %220 : vector<8x128xf32> to vector<8x128xbf16>
    %cst_57 = arith.constant dense<0.000000e+00> : vector<8x384xf32>
    %230 = tpu.matmul %229, %3, %cst_57 {dimension_numbers = #tpu.dot_dimension_numbers<[1], [0], [0], [1], [0, 0, 1, 1], [], []>} : vector<8x128xbf16>, vector<128x384xbf16>, vector<8x384xf32> -> vector<8x384xf32>
    %231 = vector.extract_strided_slice %228 {offsets = [0, 0], sizes = [8, 256], strides = [1, 1]} : vector<8x384xf32> to vector<8x256xf32>
    %232 = vector.extract_strided_slice %230 {offsets = [0, 0], sizes = [8, 256], strides = [1, 1]} : vector<8x384xf32> to vector<8x256xf32>
    %233 = arith.addf %231, %232 : vector<8x256xf32>
    %234 = arith.negf %233 : vector<8x256xf32>
    %235 = math.exp %234 : vector<8x256xf32>
    %cst_58 = arith.constant 1.000000e+00 : f32
    %236 = vector.broadcast %cst_58 : f32 to vector<8x256xf32>
    %237 = arith.addf %236, %235 : vector<8x256xf32>
    %238 = arith.divf %236, %237 : vector<8x256xf32>
    %239 = vector.extract_strided_slice %238 {offsets = [0, 0], sizes = [8, 128], strides = [1, 1]} : vector<8x256xf32> to vector<8x128xf32>
    %240 = vector.extract_strided_slice %238 {offsets = [0, 128], sizes = [8, 128], strides = [1, 1]} : vector<8x256xf32> to vector<8x128xf32>
    %241 = vector.extract_strided_slice %228 {offsets = [0, 256], sizes = [8, 128], strides = [1, 1]} : vector<8x384xf32> to vector<8x128xf32>
    %242 = vector.extract_strided_slice %230 {offsets = [0, 256], sizes = [8, 128], strides = [1, 1]} : vector<8x384xf32> to vector<8x128xf32>
    %243 = arith.addf %242, %6 : vector<8x128xf32>
    %244 = arith.mulf %239, %243 : vector<8x128xf32>
    %245 = arith.addf %241, %244 : vector<8x128xf32>
    %246 = math.tanh %245 : vector<8x128xf32>
    %cst_59 = arith.constant 1.000000e+00 : f32
    %247 = vector.broadcast %cst_59 : f32 to vector<8x128xf32>
    %248 = arith.subf %247, %240 : vector<8x128xf32>
    %249 = arith.mulf %248, %246 : vector<8x128xf32>
    %250 = arith.mulf %240, %220 : vector<8x128xf32>
    %251 = arith.addf %249, %250 : vector<8x128xf32>
    %252 = arith.index_cast %c7_i32 : i32 to index
    %c0_60 = arith.constant 0 : index
    %c0_61 = arith.constant 0 : index
    %253 = vector.load %arg5[%252, %c0_60, %c0_61] : memref<8x8x128xf32, #tpu.memory_space<vmem>>, vector<1x8x128xf32>
    %254 = vector.shape_cast %253 : vector<1x8x128xf32> to vector<8x128xf32>
    %255 = vector.shape_cast %251 : vector<8x128xf32> to vector<1x8x128xf32>
    tpu.vector_store %arg5[%252, %c0_60, %c0_61], %255 {strides = array<i32>} : memref<8x8x128xf32, #tpu.memory_space<vmem>>, vector<1x8x128xf32>,
    %c8_i32 = arith.constant 8 : i32
    %c0_62 = arith.constant 0 : index
    %c0_63 = arith.constant 0 : index
    %256 = vector.load %arg6[%c0_62, %c0_63] : memref<8x128xf32, #tpu.memory_space<vmem>>, vector<8x128xf32>
    tpu.vector_store %arg6[%c0_62, %c0_63], %251 {strides = array<i32>} : memref<8x128xf32, #tpu.memory_space<vmem>>, vector<8x128xf32>,
    return
  }
  func.func @transform_0(%arg0: i32, %arg1: i32) -> (i32, i32, i32) {
    %c0_i32 = arith.constant 0 : i32
    %c0_i32_0 = arith.constant 0 : i32
    return %arg1, %arg0, %c0_i32 : i32, i32, i32
  }
  func.func @transform_1(%arg0: i32, %arg1: i32) -> (i32, i32) {
    %c0_i32 = arith.constant 0 : i32
    %c0_i32_0 = arith.constant 0 : i32
    %c0_i32_1 = arith.constant 0 : i32
    return %c0_i32, %c0_i32_0 : i32, i32
  }
  func.func @transform_2(%arg0: i32, %arg1: i32) -> (i32, i32) {
    %c0_i32 = arith.constant 0 : i32
    %c0_i32_0 = arith.constant 0 : i32
    %c0_i32_1 = arith.constant 0 : i32
    return %c0_i32, %c0_i32_0 : i32, i32
  }
  func.func @transform_3(%arg0: i32, %arg1: i32) -> (i32, i32, i32) {
    %c0_i32 = arith.constant 0 : i32
    %c0_i32_0 = arith.constant 0 : i32
    return %arg1, %arg0, %c0_i32 : i32, i32, i32
  }
}

module attributes {stable_mosaic.version = 11 : i64} {
  func.func @_gru_recurrence_kernel(%arg0: i32, %arg1: i32, %arg2: memref<8x8x384xbf16, #tpu.memory_space<vmem>>, %arg3: memref<128x384xbf16, #tpu.memory_space<vmem>>, %arg4: memref<1x128xf32, #tpu.memory_space<vmem>>, %arg5: memref<8x128xf32, #tpu.memory_space<vmem>>, %arg6: memref<8x128xf32, #tpu.memory_space<vmem>>) attributes {dimension_semantics = [#tpu.dimension_semantics<parallel>, #tpu.dimension_semantics<arbitrary>], iteration_bounds = array<i64: 1, 1>, scalar_prefetch = 0 : i64, scratch_operands = 1 : i64, tpu.core_type = #tpu.core_type<tc>, window_params = [{transform_indices = @transform_0, window_bounds = array<i64: 8, 8, 384>}, {pipeline_mode = #tpu.pipeline_mode<synchronous>, transform_indices = @transform_1, window_bounds = array<i64: 128, 384>}, {pipeline_mode = #tpu.pipeline_mode<synchronous>, transform_indices = @transform_2, window_bounds = array<i64: 1, 128>}, {transform_indices = @transform_3, window_bounds = array<i64: 8, 128>}]} {
    %c0_i32 = arith.constant 0 : i32
    %0 = arith.cmpi eq, %arg1, %c0_i32 : i32
    %1 = arith.extui %0 : i1 to i32
    %c0_i32_0 = arith.constant 0 : i32
    %2 = arith.cmpi ne, %1, %c0_i32_0 : i32
    scf.if %2 {
      %cst_50 = arith.constant 0.000000e+00 : f32
      %226 = vector.broadcast %cst_50 : f32 to vector<8x128xf32>
      %c0_51 = arith.constant 0 : index
      %c0_52 = arith.constant 0 : index
      %227 = vector.load %arg6[%c0_51, %c0_52] : memref<8x128xf32, #tpu.memory_space<vmem>>, vector<8x128xf32>
      tpu.vector_store %arg6[%c0_51, %c0_52], %226 {strides = array<i32>} : memref<8x128xf32, #tpu.memory_space<vmem>>, vector<8x128xf32>,
    } else {
    }
    %c0 = arith.constant 0 : index
    %c0_1 = arith.constant 0 : index
    %3 = vector.load %arg3[%c0, %c0_1] : memref<128x384xbf16, #tpu.memory_space<vmem>>, vector<128x384xbf16>
    %c0_2 = arith.constant 0 : index
    %c0_3 = arith.constant 0 : index
    %4 = vector.load %arg4[%c0_2, %c0_3] : memref<1x128xf32, #tpu.memory_space<vmem>>, vector<1x128xf32>
    %5 = vector.shape_cast %4 : vector<1x128xf32> to vector<1x128xf32>
    %6 = vector.broadcast %5 : vector<1x128xf32> to vector<8x128xf32>
    %c0_4 = arith.constant 0 : index
    %c0_5 = arith.constant 0 : index
    %7 = vector.load %arg6[%c0_4, %c0_5] : memref<8x128xf32, #tpu.memory_space<vmem>>, vector<8x128xf32>
    %c0_i32_6 = arith.constant 0 : i32
    %8 = arith.index_cast %c0_i32_6 : i32 to index
    %c0_7 = arith.constant 0 : index
    %c0_8 = arith.constant 0 : index
    %9 = vector.load %arg2[%8, %c0_7, %c0_8] : memref<8x8x384xbf16, #tpu.memory_space<vmem>>, vector<1x8x384xbf16>
    %10 = vector.shape_cast %9 : vector<1x8x384xbf16> to vector<8x384xbf16>
    %11 = arith.extf %10 : vector<8x384xbf16> to vector<8x384xf32>
    %12 = arith.truncf %7 : vector<8x128xf32> to vector<8x128xbf16>
    %cst = arith.constant dense<0.000000e+00> : vector<8x384xf32>
    %13 = tpu.matmul %12, %3, %cst {dimension_numbers = #tpu.dot_dimension_numbers<[1], [0], [0], [1], [0, 0, 1, 1], [], []>} : vector<8x128xbf16>, vector<128x384xbf16>, vector<8x384xf32> -> vector<8x384xf32>
    %14 = vector.extract_strided_slice %11 {offsets = [0, 0], sizes = [8, 256], strides = [1, 1]} : vector<8x384xf32> to vector<8x256xf32>
    %15 = vector.extract_strided_slice %13 {offsets = [0, 0], sizes = [8, 256], strides = [1, 1]} : vector<8x384xf32> to vector<8x256xf32>
    %16 = arith.addf %14, %15 : vector<8x256xf32>
    %17 = arith.negf %16 : vector<8x256xf32>
    %18 = math.exp %17 : vector<8x256xf32>
    %cst_9 = arith.constant 1.000000e+00 : f32
    %19 = vector.broadcast %cst_9 : f32 to vector<8x256xf32>
    %20 = arith.addf %19, %18 : vector<8x256xf32>
    %21 = arith.divf %19, %20 : vector<8x256xf32>
    %22 = vector.extract_strided_slice %21 {offsets = [0, 0], sizes = [8, 128], strides = [1, 1]} : vector<8x256xf32> to vector<8x128xf32>
    %23 = vector.extract_strided_slice %21 {offsets = [0, 128], sizes = [8, 128], strides = [1, 1]} : vector<8x256xf32> to vector<8x128xf32>
    %24 = vector.extract_strided_slice %11 {offsets = [0, 256], sizes = [8, 128], strides = [1, 1]} : vector<8x384xf32> to vector<8x128xf32>
    %25 = vector.extract_strided_slice %13 {offsets = [0, 256], sizes = [8, 128], strides = [1, 1]} : vector<8x384xf32> to vector<8x128xf32>
    %26 = arith.addf %25, %6 : vector<8x128xf32>
    %27 = arith.mulf %22, %26 : vector<8x128xf32>
    %28 = arith.addf %24, %27 : vector<8x128xf32>
    %29 = math.tanh %28 : vector<8x128xf32>
    %cst_10 = arith.constant 1.000000e+00 : f32
    %30 = vector.broadcast %cst_10 : f32 to vector<8x128xf32>
    %31 = arith.subf %30, %23 : vector<8x128xf32>
    %32 = arith.mulf %31, %29 : vector<8x128xf32>
    %33 = arith.mulf %23, %7 : vector<8x128xf32>
    %34 = arith.addf %32, %33 : vector<8x128xf32>
    %c1_i32 = arith.constant 1 : i32
    %35 = arith.index_cast %c1_i32 : i32 to index
    %c0_11 = arith.constant 0 : index
    %c0_12 = arith.constant 0 : index
    %36 = vector.load %arg2[%35, %c0_11, %c0_12] : memref<8x8x384xbf16, #tpu.memory_space<vmem>>, vector<1x8x384xbf16>
    %37 = vector.shape_cast %36 : vector<1x8x384xbf16> to vector<8x384xbf16>
    %38 = arith.extf %37 : vector<8x384xbf16> to vector<8x384xf32>
    %39 = arith.truncf %34 : vector<8x128xf32> to vector<8x128xbf16>
    %cst_13 = arith.constant dense<0.000000e+00> : vector<8x384xf32>
    %40 = tpu.matmul %39, %3, %cst_13 {dimension_numbers = #tpu.dot_dimension_numbers<[1], [0], [0], [1], [0, 0, 1, 1], [], []>} : vector<8x128xbf16>, vector<128x384xbf16>, vector<8x384xf32> -> vector<8x384xf32>
    %41 = vector.extract_strided_slice %38 {offsets = [0, 0], sizes = [8, 256], strides = [1, 1]} : vector<8x384xf32> to vector<8x256xf32>
    %42 = vector.extract_strided_slice %40 {offsets = [0, 0], sizes = [8, 256], strides = [1, 1]} : vector<8x384xf32> to vector<8x256xf32>
    %43 = arith.addf %41, %42 : vector<8x256xf32>
    %44 = arith.negf %43 : vector<8x256xf32>
    %45 = math.exp %44 : vector<8x256xf32>
    %cst_14 = arith.constant 1.000000e+00 : f32
    %46 = vector.broadcast %cst_14 : f32 to vector<8x256xf32>
    %47 = arith.addf %46, %45 : vector<8x256xf32>
    %48 = arith.divf %46, %47 : vector<8x256xf32>
    %49 = vector.extract_strided_slice %48 {offsets = [0, 0], sizes = [8, 128], strides = [1, 1]} : vector<8x256xf32> to vector<8x128xf32>
    %50 = vector.extract_strided_slice %48 {offsets = [0, 128], sizes = [8, 128], strides = [1, 1]} : vector<8x256xf32> to vector<8x128xf32>
    %51 = vector.extract_strided_slice %38 {offsets = [0, 256], sizes = [8, 128], strides = [1, 1]} : vector<8x384xf32> to vector<8x128xf32>
    %52 = vector.extract_strided_slice %40 {offsets = [0, 256], sizes = [8, 128], strides = [1, 1]} : vector<8x384xf32> to vector<8x128xf32>
    %53 = arith.addf %52, %6 : vector<8x128xf32>
    %54 = arith.mulf %49, %53 : vector<8x128xf32>
    %55 = arith.addf %51, %54 : vector<8x128xf32>
    %56 = math.tanh %55 : vector<8x128xf32>
    %cst_15 = arith.constant 1.000000e+00 : f32
    %57 = vector.broadcast %cst_15 : f32 to vector<8x128xf32>
    %58 = arith.subf %57, %50 : vector<8x128xf32>
    %59 = arith.mulf %58, %56 : vector<8x128xf32>
    %60 = arith.mulf %50, %34 : vector<8x128xf32>
    %61 = arith.addf %59, %60 : vector<8x128xf32>
    %c2_i32 = arith.constant 2 : i32
    %62 = arith.index_cast %c2_i32 : i32 to index
    %c0_16 = arith.constant 0 : index
    %c0_17 = arith.constant 0 : index
    %63 = vector.load %arg2[%62, %c0_16, %c0_17] : memref<8x8x384xbf16, #tpu.memory_space<vmem>>, vector<1x8x384xbf16>
    %64 = vector.shape_cast %63 : vector<1x8x384xbf16> to vector<8x384xbf16>
    %65 = arith.extf %64 : vector<8x384xbf16> to vector<8x384xf32>
    %66 = arith.truncf %61 : vector<8x128xf32> to vector<8x128xbf16>
    %cst_18 = arith.constant dense<0.000000e+00> : vector<8x384xf32>
    %67 = tpu.matmul %66, %3, %cst_18 {dimension_numbers = #tpu.dot_dimension_numbers<[1], [0], [0], [1], [0, 0, 1, 1], [], []>} : vector<8x128xbf16>, vector<128x384xbf16>, vector<8x384xf32> -> vector<8x384xf32>
    %68 = vector.extract_strided_slice %65 {offsets = [0, 0], sizes = [8, 256], strides = [1, 1]} : vector<8x384xf32> to vector<8x256xf32>
    %69 = vector.extract_strided_slice %67 {offsets = [0, 0], sizes = [8, 256], strides = [1, 1]} : vector<8x384xf32> to vector<8x256xf32>
    %70 = arith.addf %68, %69 : vector<8x256xf32>
    %71 = arith.negf %70 : vector<8x256xf32>
    %72 = math.exp %71 : vector<8x256xf32>
    %cst_19 = arith.constant 1.000000e+00 : f32
    %73 = vector.broadcast %cst_19 : f32 to vector<8x256xf32>
    %74 = arith.addf %73, %72 : vector<8x256xf32>
    %75 = arith.divf %73, %74 : vector<8x256xf32>
    %76 = vector.extract_strided_slice %75 {offsets = [0, 0], sizes = [8, 128], strides = [1, 1]} : vector<8x256xf32> to vector<8x128xf32>
    %77 = vector.extract_strided_slice %75 {offsets = [0, 128], sizes = [8, 128], strides = [1, 1]} : vector<8x256xf32> to vector<8x128xf32>
    %78 = vector.extract_strided_slice %65 {offsets = [0, 256], sizes = [8, 128], strides = [1, 1]} : vector<8x384xf32> to vector<8x128xf32>
    %79 = vector.extract_strided_slice %67 {offsets = [0, 256], sizes = [8, 128], strides = [1, 1]} : vector<8x384xf32> to vector<8x128xf32>
    %80 = arith.addf %79, %6 : vector<8x128xf32>
    %81 = arith.mulf %76, %80 : vector<8x128xf32>
    %82 = arith.addf %78, %81 : vector<8x128xf32>
    %83 = math.tanh %82 : vector<8x128xf32>
    %cst_20 = arith.constant 1.000000e+00 : f32
    %84 = vector.broadcast %cst_20 : f32 to vector<8x128xf32>
    %85 = arith.subf %84, %77 : vector<8x128xf32>
    %86 = arith.mulf %85, %83 : vector<8x128xf32>
    %87 = arith.mulf %77, %61 : vector<8x128xf32>
    %88 = arith.addf %86, %87 : vector<8x128xf32>
    %c3_i32 = arith.constant 3 : i32
    %89 = arith.index_cast %c3_i32 : i32 to index
    %c0_21 = arith.constant 0 : index
    %c0_22 = arith.constant 0 : index
    %90 = vector.load %arg2[%89, %c0_21, %c0_22] : memref<8x8x384xbf16, #tpu.memory_space<vmem>>, vector<1x8x384xbf16>
    %91 = vector.shape_cast %90 : vector<1x8x384xbf16> to vector<8x384xbf16>
    %92 = arith.extf %91 : vector<8x384xbf16> to vector<8x384xf32>
    %93 = arith.truncf %88 : vector<8x128xf32> to vector<8x128xbf16>
    %cst_23 = arith.constant dense<0.000000e+00> : vector<8x384xf32>
    %94 = tpu.matmul %93, %3, %cst_23 {dimension_numbers = #tpu.dot_dimension_numbers<[1], [0], [0], [1], [0, 0, 1, 1], [], []>} : vector<8x128xbf16>, vector<128x384xbf16>, vector<8x384xf32> -> vector<8x384xf32>
    %95 = vector.extract_strided_slice %92 {offsets = [0, 0], sizes = [8, 256], strides = [1, 1]} : vector<8x384xf32> to vector<8x256xf32>
    %96 = vector.extract_strided_slice %94 {offsets = [0, 0], sizes = [8, 256], strides = [1, 1]} : vector<8x384xf32> to vector<8x256xf32>
    %97 = arith.addf %95, %96 : vector<8x256xf32>
    %98 = arith.negf %97 : vector<8x256xf32>
    %99 = math.exp %98 : vector<8x256xf32>
    %cst_24 = arith.constant 1.000000e+00 : f32
    %100 = vector.broadcast %cst_24 : f32 to vector<8x256xf32>
    %101 = arith.addf %100, %99 : vector<8x256xf32>
    %102 = arith.divf %100, %101 : vector<8x256xf32>
    %103 = vector.extract_strided_slice %102 {offsets = [0, 0], sizes = [8, 128], strides = [1, 1]} : vector<8x256xf32> to vector<8x128xf32>
    %104 = vector.extract_strided_slice %102 {offsets = [0, 128], sizes = [8, 128], strides = [1, 1]} : vector<8x256xf32> to vector<8x128xf32>
    %105 = vector.extract_strided_slice %92 {offsets = [0, 256], sizes = [8, 128], strides = [1, 1]} : vector<8x384xf32> to vector<8x128xf32>
    %106 = vector.extract_strided_slice %94 {offsets = [0, 256], sizes = [8, 128], strides = [1, 1]} : vector<8x384xf32> to vector<8x128xf32>
    %107 = arith.addf %106, %6 : vector<8x128xf32>
    %108 = arith.mulf %103, %107 : vector<8x128xf32>
    %109 = arith.addf %105, %108 : vector<8x128xf32>
    %110 = math.tanh %109 : vector<8x128xf32>
    %cst_25 = arith.constant 1.000000e+00 : f32
    %111 = vector.broadcast %cst_25 : f32 to vector<8x128xf32>
    %112 = arith.subf %111, %104 : vector<8x128xf32>
    %113 = arith.mulf %112, %110 : vector<8x128xf32>
    %114 = arith.mulf %104, %88 : vector<8x128xf32>
    %115 = arith.addf %113, %114 : vector<8x128xf32>
    %c4_i32 = arith.constant 4 : i32
    %116 = arith.index_cast %c4_i32 : i32 to index
    %c0_26 = arith.constant 0 : index
    %c0_27 = arith.constant 0 : index
    %117 = vector.load %arg2[%116, %c0_26, %c0_27] : memref<8x8x384xbf16, #tpu.memory_space<vmem>>, vector<1x8x384xbf16>
    %118 = vector.shape_cast %117 : vector<1x8x384xbf16> to vector<8x384xbf16>
    %119 = arith.extf %118 : vector<8x384xbf16> to vector<8x384xf32>
    %120 = arith.truncf %115 : vector<8x128xf32> to vector<8x128xbf16>
    %cst_28 = arith.constant dense<0.000000e+00> : vector<8x384xf32>
    %121 = tpu.matmul %120, %3, %cst_28 {dimension_numbers = #tpu.dot_dimension_numbers<[1], [0], [0], [1], [0, 0, 1, 1], [], []>} : vector<8x128xbf16>, vector<128x384xbf16>, vector<8x384xf32> -> vector<8x384xf32>
    %122 = vector.extract_strided_slice %119 {offsets = [0, 0], sizes = [8, 256], strides = [1, 1]} : vector<8x384xf32> to vector<8x256xf32>
    %123 = vector.extract_strided_slice %121 {offsets = [0, 0], sizes = [8, 256], strides = [1, 1]} : vector<8x384xf32> to vector<8x256xf32>
    %124 = arith.addf %122, %123 : vector<8x256xf32>
    %125 = arith.negf %124 : vector<8x256xf32>
    %126 = math.exp %125 : vector<8x256xf32>
    %cst_29 = arith.constant 1.000000e+00 : f32
    %127 = vector.broadcast %cst_29 : f32 to vector<8x256xf32>
    %128 = arith.addf %127, %126 : vector<8x256xf32>
    %129 = arith.divf %127, %128 : vector<8x256xf32>
    %130 = vector.extract_strided_slice %129 {offsets = [0, 0], sizes = [8, 128], strides = [1, 1]} : vector<8x256xf32> to vector<8x128xf32>
    %131 = vector.extract_strided_slice %129 {offsets = [0, 128], sizes = [8, 128], strides = [1, 1]} : vector<8x256xf32> to vector<8x128xf32>
    %132 = vector.extract_strided_slice %119 {offsets = [0, 256], sizes = [8, 128], strides = [1, 1]} : vector<8x384xf32> to vector<8x128xf32>
    %133 = vector.extract_strided_slice %121 {offsets = [0, 256], sizes = [8, 128], strides = [1, 1]} : vector<8x384xf32> to vector<8x128xf32>
    %134 = arith.addf %133, %6 : vector<8x128xf32>
    %135 = arith.mulf %130, %134 : vector<8x128xf32>
    %136 = arith.addf %132, %135 : vector<8x128xf32>
    %137 = math.tanh %136 : vector<8x128xf32>
    %cst_30 = arith.constant 1.000000e+00 : f32
    %138 = vector.broadcast %cst_30 : f32 to vector<8x128xf32>
    %139 = arith.subf %138, %131 : vector<8x128xf32>
    %140 = arith.mulf %139, %137 : vector<8x128xf32>
    %141 = arith.mulf %131, %115 : vector<8x128xf32>
    %142 = arith.addf %140, %141 : vector<8x128xf32>
    %c5_i32 = arith.constant 5 : i32
    %143 = arith.index_cast %c5_i32 : i32 to index
    %c0_31 = arith.constant 0 : index
    %c0_32 = arith.constant 0 : index
    %144 = vector.load %arg2[%143, %c0_31, %c0_32] : memref<8x8x384xbf16, #tpu.memory_space<vmem>>, vector<1x8x384xbf16>
    %145 = vector.shape_cast %144 : vector<1x8x384xbf16> to vector<8x384xbf16>
    %146 = arith.extf %145 : vector<8x384xbf16> to vector<8x384xf32>
    %147 = arith.truncf %142 : vector<8x128xf32> to vector<8x128xbf16>
    %cst_33 = arith.constant dense<0.000000e+00> : vector<8x384xf32>
    %148 = tpu.matmul %147, %3, %cst_33 {dimension_numbers = #tpu.dot_dimension_numbers<[1], [0], [0], [1], [0, 0, 1, 1], [], []>} : vector<8x128xbf16>, vector<128x384xbf16>, vector<8x384xf32> -> vector<8x384xf32>
    %149 = vector.extract_strided_slice %146 {offsets = [0, 0], sizes = [8, 256], strides = [1, 1]} : vector<8x384xf32> to vector<8x256xf32>
    %150 = vector.extract_strided_slice %148 {offsets = [0, 0], sizes = [8, 256], strides = [1, 1]} : vector<8x384xf32> to vector<8x256xf32>
    %151 = arith.addf %149, %150 : vector<8x256xf32>
    %152 = arith.negf %151 : vector<8x256xf32>
    %153 = math.exp %152 : vector<8x256xf32>
    %cst_34 = arith.constant 1.000000e+00 : f32
    %154 = vector.broadcast %cst_34 : f32 to vector<8x256xf32>
    %155 = arith.addf %154, %153 : vector<8x256xf32>
    %156 = arith.divf %154, %155 : vector<8x256xf32>
    %157 = vector.extract_strided_slice %156 {offsets = [0, 0], sizes = [8, 128], strides = [1, 1]} : vector<8x256xf32> to vector<8x128xf32>
    %158 = vector.extract_strided_slice %156 {offsets = [0, 128], sizes = [8, 128], strides = [1, 1]} : vector<8x256xf32> to vector<8x128xf32>
    %159 = vector.extract_strided_slice %146 {offsets = [0, 256], sizes = [8, 128], strides = [1, 1]} : vector<8x384xf32> to vector<8x128xf32>
    %160 = vector.extract_strided_slice %148 {offsets = [0, 256], sizes = [8, 128], strides = [1, 1]} : vector<8x384xf32> to vector<8x128xf32>
    %161 = arith.addf %160, %6 : vector<8x128xf32>
    %162 = arith.mulf %157, %161 : vector<8x128xf32>
    %163 = arith.addf %159, %162 : vector<8x128xf32>
    %164 = math.tanh %163 : vector<8x128xf32>
    %cst_35 = arith.constant 1.000000e+00 : f32
    %165 = vector.broadcast %cst_35 : f32 to vector<8x128xf32>
    %166 = arith.subf %165, %158 : vector<8x128xf32>
    %167 = arith.mulf %166, %164 : vector<8x128xf32>
    %168 = arith.mulf %158, %142 : vector<8x128xf32>
    %169 = arith.addf %167, %168 : vector<8x128xf32>
    %c6_i32 = arith.constant 6 : i32
    %170 = arith.index_cast %c6_i32 : i32 to index
    %c0_36 = arith.constant 0 : index
    %c0_37 = arith.constant 0 : index
    %171 = vector.load %arg2[%170, %c0_36, %c0_37] : memref<8x8x384xbf16, #tpu.memory_space<vmem>>, vector<1x8x384xbf16>
    %172 = vector.shape_cast %171 : vector<1x8x384xbf16> to vector<8x384xbf16>
    %173 = arith.extf %172 : vector<8x384xbf16> to vector<8x384xf32>
    %174 = arith.truncf %169 : vector<8x128xf32> to vector<8x128xbf16>
    %cst_38 = arith.constant dense<0.000000e+00> : vector<8x384xf32>
    %175 = tpu.matmul %174, %3, %cst_38 {dimension_numbers = #tpu.dot_dimension_numbers<[1], [0], [0], [1], [0, 0, 1, 1], [], []>} : vector<8x128xbf16>, vector<128x384xbf16>, vector<8x384xf32> -> vector<8x384xf32>
    %176 = vector.extract_strided_slice %173 {offsets = [0, 0], sizes = [8, 256], strides = [1, 1]} : vector<8x384xf32> to vector<8x256xf32>
    %177 = vector.extract_strided_slice %175 {offsets = [0, 0], sizes = [8, 256], strides = [1, 1]} : vector<8x384xf32> to vector<8x256xf32>
    %178 = arith.addf %176, %177 : vector<8x256xf32>
    %179 = arith.negf %178 : vector<8x256xf32>
    %180 = math.exp %179 : vector<8x256xf32>
    %cst_39 = arith.constant 1.000000e+00 : f32
    %181 = vector.broadcast %cst_39 : f32 to vector<8x256xf32>
    %182 = arith.addf %181, %180 : vector<8x256xf32>
    %183 = arith.divf %181, %182 : vector<8x256xf32>
    %184 = vector.extract_strided_slice %183 {offsets = [0, 0], sizes = [8, 128], strides = [1, 1]} : vector<8x256xf32> to vector<8x128xf32>
    %185 = vector.extract_strided_slice %183 {offsets = [0, 128], sizes = [8, 128], strides = [1, 1]} : vector<8x256xf32> to vector<8x128xf32>
    %186 = vector.extract_strided_slice %173 {offsets = [0, 256], sizes = [8, 128], strides = [1, 1]} : vector<8x384xf32> to vector<8x128xf32>
    %187 = vector.extract_strided_slice %175 {offsets = [0, 256], sizes = [8, 128], strides = [1, 1]} : vector<8x384xf32> to vector<8x128xf32>
    %188 = arith.addf %187, %6 : vector<8x128xf32>
    %189 = arith.mulf %184, %188 : vector<8x128xf32>
    %190 = arith.addf %186, %189 : vector<8x128xf32>
    %191 = math.tanh %190 : vector<8x128xf32>
    %cst_40 = arith.constant 1.000000e+00 : f32
    %192 = vector.broadcast %cst_40 : f32 to vector<8x128xf32>
    %193 = arith.subf %192, %185 : vector<8x128xf32>
    %194 = arith.mulf %193, %191 : vector<8x128xf32>
    %195 = arith.mulf %185, %169 : vector<8x128xf32>
    %196 = arith.addf %194, %195 : vector<8x128xf32>
    %c7_i32 = arith.constant 7 : i32
    %197 = arith.index_cast %c7_i32 : i32 to index
    %c0_41 = arith.constant 0 : index
    %c0_42 = arith.constant 0 : index
    %198 = vector.load %arg2[%197, %c0_41, %c0_42] : memref<8x8x384xbf16, #tpu.memory_space<vmem>>, vector<1x8x384xbf16>
    %199 = vector.shape_cast %198 : vector<1x8x384xbf16> to vector<8x384xbf16>
    %200 = arith.extf %199 : vector<8x384xbf16> to vector<8x384xf32>
    %201 = arith.truncf %196 : vector<8x128xf32> to vector<8x128xbf16>
    %cst_43 = arith.constant dense<0.000000e+00> : vector<8x384xf32>
    %202 = tpu.matmul %201, %3, %cst_43 {dimension_numbers = #tpu.dot_dimension_numbers<[1], [0], [0], [1], [0, 0, 1, 1], [], []>} : vector<8x128xbf16>, vector<128x384xbf16>, vector<8x384xf32> -> vector<8x384xf32>
    %203 = vector.extract_strided_slice %200 {offsets = [0, 0], sizes = [8, 256], strides = [1, 1]} : vector<8x384xf32> to vector<8x256xf32>
    %204 = vector.extract_strided_slice %202 {offsets = [0, 0], sizes = [8, 256], strides = [1, 1]} : vector<8x384xf32> to vector<8x256xf32>
    %205 = arith.addf %203, %204 : vector<8x256xf32>
    %206 = arith.negf %205 : vector<8x256xf32>
    %207 = math.exp %206 : vector<8x256xf32>
    %cst_44 = arith.constant 1.000000e+00 : f32
    %208 = vector.broadcast %cst_44 : f32 to vector<8x256xf32>
    %209 = arith.addf %208, %207 : vector<8x256xf32>
    %210 = arith.divf %208, %209 : vector<8x256xf32>
    %211 = vector.extract_strided_slice %210 {offsets = [0, 0], sizes = [8, 128], strides = [1, 1]} : vector<8x256xf32> to vector<8x128xf32>
    %212 = vector.extract_strided_slice %210 {offsets = [0, 128], sizes = [8, 128], strides = [1, 1]} : vector<8x256xf32> to vector<8x128xf32>
    %213 = vector.extract_strided_slice %200 {offsets = [0, 256], sizes = [8, 128], strides = [1, 1]} : vector<8x384xf32> to vector<8x128xf32>
    %214 = vector.extract_strided_slice %202 {offsets = [0, 256], sizes = [8, 128], strides = [1, 1]} : vector<8x384xf32> to vector<8x128xf32>
    %215 = arith.addf %214, %6 : vector<8x128xf32>
    %216 = arith.mulf %211, %215 : vector<8x128xf32>
    %217 = arith.addf %213, %216 : vector<8x128xf32>
    %218 = math.tanh %217 : vector<8x128xf32>
    %cst_45 = arith.constant 1.000000e+00 : f32
    %219 = vector.broadcast %cst_45 : f32 to vector<8x128xf32>
    %220 = arith.subf %219, %212 : vector<8x128xf32>
    %221 = arith.mulf %220, %218 : vector<8x128xf32>
    %222 = arith.mulf %212, %196 : vector<8x128xf32>
    %223 = arith.addf %221, %222 : vector<8x128xf32>
    %c8_i32 = arith.constant 8 : i32
    %c0_46 = arith.constant 0 : index
    %c0_47 = arith.constant 0 : index
    %224 = vector.load %arg6[%c0_46, %c0_47] : memref<8x128xf32, #tpu.memory_space<vmem>>, vector<8x128xf32>
    tpu.vector_store %arg6[%c0_46, %c0_47], %223 {strides = array<i32>} : memref<8x128xf32, #tpu.memory_space<vmem>>, vector<8x128xf32>,
    %c0_48 = arith.constant 0 : index
    %c0_49 = arith.constant 0 : index
    %225 = vector.load %arg5[%c0_48, %c0_49] : memref<8x128xf32, #tpu.memory_space<vmem>>, vector<8x128xf32>
    tpu.vector_store %arg5[%c0_48, %c0_49], %223 {strides = array<i32>} : memref<8x128xf32, #tpu.memory_space<vmem>>, vector<8x128xf32>,
    return
  }
  func.func @transform_0(%arg0: i32, %arg1: i32) -> (i32, i32, i32) {
    %c0_i32 = arith.constant 0 : i32
    %c0_i32_0 = arith.constant 0 : i32
    return %arg1, %arg0, %c0_i32 : i32, i32, i32
  }
  func.func @transform_1(%arg0: i32, %arg1: i32) -> (i32, i32) {
    %c0_i32 = arith.constant 0 : i32
    %c0_i32_0 = arith.constant 0 : i32
    %c0_i32_1 = arith.constant 0 : i32
    return %c0_i32, %c0_i32_0 : i32, i32
  }
  func.func @transform_2(%arg0: i32, %arg1: i32) -> (i32, i32) {
    %c0_i32 = arith.constant 0 : i32
    %c0_i32_0 = arith.constant 0 : i32
    %c0_i32_1 = arith.constant 0 : i32
    return %c0_i32, %c0_i32_0 : i32, i32
  }
  func.func @transform_3(%arg0: i32, %arg1: i32) -> (i32, i32) {
    %c0_i32 = arith.constant 0 : i32
    %c0_i32_0 = arith.constant 0 : i32
    return %arg0, %c0_i32 : i32, i32
  }
}

module attributes {stable_mosaic.version = 11 : i64} {
  func.func @_gru_recurrence_kernel(%arg0: i32, %arg1: i32, %arg2: memref<8x8x384xbf16, #tpu.memory_space<vmem>>, %arg3: memref<128x384xbf16, #tpu.memory_space<vmem>>, %arg4: memref<1x128xf32, #tpu.memory_space<vmem>>, %arg5: memref<8x128xf32, #tpu.memory_space<vmem>>, %arg6: memref<8x128xf32, #tpu.memory_space<vmem>>) attributes {dimension_semantics = [#tpu.dimension_semantics<parallel>, #tpu.dimension_semantics<arbitrary>], iteration_bounds = array<i64: 1, 1>, scalar_prefetch = 0 : i64, scratch_operands = 1 : i64, tpu.core_type = #tpu.core_type<tc>, window_params = [{transform_indices = @transform_0, window_bounds = array<i64: 8, 8, 384>}, {pipeline_mode = #tpu.pipeline_mode<synchronous>, transform_indices = @transform_1, window_bounds = array<i64: 128, 384>}, {pipeline_mode = #tpu.pipeline_mode<synchronous>, transform_indices = @transform_2, window_bounds = array<i64: 1, 128>}, {transform_indices = @transform_3, window_bounds = array<i64: 8, 128>}]} {
    %c0_i32 = arith.constant 0 : i32
    %0 = arith.cmpi eq, %arg1, %c0_i32 : i32
    %1 = arith.extui %0 : i1 to i32
    %c0_i32_0 = arith.constant 0 : i32
    %2 = arith.cmpi ne, %1, %c0_i32_0 : i32
    scf.if %2 {
      %cst_50 = arith.constant 0.000000e+00 : f32
      %226 = vector.broadcast %cst_50 : f32 to vector<8x128xf32>
      %c0_51 = arith.constant 0 : index
      %c0_52 = arith.constant 0 : index
      %227 = vector.load %arg6[%c0_51, %c0_52] : memref<8x128xf32, #tpu.memory_space<vmem>>, vector<8x128xf32>
      tpu.vector_store %arg6[%c0_51, %c0_52], %226 {strides = array<i32>} : memref<8x128xf32, #tpu.memory_space<vmem>>, vector<8x128xf32>,
    } else {
    }
    %c0 = arith.constant 0 : index
    %c0_1 = arith.constant 0 : index
    %3 = vector.load %arg3[%c0, %c0_1] : memref<128x384xbf16, #tpu.memory_space<vmem>>, vector<128x384xbf16>
    %c0_2 = arith.constant 0 : index
    %c0_3 = arith.constant 0 : index
    %4 = vector.load %arg4[%c0_2, %c0_3] : memref<1x128xf32, #tpu.memory_space<vmem>>, vector<1x128xf32>
    %5 = vector.shape_cast %4 : vector<1x128xf32> to vector<1x128xf32>
    %6 = vector.broadcast %5 : vector<1x128xf32> to vector<8x128xf32>
    %c0_4 = arith.constant 0 : index
    %c0_5 = arith.constant 0 : index
    %7 = vector.load %arg6[%c0_4, %c0_5] : memref<8x128xf32, #tpu.memory_space<vmem>>, vector<8x128xf32>
    %c0_i32_6 = arith.constant 0 : i32
    %8 = arith.index_cast %c0_i32_6 : i32 to index
    %c0_7 = arith.constant 0 : index
    %c0_8 = arith.constant 0 : index
    %9 = vector.load %arg2[%8, %c0_7, %c0_8] : memref<8x8x384xbf16, #tpu.memory_space<vmem>>, vector<1x8x384xbf16>
    %10 = vector.shape_cast %9 : vector<1x8x384xbf16> to vector<8x384xbf16>
    %11 = arith.extf %10 : vector<8x384xbf16> to vector<8x384xf32>
    %12 = arith.truncf %7 : vector<8x128xf32> to vector<8x128xbf16>
    %cst = arith.constant dense<0.000000e+00> : vector<8x384xf32>
    %13 = tpu.matmul %12, %3, %cst {dimension_numbers = #tpu.dot_dimension_numbers<[1], [0], [0], [1], [0, 0, 1, 1], [], []>} : vector<8x128xbf16>, vector<128x384xbf16>, vector<8x384xf32> -> vector<8x384xf32>
    %14 = vector.extract_strided_slice %11 {offsets = [0, 0], sizes = [8, 256], strides = [1, 1]} : vector<8x384xf32> to vector<8x256xf32>
    %15 = vector.extract_strided_slice %13 {offsets = [0, 0], sizes = [8, 256], strides = [1, 1]} : vector<8x384xf32> to vector<8x256xf32>
    %16 = arith.addf %14, %15 : vector<8x256xf32>
    %17 = arith.negf %16 : vector<8x256xf32>
    %18 = math.exp %17 : vector<8x256xf32>
    %cst_9 = arith.constant 1.000000e+00 : f32
    %19 = vector.broadcast %cst_9 : f32 to vector<8x256xf32>
    %20 = arith.addf %19, %18 : vector<8x256xf32>
    %21 = arith.divf %19, %20 : vector<8x256xf32>
    %22 = vector.extract_strided_slice %21 {offsets = [0, 0], sizes = [8, 128], strides = [1, 1]} : vector<8x256xf32> to vector<8x128xf32>
    %23 = vector.extract_strided_slice %21 {offsets = [0, 128], sizes = [8, 128], strides = [1, 1]} : vector<8x256xf32> to vector<8x128xf32>
    %24 = vector.extract_strided_slice %11 {offsets = [0, 256], sizes = [8, 128], strides = [1, 1]} : vector<8x384xf32> to vector<8x128xf32>
    %25 = vector.extract_strided_slice %13 {offsets = [0, 256], sizes = [8, 128], strides = [1, 1]} : vector<8x384xf32> to vector<8x128xf32>
    %26 = arith.addf %25, %6 : vector<8x128xf32>
    %27 = arith.mulf %22, %26 : vector<8x128xf32>
    %28 = arith.addf %24, %27 : vector<8x128xf32>
    %29 = math.tanh %28 : vector<8x128xf32>
    %cst_10 = arith.constant 1.000000e+00 : f32
    %30 = vector.broadcast %cst_10 : f32 to vector<8x128xf32>
    %31 = arith.subf %30, %23 : vector<8x128xf32>
    %32 = arith.mulf %31, %29 : vector<8x128xf32>
    %33 = arith.mulf %23, %7 : vector<8x128xf32>
    %34 = arith.addf %32, %33 : vector<8x128xf32>
    %c1_i32 = arith.constant 1 : i32
    %35 = arith.index_cast %c1_i32 : i32 to index
    %c0_11 = arith.constant 0 : index
    %c0_12 = arith.constant 0 : index
    %36 = vector.load %arg2[%35, %c0_11, %c0_12] : memref<8x8x384xbf16, #tpu.memory_space<vmem>>, vector<1x8x384xbf16>
    %37 = vector.shape_cast %36 : vector<1x8x384xbf16> to vector<8x384xbf16>
    %38 = arith.extf %37 : vector<8x384xbf16> to vector<8x384xf32>
    %39 = arith.truncf %34 : vector<8x128xf32> to vector<8x128xbf16>
    %cst_13 = arith.constant dense<0.000000e+00> : vector<8x384xf32>
    %40 = tpu.matmul %39, %3, %cst_13 {dimension_numbers = #tpu.dot_dimension_numbers<[1], [0], [0], [1], [0, 0, 1, 1], [], []>} : vector<8x128xbf16>, vector<128x384xbf16>, vector<8x384xf32> -> vector<8x384xf32>
    %41 = vector.extract_strided_slice %38 {offsets = [0, 0], sizes = [8, 256], strides = [1, 1]} : vector<8x384xf32> to vector<8x256xf32>
    %42 = vector.extract_strided_slice %40 {offsets = [0, 0], sizes = [8, 256], strides = [1, 1]} : vector<8x384xf32> to vector<8x256xf32>
    %43 = arith.addf %41, %42 : vector<8x256xf32>
    %44 = arith.negf %43 : vector<8x256xf32>
    %45 = math.exp %44 : vector<8x256xf32>
    %cst_14 = arith.constant 1.000000e+00 : f32
    %46 = vector.broadcast %cst_14 : f32 to vector<8x256xf32>
    %47 = arith.addf %46, %45 : vector<8x256xf32>
    %48 = arith.divf %46, %47 : vector<8x256xf32>
    %49 = vector.extract_strided_slice %48 {offsets = [0, 0], sizes = [8, 128], strides = [1, 1]} : vector<8x256xf32> to vector<8x128xf32>
    %50 = vector.extract_strided_slice %48 {offsets = [0, 128], sizes = [8, 128], strides = [1, 1]} : vector<8x256xf32> to vector<8x128xf32>
    %51 = vector.extract_strided_slice %38 {offsets = [0, 256], sizes = [8, 128], strides = [1, 1]} : vector<8x384xf32> to vector<8x128xf32>
    %52 = vector.extract_strided_slice %40 {offsets = [0, 256], sizes = [8, 128], strides = [1, 1]} : vector<8x384xf32> to vector<8x128xf32>
    %53 = arith.addf %52, %6 : vector<8x128xf32>
    %54 = arith.mulf %49, %53 : vector<8x128xf32>
    %55 = arith.addf %51, %54 : vector<8x128xf32>
    %56 = math.tanh %55 : vector<8x128xf32>
    %cst_15 = arith.constant 1.000000e+00 : f32
    %57 = vector.broadcast %cst_15 : f32 to vector<8x128xf32>
    %58 = arith.subf %57, %50 : vector<8x128xf32>
    %59 = arith.mulf %58, %56 : vector<8x128xf32>
    %60 = arith.mulf %50, %34 : vector<8x128xf32>
    %61 = arith.addf %59, %60 : vector<8x128xf32>
    %c2_i32 = arith.constant 2 : i32
    %62 = arith.index_cast %c2_i32 : i32 to index
    %c0_16 = arith.constant 0 : index
    %c0_17 = arith.constant 0 : index
    %63 = vector.load %arg2[%62, %c0_16, %c0_17] : memref<8x8x384xbf16, #tpu.memory_space<vmem>>, vector<1x8x384xbf16>
    %64 = vector.shape_cast %63 : vector<1x8x384xbf16> to vector<8x384xbf16>
    %65 = arith.extf %64 : vector<8x384xbf16> to vector<8x384xf32>
    %66 = arith.truncf %61 : vector<8x128xf32> to vector<8x128xbf16>
    %cst_18 = arith.constant dense<0.000000e+00> : vector<8x384xf32>
    %67 = tpu.matmul %66, %3, %cst_18 {dimension_numbers = #tpu.dot_dimension_numbers<[1], [0], [0], [1], [0, 0, 1, 1], [], []>} : vector<8x128xbf16>, vector<128x384xbf16>, vector<8x384xf32> -> vector<8x384xf32>
    %68 = vector.extract_strided_slice %65 {offsets = [0, 0], sizes = [8, 256], strides = [1, 1]} : vector<8x384xf32> to vector<8x256xf32>
    %69 = vector.extract_strided_slice %67 {offsets = [0, 0], sizes = [8, 256], strides = [1, 1]} : vector<8x384xf32> to vector<8x256xf32>
    %70 = arith.addf %68, %69 : vector<8x256xf32>
    %71 = arith.negf %70 : vector<8x256xf32>
    %72 = math.exp %71 : vector<8x256xf32>
    %cst_19 = arith.constant 1.000000e+00 : f32
    %73 = vector.broadcast %cst_19 : f32 to vector<8x256xf32>
    %74 = arith.addf %73, %72 : vector<8x256xf32>
    %75 = arith.divf %73, %74 : vector<8x256xf32>
    %76 = vector.extract_strided_slice %75 {offsets = [0, 0], sizes = [8, 128], strides = [1, 1]} : vector<8x256xf32> to vector<8x128xf32>
    %77 = vector.extract_strided_slice %75 {offsets = [0, 128], sizes = [8, 128], strides = [1, 1]} : vector<8x256xf32> to vector<8x128xf32>
    %78 = vector.extract_strided_slice %65 {offsets = [0, 256], sizes = [8, 128], strides = [1, 1]} : vector<8x384xf32> to vector<8x128xf32>
    %79 = vector.extract_strided_slice %67 {offsets = [0, 256], sizes = [8, 128], strides = [1, 1]} : vector<8x384xf32> to vector<8x128xf32>
    %80 = arith.addf %79, %6 : vector<8x128xf32>
    %81 = arith.mulf %76, %80 : vector<8x128xf32>
    %82 = arith.addf %78, %81 : vector<8x128xf32>
    %83 = math.tanh %82 : vector<8x128xf32>
    %cst_20 = arith.constant 1.000000e+00 : f32
    %84 = vector.broadcast %cst_20 : f32 to vector<8x128xf32>
    %85 = arith.subf %84, %77 : vector<8x128xf32>
    %86 = arith.mulf %85, %83 : vector<8x128xf32>
    %87 = arith.mulf %77, %61 : vector<8x128xf32>
    %88 = arith.addf %86, %87 : vector<8x128xf32>
    %c3_i32 = arith.constant 3 : i32
    %89 = arith.index_cast %c3_i32 : i32 to index
    %c0_21 = arith.constant 0 : index
    %c0_22 = arith.constant 0 : index
    %90 = vector.load %arg2[%89, %c0_21, %c0_22] : memref<8x8x384xbf16, #tpu.memory_space<vmem>>, vector<1x8x384xbf16>
    %91 = vector.shape_cast %90 : vector<1x8x384xbf16> to vector<8x384xbf16>
    %92 = arith.extf %91 : vector<8x384xbf16> to vector<8x384xf32>
    %93 = arith.truncf %88 : vector<8x128xf32> to vector<8x128xbf16>
    %cst_23 = arith.constant dense<0.000000e+00> : vector<8x384xf32>
    %94 = tpu.matmul %93, %3, %cst_23 {dimension_numbers = #tpu.dot_dimension_numbers<[1], [0], [0], [1], [0, 0, 1, 1], [], []>} : vector<8x128xbf16>, vector<128x384xbf16>, vector<8x384xf32> -> vector<8x384xf32>
    %95 = vector.extract_strided_slice %92 {offsets = [0, 0], sizes = [8, 256], strides = [1, 1]} : vector<8x384xf32> to vector<8x256xf32>
    %96 = vector.extract_strided_slice %94 {offsets = [0, 0], sizes = [8, 256], strides = [1, 1]} : vector<8x384xf32> to vector<8x256xf32>
    %97 = arith.addf %95, %96 : vector<8x256xf32>
    %98 = arith.negf %97 : vector<8x256xf32>
    %99 = math.exp %98 : vector<8x256xf32>
    %cst_24 = arith.constant 1.000000e+00 : f32
    %100 = vector.broadcast %cst_24 : f32 to vector<8x256xf32>
    %101 = arith.addf %100, %99 : vector<8x256xf32>
    %102 = arith.divf %100, %101 : vector<8x256xf32>
    %103 = vector.extract_strided_slice %102 {offsets = [0, 0], sizes = [8, 128], strides = [1, 1]} : vector<8x256xf32> to vector<8x128xf32>
    %104 = vector.extract_strided_slice %102 {offsets = [0, 128], sizes = [8, 128], strides = [1, 1]} : vector<8x256xf32> to vector<8x128xf32>
    %105 = vector.extract_strided_slice %92 {offsets = [0, 256], sizes = [8, 128], strides = [1, 1]} : vector<8x384xf32> to vector<8x128xf32>
    %106 = vector.extract_strided_slice %94 {offsets = [0, 256], sizes = [8, 128], strides = [1, 1]} : vector<8x384xf32> to vector<8x128xf32>
    %107 = arith.addf %106, %6 : vector<8x128xf32>
    %108 = arith.mulf %103, %107 : vector<8x128xf32>
    %109 = arith.addf %105, %108 : vector<8x128xf32>
    %110 = math.tanh %109 : vector<8x128xf32>
    %cst_25 = arith.constant 1.000000e+00 : f32
    %111 = vector.broadcast %cst_25 : f32 to vector<8x128xf32>
    %112 = arith.subf %111, %104 : vector<8x128xf32>
    %113 = arith.mulf %112, %110 : vector<8x128xf32>
    %114 = arith.mulf %104, %88 : vector<8x128xf32>
    %115 = arith.addf %113, %114 : vector<8x128xf32>
    %c4_i32 = arith.constant 4 : i32
    %116 = arith.index_cast %c4_i32 : i32 to index
    %c0_26 = arith.constant 0 : index
    %c0_27 = arith.constant 0 : index
    %117 = vector.load %arg2[%116, %c0_26, %c0_27] : memref<8x8x384xbf16, #tpu.memory_space<vmem>>, vector<1x8x384xbf16>
    %118 = vector.shape_cast %117 : vector<1x8x384xbf16> to vector<8x384xbf16>
    %119 = arith.extf %118 : vector<8x384xbf16> to vector<8x384xf32>
    %120 = arith.truncf %115 : vector<8x128xf32> to vector<8x128xbf16>
    %cst_28 = arith.constant dense<0.000000e+00> : vector<8x384xf32>
    %121 = tpu.matmul %120, %3, %cst_28 {dimension_numbers = #tpu.dot_dimension_numbers<[1], [0], [0], [1], [0, 0, 1, 1], [], []>} : vector<8x128xbf16>, vector<128x384xbf16>, vector<8x384xf32> -> vector<8x384xf32>
    %122 = vector.extract_strided_slice %119 {offsets = [0, 0], sizes = [8, 256], strides = [1, 1]} : vector<8x384xf32> to vector<8x256xf32>
    %123 = vector.extract_strided_slice %121 {offsets = [0, 0], sizes = [8, 256], strides = [1, 1]} : vector<8x384xf32> to vector<8x256xf32>
    %124 = arith.addf %122, %123 : vector<8x256xf32>
    %125 = arith.negf %124 : vector<8x256xf32>
    %126 = math.exp %125 : vector<8x256xf32>
    %cst_29 = arith.constant 1.000000e+00 : f32
    %127 = vector.broadcast %cst_29 : f32 to vector<8x256xf32>
    %128 = arith.addf %127, %126 : vector<8x256xf32>
    %129 = arith.divf %127, %128 : vector<8x256xf32>
    %130 = vector.extract_strided_slice %129 {offsets = [0, 0], sizes = [8, 128], strides = [1, 1]} : vector<8x256xf32> to vector<8x128xf32>
    %131 = vector.extract_strided_slice %129 {offsets = [0, 128], sizes = [8, 128], strides = [1, 1]} : vector<8x256xf32> to vector<8x128xf32>
    %132 = vector.extract_strided_slice %119 {offsets = [0, 256], sizes = [8, 128], strides = [1, 1]} : vector<8x384xf32> to vector<8x128xf32>
    %133 = vector.extract_strided_slice %121 {offsets = [0, 256], sizes = [8, 128], strides = [1, 1]} : vector<8x384xf32> to vector<8x128xf32>
    %134 = arith.addf %133, %6 : vector<8x128xf32>
    %135 = arith.mulf %130, %134 : vector<8x128xf32>
    %136 = arith.addf %132, %135 : vector<8x128xf32>
    %137 = math.tanh %136 : vector<8x128xf32>
    %cst_30 = arith.constant 1.000000e+00 : f32
    %138 = vector.broadcast %cst_30 : f32 to vector<8x128xf32>
    %139 = arith.subf %138, %131 : vector<8x128xf32>
    %140 = arith.mulf %139, %137 : vector<8x128xf32>
    %141 = arith.mulf %131, %115 : vector<8x128xf32>
    %142 = arith.addf %140, %141 : vector<8x128xf32>
    %c5_i32 = arith.constant 5 : i32
    %143 = arith.index_cast %c5_i32 : i32 to index
    %c0_31 = arith.constant 0 : index
    %c0_32 = arith.constant 0 : index
    %144 = vector.load %arg2[%143, %c0_31, %c0_32] : memref<8x8x384xbf16, #tpu.memory_space<vmem>>, vector<1x8x384xbf16>
    %145 = vector.shape_cast %144 : vector<1x8x384xbf16> to vector<8x384xbf16>
    %146 = arith.extf %145 : vector<8x384xbf16> to vector<8x384xf32>
    %147 = arith.truncf %142 : vector<8x128xf32> to vector<8x128xbf16>
    %cst_33 = arith.constant dense<0.000000e+00> : vector<8x384xf32>
    %148 = tpu.matmul %147, %3, %cst_33 {dimension_numbers = #tpu.dot_dimension_numbers<[1], [0], [0], [1], [0, 0, 1, 1], [], []>} : vector<8x128xbf16>, vector<128x384xbf16>, vector<8x384xf32> -> vector<8x384xf32>
    %149 = vector.extract_strided_slice %146 {offsets = [0, 0], sizes = [8, 256], strides = [1, 1]} : vector<8x384xf32> to vector<8x256xf32>
    %150 = vector.extract_strided_slice %148 {offsets = [0, 0], sizes = [8, 256], strides = [1, 1]} : vector<8x384xf32> to vector<8x256xf32>
    %151 = arith.addf %149, %150 : vector<8x256xf32>
    %152 = arith.negf %151 : vector<8x256xf32>
    %153 = math.exp %152 : vector<8x256xf32>
    %cst_34 = arith.constant 1.000000e+00 : f32
    %154 = vector.broadcast %cst_34 : f32 to vector<8x256xf32>
    %155 = arith.addf %154, %153 : vector<8x256xf32>
    %156 = arith.divf %154, %155 : vector<8x256xf32>
    %157 = vector.extract_strided_slice %156 {offsets = [0, 0], sizes = [8, 128], strides = [1, 1]} : vector<8x256xf32> to vector<8x128xf32>
    %158 = vector.extract_strided_slice %156 {offsets = [0, 128], sizes = [8, 128], strides = [1, 1]} : vector<8x256xf32> to vector<8x128xf32>
    %159 = vector.extract_strided_slice %146 {offsets = [0, 256], sizes = [8, 128], strides = [1, 1]} : vector<8x384xf32> to vector<8x128xf32>
    %160 = vector.extract_strided_slice %148 {offsets = [0, 256], sizes = [8, 128], strides = [1, 1]} : vector<8x384xf32> to vector<8x128xf32>
    %161 = arith.addf %160, %6 : vector<8x128xf32>
    %162 = arith.mulf %157, %161 : vector<8x128xf32>
    %163 = arith.addf %159, %162 : vector<8x128xf32>
    %164 = math.tanh %163 : vector<8x128xf32>
    %cst_35 = arith.constant 1.000000e+00 : f32
    %165 = vector.broadcast %cst_35 : f32 to vector<8x128xf32>
    %166 = arith.subf %165, %158 : vector<8x128xf32>
    %167 = arith.mulf %166, %164 : vector<8x128xf32>
    %168 = arith.mulf %158, %142 : vector<8x128xf32>
    %169 = arith.addf %167, %168 : vector<8x128xf32>
    %c6_i32 = arith.constant 6 : i32
    %170 = arith.index_cast %c6_i32 : i32 to index
    %c0_36 = arith.constant 0 : index
    %c0_37 = arith.constant 0 : index
    %171 = vector.load %arg2[%170, %c0_36, %c0_37] : memref<8x8x384xbf16, #tpu.memory_space<vmem>>, vector<1x8x384xbf16>
    %172 = vector.shape_cast %171 : vector<1x8x384xbf16> to vector<8x384xbf16>
    %173 = arith.extf %172 : vector<8x384xbf16> to vector<8x384xf32>
    %174 = arith.truncf %169 : vector<8x128xf32> to vector<8x128xbf16>
    %cst_38 = arith.constant dense<0.000000e+00> : vector<8x384xf32>
    %175 = tpu.matmul %174, %3, %cst_38 {dimension_numbers = #tpu.dot_dimension_numbers<[1], [0], [0], [1], [0, 0, 1, 1], [], []>} : vector<8x128xbf16>, vector<128x384xbf16>, vector<8x384xf32> -> vector<8x384xf32>
    %176 = vector.extract_strided_slice %173 {offsets = [0, 0], sizes = [8, 256], strides = [1, 1]} : vector<8x384xf32> to vector<8x256xf32>
    %177 = vector.extract_strided_slice %175 {offsets = [0, 0], sizes = [8, 256], strides = [1, 1]} : vector<8x384xf32> to vector<8x256xf32>
    %178 = arith.addf %176, %177 : vector<8x256xf32>
    %179 = arith.negf %178 : vector<8x256xf32>
    %180 = math.exp %179 : vector<8x256xf32>
    %cst_39 = arith.constant 1.000000e+00 : f32
    %181 = vector.broadcast %cst_39 : f32 to vector<8x256xf32>
    %182 = arith.addf %181, %180 : vector<8x256xf32>
    %183 = arith.divf %181, %182 : vector<8x256xf32>
    %184 = vector.extract_strided_slice %183 {offsets = [0, 0], sizes = [8, 128], strides = [1, 1]} : vector<8x256xf32> to vector<8x128xf32>
    %185 = vector.extract_strided_slice %183 {offsets = [0, 128], sizes = [8, 128], strides = [1, 1]} : vector<8x256xf32> to vector<8x128xf32>
    %186 = vector.extract_strided_slice %173 {offsets = [0, 256], sizes = [8, 128], strides = [1, 1]} : vector<8x384xf32> to vector<8x128xf32>
    %187 = vector.extract_strided_slice %175 {offsets = [0, 256], sizes = [8, 128], strides = [1, 1]} : vector<8x384xf32> to vector<8x128xf32>
    %188 = arith.addf %187, %6 : vector<8x128xf32>
    %189 = arith.mulf %184, %188 : vector<8x128xf32>
    %190 = arith.addf %186, %189 : vector<8x128xf32>
    %191 = math.tanh %190 : vector<8x128xf32>
    %cst_40 = arith.constant 1.000000e+00 : f32
    %192 = vector.broadcast %cst_40 : f32 to vector<8x128xf32>
    %193 = arith.subf %192, %185 : vector<8x128xf32>
    %194 = arith.mulf %193, %191 : vector<8x128xf32>
    %195 = arith.mulf %185, %169 : vector<8x128xf32>
    %196 = arith.addf %194, %195 : vector<8x128xf32>
    %c7_i32 = arith.constant 7 : i32
    %197 = arith.index_cast %c7_i32 : i32 to index
    %c0_41 = arith.constant 0 : index
    %c0_42 = arith.constant 0 : index
    %198 = vector.load %arg2[%197, %c0_41, %c0_42] : memref<8x8x384xbf16, #tpu.memory_space<vmem>>, vector<1x8x384xbf16>
    %199 = vector.shape_cast %198 : vector<1x8x384xbf16> to vector<8x384xbf16>
    %200 = arith.extf %199 : vector<8x384xbf16> to vector<8x384xf32>
    %201 = arith.truncf %196 : vector<8x128xf32> to vector<8x128xbf16>
    %cst_43 = arith.constant dense<0.000000e+00> : vector<8x384xf32>
    %202 = tpu.matmul %201, %3, %cst_43 {dimension_numbers = #tpu.dot_dimension_numbers<[1], [0], [0], [1], [0, 0, 1, 1], [], []>} : vector<8x128xbf16>, vector<128x384xbf16>, vector<8x384xf32> -> vector<8x384xf32>
    %203 = vector.extract_strided_slice %200 {offsets = [0, 0], sizes = [8, 256], strides = [1, 1]} : vector<8x384xf32> to vector<8x256xf32>
    %204 = vector.extract_strided_slice %202 {offsets = [0, 0], sizes = [8, 256], strides = [1, 1]} : vector<8x384xf32> to vector<8x256xf32>
    %205 = arith.addf %203, %204 : vector<8x256xf32>
    %206 = arith.negf %205 : vector<8x256xf32>
    %207 = math.exp %206 : vector<8x256xf32>
    %cst_44 = arith.constant 1.000000e+00 : f32
    %208 = vector.broadcast %cst_44 : f32 to vector<8x256xf32>
    %209 = arith.addf %208, %207 : vector<8x256xf32>
    %210 = arith.divf %208, %209 : vector<8x256xf32>
    %211 = vector.extract_strided_slice %210 {offsets = [0, 0], sizes = [8, 128], strides = [1, 1]} : vector<8x256xf32> to vector<8x128xf32>
    %212 = vector.extract_strided_slice %210 {offsets = [0, 128], sizes = [8, 128], strides = [1, 1]} : vector<8x256xf32> to vector<8x128xf32>
    %213 = vector.extract_strided_slice %200 {offsets = [0, 256], sizes = [8, 128], strides = [1, 1]} : vector<8x384xf32> to vector<8x128xf32>
    %214 = vector.extract_strided_slice %202 {offsets = [0, 256], sizes = [8, 128], strides = [1, 1]} : vector<8x384xf32> to vector<8x128xf32>
    %215 = arith.addf %214, %6 : vector<8x128xf32>
    %216 = arith.mulf %211, %215 : vector<8x128xf32>
    %217 = arith.addf %213, %216 : vector<8x128xf32>
    %218 = math.tanh %217 : vector<8x128xf32>
    %cst_45 = arith.constant 1.000000e+00 : f32
    %219 = vector.broadcast %cst_45 : f32 to vector<8x128xf32>
    %220 = arith.subf %219, %212 : vector<8x128xf32>
    %221 = arith.mulf %220, %218 : vector<8x128xf32>
    %222 = arith.mulf %212, %196 : vector<8x128xf32>
    %223 = arith.addf %221, %222 : vector<8x128xf32>
    %c8_i32 = arith.constant 8 : i32
    %c0_46 = arith.constant 0 : index
    %c0_47 = arith.constant 0 : index
    %224 = vector.load %arg6[%c0_46, %c0_47] : memref<8x128xf32, #tpu.memory_space<vmem>>, vector<8x128xf32>
    tpu.vector_store %arg6[%c0_46, %c0_47], %223 {strides = array<i32>} : memref<8x128xf32, #tpu.memory_space<vmem>>, vector<8x128xf32>,
    %c0_48 = arith.constant 0 : index
    %c0_49 = arith.constant 0 : index
    %225 = vector.load %arg5[%c0_48, %c0_49] : memref<8x128xf32, #tpu.memory_space<vmem>>, vector<8x128xf32>
    tpu.vector_store %arg5[%c0_48, %c0_49], %223 {strides = array<i32>} : memref<8x128xf32, #tpu.memory_space<vmem>>, vector<8x128xf32>,
    return
  }
  func.func @transform_0(%arg0: i32, %arg1: i32) -> (i32, i32, i32) {
    %c0_i32 = arith.constant 0 : i32
    %c0_i32_0 = arith.constant 0 : i32
    return %arg1, %arg0, %c0_i32 : i32, i32, i32
  }
  func.func @transform_1(%arg0: i32, %arg1: i32) -> (i32, i32) {
    %c0_i32 = arith.constant 0 : i32
    %c0_i32_0 = arith.constant 0 : i32
    %c0_i32_1 = arith.constant 0 : i32
    return %c0_i32, %c0_i32_0 : i32, i32
  }
  func.func @transform_2(%arg0: i32, %arg1: i32) -> (i32, i32) {
    %c0_i32 = arith.constant 0 : i32
    %c0_i32_0 = arith.constant 0 : i32
    %c0_i32_1 = arith.constant 0 : i32
    return %c0_i32, %c0_i32_0 : i32, i32
  }
  func.func @transform_3(%arg0: i32, %arg1: i32) -> (i32, i32) {
    %c0_i32 = arith.constant 0 : i32
    %c0_i32_0 = arith.constant 0 : i32
    return %arg0, %c0_i32 : i32, i32
  }
}

module attributes {stable_mosaic.version = 11 : i64} {
  func.func @_gru_recurrence_kernel(%arg0: i32, %arg1: i32, %arg2: memref<8x8x384xbf16, #tpu.memory_space<vmem>>, %arg3: memref<128x384xbf16, #tpu.memory_space<vmem>>, %arg4: memref<1x128xf32, #tpu.memory_space<vmem>>, %arg5: memref<8x8x128xf32, #tpu.memory_space<vmem>>, %arg6: memref<8x128xf32, #tpu.memory_space<vmem>>) attributes {dimension_semantics = [#tpu.dimension_semantics<parallel>, #tpu.dimension_semantics<arbitrary>], iteration_bounds = array<i64: 1, 1>, scalar_prefetch = 0 : i64, scratch_operands = 1 : i64, tpu.core_type = #tpu.core_type<tc>, window_params = [{transform_indices = @transform_0, window_bounds = array<i64: 8, 8, 384>}, {pipeline_mode = #tpu.pipeline_mode<synchronous>, transform_indices = @transform_1, window_bounds = array<i64: 128, 384>}, {pipeline_mode = #tpu.pipeline_mode<synchronous>, transform_indices = @transform_2, window_bounds = array<i64: 1, 128>}, {transform_indices = @transform_3, window_bounds = array<i64: 8, 8, 128>}]} {
    %c0_i32 = arith.constant 0 : i32
    %0 = arith.cmpi eq, %arg1, %c0_i32 : i32
    %1 = arith.extui %0 : i1 to i32
    %c0_i32_0 = arith.constant 0 : i32
    %2 = arith.cmpi ne, %1, %c0_i32_0 : i32
    scf.if %2 {
      %cst_64 = arith.constant 0.000000e+00 : f32
      %257 = vector.broadcast %cst_64 : f32 to vector<8x128xf32>
      %c0_65 = arith.constant 0 : index
      %c0_66 = arith.constant 0 : index
      %258 = vector.load %arg6[%c0_65, %c0_66] : memref<8x128xf32, #tpu.memory_space<vmem>>, vector<8x128xf32>
      tpu.vector_store %arg6[%c0_65, %c0_66], %257 {strides = array<i32>} : memref<8x128xf32, #tpu.memory_space<vmem>>, vector<8x128xf32>,
    } else {
    }
    %c0 = arith.constant 0 : index
    %c0_1 = arith.constant 0 : index
    %3 = vector.load %arg3[%c0, %c0_1] : memref<128x384xbf16, #tpu.memory_space<vmem>>, vector<128x384xbf16>
    %c0_2 = arith.constant 0 : index
    %c0_3 = arith.constant 0 : index
    %4 = vector.load %arg4[%c0_2, %c0_3] : memref<1x128xf32, #tpu.memory_space<vmem>>, vector<1x128xf32>
    %5 = vector.shape_cast %4 : vector<1x128xf32> to vector<1x128xf32>
    %6 = vector.broadcast %5 : vector<1x128xf32> to vector<8x128xf32>
    %c0_4 = arith.constant 0 : index
    %c0_5 = arith.constant 0 : index
    %7 = vector.load %arg6[%c0_4, %c0_5] : memref<8x128xf32, #tpu.memory_space<vmem>>, vector<8x128xf32>
    %c0_i32_6 = arith.constant 0 : i32
    %8 = arith.index_cast %c0_i32_6 : i32 to index
    %c0_7 = arith.constant 0 : index
    %c0_8 = arith.constant 0 : index
    %9 = vector.load %arg2[%8, %c0_7, %c0_8] : memref<8x8x384xbf16, #tpu.memory_space<vmem>>, vector<1x8x384xbf16>
    %10 = vector.shape_cast %9 : vector<1x8x384xbf16> to vector<8x384xbf16>
    %11 = arith.extf %10 : vector<8x384xbf16> to vector<8x384xf32>
    %12 = arith.truncf %7 : vector<8x128xf32> to vector<8x128xbf16>
    %cst = arith.constant dense<0.000000e+00> : vector<8x384xf32>
    %13 = tpu.matmul %12, %3, %cst {dimension_numbers = #tpu.dot_dimension_numbers<[1], [0], [0], [1], [0, 0, 1, 1], [], []>} : vector<8x128xbf16>, vector<128x384xbf16>, vector<8x384xf32> -> vector<8x384xf32>
    %14 = vector.extract_strided_slice %11 {offsets = [0, 0], sizes = [8, 256], strides = [1, 1]} : vector<8x384xf32> to vector<8x256xf32>
    %15 = vector.extract_strided_slice %13 {offsets = [0, 0], sizes = [8, 256], strides = [1, 1]} : vector<8x384xf32> to vector<8x256xf32>
    %16 = arith.addf %14, %15 : vector<8x256xf32>
    %17 = arith.negf %16 : vector<8x256xf32>
    %18 = math.exp %17 : vector<8x256xf32>
    %cst_9 = arith.constant 1.000000e+00 : f32
    %19 = vector.broadcast %cst_9 : f32 to vector<8x256xf32>
    %20 = arith.addf %19, %18 : vector<8x256xf32>
    %21 = arith.divf %19, %20 : vector<8x256xf32>
    %22 = vector.extract_strided_slice %21 {offsets = [0, 0], sizes = [8, 128], strides = [1, 1]} : vector<8x256xf32> to vector<8x128xf32>
    %23 = vector.extract_strided_slice %21 {offsets = [0, 128], sizes = [8, 128], strides = [1, 1]} : vector<8x256xf32> to vector<8x128xf32>
    %24 = vector.extract_strided_slice %11 {offsets = [0, 256], sizes = [8, 128], strides = [1, 1]} : vector<8x384xf32> to vector<8x128xf32>
    %25 = vector.extract_strided_slice %13 {offsets = [0, 256], sizes = [8, 128], strides = [1, 1]} : vector<8x384xf32> to vector<8x128xf32>
    %26 = arith.addf %25, %6 : vector<8x128xf32>
    %27 = arith.mulf %22, %26 : vector<8x128xf32>
    %28 = arith.addf %24, %27 : vector<8x128xf32>
    %29 = math.tanh %28 : vector<8x128xf32>
    %cst_10 = arith.constant 1.000000e+00 : f32
    %30 = vector.broadcast %cst_10 : f32 to vector<8x128xf32>
    %31 = arith.subf %30, %23 : vector<8x128xf32>
    %32 = arith.mulf %31, %29 : vector<8x128xf32>
    %33 = arith.mulf %23, %7 : vector<8x128xf32>
    %34 = arith.addf %32, %33 : vector<8x128xf32>
    %35 = arith.index_cast %c0_i32_6 : i32 to index
    %c0_11 = arith.constant 0 : index
    %c0_12 = arith.constant 0 : index
    %36 = vector.load %arg5[%35, %c0_11, %c0_12] : memref<8x8x128xf32, #tpu.memory_space<vmem>>, vector<1x8x128xf32>
    %37 = vector.shape_cast %36 : vector<1x8x128xf32> to vector<8x128xf32>
    %38 = vector.shape_cast %34 : vector<8x128xf32> to vector<1x8x128xf32>
    tpu.vector_store %arg5[%35, %c0_11, %c0_12], %38 {strides = array<i32>} : memref<8x8x128xf32, #tpu.memory_space<vmem>>, vector<1x8x128xf32>,
    %c1_i32 = arith.constant 1 : i32
    %39 = arith.index_cast %c1_i32 : i32 to index
    %c0_13 = arith.constant 0 : index
    %c0_14 = arith.constant 0 : index
    %40 = vector.load %arg2[%39, %c0_13, %c0_14] : memref<8x8x384xbf16, #tpu.memory_space<vmem>>, vector<1x8x384xbf16>
    %41 = vector.shape_cast %40 : vector<1x8x384xbf16> to vector<8x384xbf16>
    %42 = arith.extf %41 : vector<8x384xbf16> to vector<8x384xf32>
    %43 = arith.truncf %34 : vector<8x128xf32> to vector<8x128xbf16>
    %cst_15 = arith.constant dense<0.000000e+00> : vector<8x384xf32>
    %44 = tpu.matmul %43, %3, %cst_15 {dimension_numbers = #tpu.dot_dimension_numbers<[1], [0], [0], [1], [0, 0, 1, 1], [], []>} : vector<8x128xbf16>, vector<128x384xbf16>, vector<8x384xf32> -> vector<8x384xf32>
    %45 = vector.extract_strided_slice %42 {offsets = [0, 0], sizes = [8, 256], strides = [1, 1]} : vector<8x384xf32> to vector<8x256xf32>
    %46 = vector.extract_strided_slice %44 {offsets = [0, 0], sizes = [8, 256], strides = [1, 1]} : vector<8x384xf32> to vector<8x256xf32>
    %47 = arith.addf %45, %46 : vector<8x256xf32>
    %48 = arith.negf %47 : vector<8x256xf32>
    %49 = math.exp %48 : vector<8x256xf32>
    %cst_16 = arith.constant 1.000000e+00 : f32
    %50 = vector.broadcast %cst_16 : f32 to vector<8x256xf32>
    %51 = arith.addf %50, %49 : vector<8x256xf32>
    %52 = arith.divf %50, %51 : vector<8x256xf32>
    %53 = vector.extract_strided_slice %52 {offsets = [0, 0], sizes = [8, 128], strides = [1, 1]} : vector<8x256xf32> to vector<8x128xf32>
    %54 = vector.extract_strided_slice %52 {offsets = [0, 128], sizes = [8, 128], strides = [1, 1]} : vector<8x256xf32> to vector<8x128xf32>
    %55 = vector.extract_strided_slice %42 {offsets = [0, 256], sizes = [8, 128], strides = [1, 1]} : vector<8x384xf32> to vector<8x128xf32>
    %56 = vector.extract_strided_slice %44 {offsets = [0, 256], sizes = [8, 128], strides = [1, 1]} : vector<8x384xf32> to vector<8x128xf32>
    %57 = arith.addf %56, %6 : vector<8x128xf32>
    %58 = arith.mulf %53, %57 : vector<8x128xf32>
    %59 = arith.addf %55, %58 : vector<8x128xf32>
    %60 = math.tanh %59 : vector<8x128xf32>
    %cst_17 = arith.constant 1.000000e+00 : f32
    %61 = vector.broadcast %cst_17 : f32 to vector<8x128xf32>
    %62 = arith.subf %61, %54 : vector<8x128xf32>
    %63 = arith.mulf %62, %60 : vector<8x128xf32>
    %64 = arith.mulf %54, %34 : vector<8x128xf32>
    %65 = arith.addf %63, %64 : vector<8x128xf32>
    %66 = arith.index_cast %c1_i32 : i32 to index
    %c0_18 = arith.constant 0 : index
    %c0_19 = arith.constant 0 : index
    %67 = vector.load %arg5[%66, %c0_18, %c0_19] : memref<8x8x128xf32, #tpu.memory_space<vmem>>, vector<1x8x128xf32>
    %68 = vector.shape_cast %67 : vector<1x8x128xf32> to vector<8x128xf32>
    %69 = vector.shape_cast %65 : vector<8x128xf32> to vector<1x8x128xf32>
    tpu.vector_store %arg5[%66, %c0_18, %c0_19], %69 {strides = array<i32>} : memref<8x8x128xf32, #tpu.memory_space<vmem>>, vector<1x8x128xf32>,
    %c2_i32 = arith.constant 2 : i32
    %70 = arith.index_cast %c2_i32 : i32 to index
    %c0_20 = arith.constant 0 : index
    %c0_21 = arith.constant 0 : index
    %71 = vector.load %arg2[%70, %c0_20, %c0_21] : memref<8x8x384xbf16, #tpu.memory_space<vmem>>, vector<1x8x384xbf16>
    %72 = vector.shape_cast %71 : vector<1x8x384xbf16> to vector<8x384xbf16>
    %73 = arith.extf %72 : vector<8x384xbf16> to vector<8x384xf32>
    %74 = arith.truncf %65 : vector<8x128xf32> to vector<8x128xbf16>
    %cst_22 = arith.constant dense<0.000000e+00> : vector<8x384xf32>
    %75 = tpu.matmul %74, %3, %cst_22 {dimension_numbers = #tpu.dot_dimension_numbers<[1], [0], [0], [1], [0, 0, 1, 1], [], []>} : vector<8x128xbf16>, vector<128x384xbf16>, vector<8x384xf32> -> vector<8x384xf32>
    %76 = vector.extract_strided_slice %73 {offsets = [0, 0], sizes = [8, 256], strides = [1, 1]} : vector<8x384xf32> to vector<8x256xf32>
    %77 = vector.extract_strided_slice %75 {offsets = [0, 0], sizes = [8, 256], strides = [1, 1]} : vector<8x384xf32> to vector<8x256xf32>
    %78 = arith.addf %76, %77 : vector<8x256xf32>
    %79 = arith.negf %78 : vector<8x256xf32>
    %80 = math.exp %79 : vector<8x256xf32>
    %cst_23 = arith.constant 1.000000e+00 : f32
    %81 = vector.broadcast %cst_23 : f32 to vector<8x256xf32>
    %82 = arith.addf %81, %80 : vector<8x256xf32>
    %83 = arith.divf %81, %82 : vector<8x256xf32>
    %84 = vector.extract_strided_slice %83 {offsets = [0, 0], sizes = [8, 128], strides = [1, 1]} : vector<8x256xf32> to vector<8x128xf32>
    %85 = vector.extract_strided_slice %83 {offsets = [0, 128], sizes = [8, 128], strides = [1, 1]} : vector<8x256xf32> to vector<8x128xf32>
    %86 = vector.extract_strided_slice %73 {offsets = [0, 256], sizes = [8, 128], strides = [1, 1]} : vector<8x384xf32> to vector<8x128xf32>
    %87 = vector.extract_strided_slice %75 {offsets = [0, 256], sizes = [8, 128], strides = [1, 1]} : vector<8x384xf32> to vector<8x128xf32>
    %88 = arith.addf %87, %6 : vector<8x128xf32>
    %89 = arith.mulf %84, %88 : vector<8x128xf32>
    %90 = arith.addf %86, %89 : vector<8x128xf32>
    %91 = math.tanh %90 : vector<8x128xf32>
    %cst_24 = arith.constant 1.000000e+00 : f32
    %92 = vector.broadcast %cst_24 : f32 to vector<8x128xf32>
    %93 = arith.subf %92, %85 : vector<8x128xf32>
    %94 = arith.mulf %93, %91 : vector<8x128xf32>
    %95 = arith.mulf %85, %65 : vector<8x128xf32>
    %96 = arith.addf %94, %95 : vector<8x128xf32>
    %97 = arith.index_cast %c2_i32 : i32 to index
    %c0_25 = arith.constant 0 : index
    %c0_26 = arith.constant 0 : index
    %98 = vector.load %arg5[%97, %c0_25, %c0_26] : memref<8x8x128xf32, #tpu.memory_space<vmem>>, vector<1x8x128xf32>
    %99 = vector.shape_cast %98 : vector<1x8x128xf32> to vector<8x128xf32>
    %100 = vector.shape_cast %96 : vector<8x128xf32> to vector<1x8x128xf32>
    tpu.vector_store %arg5[%97, %c0_25, %c0_26], %100 {strides = array<i32>} : memref<8x8x128xf32, #tpu.memory_space<vmem>>, vector<1x8x128xf32>,
    %c3_i32 = arith.constant 3 : i32
    %101 = arith.index_cast %c3_i32 : i32 to index
    %c0_27 = arith.constant 0 : index
    %c0_28 = arith.constant 0 : index
    %102 = vector.load %arg2[%101, %c0_27, %c0_28] : memref<8x8x384xbf16, #tpu.memory_space<vmem>>, vector<1x8x384xbf16>
    %103 = vector.shape_cast %102 : vector<1x8x384xbf16> to vector<8x384xbf16>
    %104 = arith.extf %103 : vector<8x384xbf16> to vector<8x384xf32>
    %105 = arith.truncf %96 : vector<8x128xf32> to vector<8x128xbf16>
    %cst_29 = arith.constant dense<0.000000e+00> : vector<8x384xf32>
    %106 = tpu.matmul %105, %3, %cst_29 {dimension_numbers = #tpu.dot_dimension_numbers<[1], [0], [0], [1], [0, 0, 1, 1], [], []>} : vector<8x128xbf16>, vector<128x384xbf16>, vector<8x384xf32> -> vector<8x384xf32>
    %107 = vector.extract_strided_slice %104 {offsets = [0, 0], sizes = [8, 256], strides = [1, 1]} : vector<8x384xf32> to vector<8x256xf32>
    %108 = vector.extract_strided_slice %106 {offsets = [0, 0], sizes = [8, 256], strides = [1, 1]} : vector<8x384xf32> to vector<8x256xf32>
    %109 = arith.addf %107, %108 : vector<8x256xf32>
    %110 = arith.negf %109 : vector<8x256xf32>
    %111 = math.exp %110 : vector<8x256xf32>
    %cst_30 = arith.constant 1.000000e+00 : f32
    %112 = vector.broadcast %cst_30 : f32 to vector<8x256xf32>
    %113 = arith.addf %112, %111 : vector<8x256xf32>
    %114 = arith.divf %112, %113 : vector<8x256xf32>
    %115 = vector.extract_strided_slice %114 {offsets = [0, 0], sizes = [8, 128], strides = [1, 1]} : vector<8x256xf32> to vector<8x128xf32>
    %116 = vector.extract_strided_slice %114 {offsets = [0, 128], sizes = [8, 128], strides = [1, 1]} : vector<8x256xf32> to vector<8x128xf32>
    %117 = vector.extract_strided_slice %104 {offsets = [0, 256], sizes = [8, 128], strides = [1, 1]} : vector<8x384xf32> to vector<8x128xf32>
    %118 = vector.extract_strided_slice %106 {offsets = [0, 256], sizes = [8, 128], strides = [1, 1]} : vector<8x384xf32> to vector<8x128xf32>
    %119 = arith.addf %118, %6 : vector<8x128xf32>
    %120 = arith.mulf %115, %119 : vector<8x128xf32>
    %121 = arith.addf %117, %120 : vector<8x128xf32>
    %122 = math.tanh %121 : vector<8x128xf32>
    %cst_31 = arith.constant 1.000000e+00 : f32
    %123 = vector.broadcast %cst_31 : f32 to vector<8x128xf32>
    %124 = arith.subf %123, %116 : vector<8x128xf32>
    %125 = arith.mulf %124, %122 : vector<8x128xf32>
    %126 = arith.mulf %116, %96 : vector<8x128xf32>
    %127 = arith.addf %125, %126 : vector<8x128xf32>
    %128 = arith.index_cast %c3_i32 : i32 to index
    %c0_32 = arith.constant 0 : index
    %c0_33 = arith.constant 0 : index
    %129 = vector.load %arg5[%128, %c0_32, %c0_33] : memref<8x8x128xf32, #tpu.memory_space<vmem>>, vector<1x8x128xf32>
    %130 = vector.shape_cast %129 : vector<1x8x128xf32> to vector<8x128xf32>
    %131 = vector.shape_cast %127 : vector<8x128xf32> to vector<1x8x128xf32>
    tpu.vector_store %arg5[%128, %c0_32, %c0_33], %131 {strides = array<i32>} : memref<8x8x128xf32, #tpu.memory_space<vmem>>, vector<1x8x128xf32>,
    %c4_i32 = arith.constant 4 : i32
    %132 = arith.index_cast %c4_i32 : i32 to index
    %c0_34 = arith.constant 0 : index
    %c0_35 = arith.constant 0 : index
    %133 = vector.load %arg2[%132, %c0_34, %c0_35] : memref<8x8x384xbf16, #tpu.memory_space<vmem>>, vector<1x8x384xbf16>
    %134 = vector.shape_cast %133 : vector<1x8x384xbf16> to vector<8x384xbf16>
    %135 = arith.extf %134 : vector<8x384xbf16> to vector<8x384xf32>
    %136 = arith.truncf %127 : vector<8x128xf32> to vector<8x128xbf16>
    %cst_36 = arith.constant dense<0.000000e+00> : vector<8x384xf32>
    %137 = tpu.matmul %136, %3, %cst_36 {dimension_numbers = #tpu.dot_dimension_numbers<[1], [0], [0], [1], [0, 0, 1, 1], [], []>} : vector<8x128xbf16>, vector<128x384xbf16>, vector<8x384xf32> -> vector<8x384xf32>
    %138 = vector.extract_strided_slice %135 {offsets = [0, 0], sizes = [8, 256], strides = [1, 1]} : vector<8x384xf32> to vector<8x256xf32>
    %139 = vector.extract_strided_slice %137 {offsets = [0, 0], sizes = [8, 256], strides = [1, 1]} : vector<8x384xf32> to vector<8x256xf32>
    %140 = arith.addf %138, %139 : vector<8x256xf32>
    %141 = arith.negf %140 : vector<8x256xf32>
    %142 = math.exp %141 : vector<8x256xf32>
    %cst_37 = arith.constant 1.000000e+00 : f32
    %143 = vector.broadcast %cst_37 : f32 to vector<8x256xf32>
    %144 = arith.addf %143, %142 : vector<8x256xf32>
    %145 = arith.divf %143, %144 : vector<8x256xf32>
    %146 = vector.extract_strided_slice %145 {offsets = [0, 0], sizes = [8, 128], strides = [1, 1]} : vector<8x256xf32> to vector<8x128xf32>
    %147 = vector.extract_strided_slice %145 {offsets = [0, 128], sizes = [8, 128], strides = [1, 1]} : vector<8x256xf32> to vector<8x128xf32>
    %148 = vector.extract_strided_slice %135 {offsets = [0, 256], sizes = [8, 128], strides = [1, 1]} : vector<8x384xf32> to vector<8x128xf32>
    %149 = vector.extract_strided_slice %137 {offsets = [0, 256], sizes = [8, 128], strides = [1, 1]} : vector<8x384xf32> to vector<8x128xf32>
    %150 = arith.addf %149, %6 : vector<8x128xf32>
    %151 = arith.mulf %146, %150 : vector<8x128xf32>
    %152 = arith.addf %148, %151 : vector<8x128xf32>
    %153 = math.tanh %152 : vector<8x128xf32>
    %cst_38 = arith.constant 1.000000e+00 : f32
    %154 = vector.broadcast %cst_38 : f32 to vector<8x128xf32>
    %155 = arith.subf %154, %147 : vector<8x128xf32>
    %156 = arith.mulf %155, %153 : vector<8x128xf32>
    %157 = arith.mulf %147, %127 : vector<8x128xf32>
    %158 = arith.addf %156, %157 : vector<8x128xf32>
    %159 = arith.index_cast %c4_i32 : i32 to index
    %c0_39 = arith.constant 0 : index
    %c0_40 = arith.constant 0 : index
    %160 = vector.load %arg5[%159, %c0_39, %c0_40] : memref<8x8x128xf32, #tpu.memory_space<vmem>>, vector<1x8x128xf32>
    %161 = vector.shape_cast %160 : vector<1x8x128xf32> to vector<8x128xf32>
    %162 = vector.shape_cast %158 : vector<8x128xf32> to vector<1x8x128xf32>
    tpu.vector_store %arg5[%159, %c0_39, %c0_40], %162 {strides = array<i32>} : memref<8x8x128xf32, #tpu.memory_space<vmem>>, vector<1x8x128xf32>,
    %c5_i32 = arith.constant 5 : i32
    %163 = arith.index_cast %c5_i32 : i32 to index
    %c0_41 = arith.constant 0 : index
    %c0_42 = arith.constant 0 : index
    %164 = vector.load %arg2[%163, %c0_41, %c0_42] : memref<8x8x384xbf16, #tpu.memory_space<vmem>>, vector<1x8x384xbf16>
    %165 = vector.shape_cast %164 : vector<1x8x384xbf16> to vector<8x384xbf16>
    %166 = arith.extf %165 : vector<8x384xbf16> to vector<8x384xf32>
    %167 = arith.truncf %158 : vector<8x128xf32> to vector<8x128xbf16>
    %cst_43 = arith.constant dense<0.000000e+00> : vector<8x384xf32>
    %168 = tpu.matmul %167, %3, %cst_43 {dimension_numbers = #tpu.dot_dimension_numbers<[1], [0], [0], [1], [0, 0, 1, 1], [], []>} : vector<8x128xbf16>, vector<128x384xbf16>, vector<8x384xf32> -> vector<8x384xf32>
    %169 = vector.extract_strided_slice %166 {offsets = [0, 0], sizes = [8, 256], strides = [1, 1]} : vector<8x384xf32> to vector<8x256xf32>
    %170 = vector.extract_strided_slice %168 {offsets = [0, 0], sizes = [8, 256], strides = [1, 1]} : vector<8x384xf32> to vector<8x256xf32>
    %171 = arith.addf %169, %170 : vector<8x256xf32>
    %172 = arith.negf %171 : vector<8x256xf32>
    %173 = math.exp %172 : vector<8x256xf32>
    %cst_44 = arith.constant 1.000000e+00 : f32
    %174 = vector.broadcast %cst_44 : f32 to vector<8x256xf32>
    %175 = arith.addf %174, %173 : vector<8x256xf32>
    %176 = arith.divf %174, %175 : vector<8x256xf32>
    %177 = vector.extract_strided_slice %176 {offsets = [0, 0], sizes = [8, 128], strides = [1, 1]} : vector<8x256xf32> to vector<8x128xf32>
    %178 = vector.extract_strided_slice %176 {offsets = [0, 128], sizes = [8, 128], strides = [1, 1]} : vector<8x256xf32> to vector<8x128xf32>
    %179 = vector.extract_strided_slice %166 {offsets = [0, 256], sizes = [8, 128], strides = [1, 1]} : vector<8x384xf32> to vector<8x128xf32>
    %180 = vector.extract_strided_slice %168 {offsets = [0, 256], sizes = [8, 128], strides = [1, 1]} : vector<8x384xf32> to vector<8x128xf32>
    %181 = arith.addf %180, %6 : vector<8x128xf32>
    %182 = arith.mulf %177, %181 : vector<8x128xf32>
    %183 = arith.addf %179, %182 : vector<8x128xf32>
    %184 = math.tanh %183 : vector<8x128xf32>
    %cst_45 = arith.constant 1.000000e+00 : f32
    %185 = vector.broadcast %cst_45 : f32 to vector<8x128xf32>
    %186 = arith.subf %185, %178 : vector<8x128xf32>
    %187 = arith.mulf %186, %184 : vector<8x128xf32>
    %188 = arith.mulf %178, %158 : vector<8x128xf32>
    %189 = arith.addf %187, %188 : vector<8x128xf32>
    %190 = arith.index_cast %c5_i32 : i32 to index
    %c0_46 = arith.constant 0 : index
    %c0_47 = arith.constant 0 : index
    %191 = vector.load %arg5[%190, %c0_46, %c0_47] : memref<8x8x128xf32, #tpu.memory_space<vmem>>, vector<1x8x128xf32>
    %192 = vector.shape_cast %191 : vector<1x8x128xf32> to vector<8x128xf32>
    %193 = vector.shape_cast %189 : vector<8x128xf32> to vector<1x8x128xf32>
    tpu.vector_store %arg5[%190, %c0_46, %c0_47], %193 {strides = array<i32>} : memref<8x8x128xf32, #tpu.memory_space<vmem>>, vector<1x8x128xf32>,
    %c6_i32 = arith.constant 6 : i32
    %194 = arith.index_cast %c6_i32 : i32 to index
    %c0_48 = arith.constant 0 : index
    %c0_49 = arith.constant 0 : index
    %195 = vector.load %arg2[%194, %c0_48, %c0_49] : memref<8x8x384xbf16, #tpu.memory_space<vmem>>, vector<1x8x384xbf16>
    %196 = vector.shape_cast %195 : vector<1x8x384xbf16> to vector<8x384xbf16>
    %197 = arith.extf %196 : vector<8x384xbf16> to vector<8x384xf32>
    %198 = arith.truncf %189 : vector<8x128xf32> to vector<8x128xbf16>
    %cst_50 = arith.constant dense<0.000000e+00> : vector<8x384xf32>
    %199 = tpu.matmul %198, %3, %cst_50 {dimension_numbers = #tpu.dot_dimension_numbers<[1], [0], [0], [1], [0, 0, 1, 1], [], []>} : vector<8x128xbf16>, vector<128x384xbf16>, vector<8x384xf32> -> vector<8x384xf32>
    %200 = vector.extract_strided_slice %197 {offsets = [0, 0], sizes = [8, 256], strides = [1, 1]} : vector<8x384xf32> to vector<8x256xf32>
    %201 = vector.extract_strided_slice %199 {offsets = [0, 0], sizes = [8, 256], strides = [1, 1]} : vector<8x384xf32> to vector<8x256xf32>
    %202 = arith.addf %200, %201 : vector<8x256xf32>
    %203 = arith.negf %202 : vector<8x256xf32>
    %204 = math.exp %203 : vector<8x256xf32>
    %cst_51 = arith.constant 1.000000e+00 : f32
    %205 = vector.broadcast %cst_51 : f32 to vector<8x256xf32>
    %206 = arith.addf %205, %204 : vector<8x256xf32>
    %207 = arith.divf %205, %206 : vector<8x256xf32>
    %208 = vector.extract_strided_slice %207 {offsets = [0, 0], sizes = [8, 128], strides = [1, 1]} : vector<8x256xf32> to vector<8x128xf32>
    %209 = vector.extract_strided_slice %207 {offsets = [0, 128], sizes = [8, 128], strides = [1, 1]} : vector<8x256xf32> to vector<8x128xf32>
    %210 = vector.extract_strided_slice %197 {offsets = [0, 256], sizes = [8, 128], strides = [1, 1]} : vector<8x384xf32> to vector<8x128xf32>
    %211 = vector.extract_strided_slice %199 {offsets = [0, 256], sizes = [8, 128], strides = [1, 1]} : vector<8x384xf32> to vector<8x128xf32>
    %212 = arith.addf %211, %6 : vector<8x128xf32>
    %213 = arith.mulf %208, %212 : vector<8x128xf32>
    %214 = arith.addf %210, %213 : vector<8x128xf32>
    %215 = math.tanh %214 : vector<8x128xf32>
    %cst_52 = arith.constant 1.000000e+00 : f32
    %216 = vector.broadcast %cst_52 : f32 to vector<8x128xf32>
    %217 = arith.subf %216, %209 : vector<8x128xf32>
    %218 = arith.mulf %217, %215 : vector<8x128xf32>
    %219 = arith.mulf %209, %189 : vector<8x128xf32>
    %220 = arith.addf %218, %219 : vector<8x128xf32>
    %221 = arith.index_cast %c6_i32 : i32 to index
    %c0_53 = arith.constant 0 : index
    %c0_54 = arith.constant 0 : index
    %222 = vector.load %arg5[%221, %c0_53, %c0_54] : memref<8x8x128xf32, #tpu.memory_space<vmem>>, vector<1x8x128xf32>
    %223 = vector.shape_cast %222 : vector<1x8x128xf32> to vector<8x128xf32>
    %224 = vector.shape_cast %220 : vector<8x128xf32> to vector<1x8x128xf32>
    tpu.vector_store %arg5[%221, %c0_53, %c0_54], %224 {strides = array<i32>} : memref<8x8x128xf32, #tpu.memory_space<vmem>>, vector<1x8x128xf32>,
    %c7_i32 = arith.constant 7 : i32
    %225 = arith.index_cast %c7_i32 : i32 to index
    %c0_55 = arith.constant 0 : index
    %c0_56 = arith.constant 0 : index
    %226 = vector.load %arg2[%225, %c0_55, %c0_56] : memref<8x8x384xbf16, #tpu.memory_space<vmem>>, vector<1x8x384xbf16>
    %227 = vector.shape_cast %226 : vector<1x8x384xbf16> to vector<8x384xbf16>
    %228 = arith.extf %227 : vector<8x384xbf16> to vector<8x384xf32>
    %229 = arith.truncf %220 : vector<8x128xf32> to vector<8x128xbf16>
    %cst_57 = arith.constant dense<0.000000e+00> : vector<8x384xf32>
    %230 = tpu.matmul %229, %3, %cst_57 {dimension_numbers = #tpu.dot_dimension_numbers<[1], [0], [0], [1], [0, 0, 1, 1], [], []>} : vector<8x128xbf16>, vector<128x384xbf16>, vector<8x384xf32> -> vector<8x384xf32>
    %231 = vector.extract_strided_slice %228 {offsets = [0, 0], sizes = [8, 256], strides = [1, 1]} : vector<8x384xf32> to vector<8x256xf32>
    %232 = vector.extract_strided_slice %230 {offsets = [0, 0], sizes = [8, 256], strides = [1, 1]} : vector<8x384xf32> to vector<8x256xf32>
    %233 = arith.addf %231, %232 : vector<8x256xf32>
    %234 = arith.negf %233 : vector<8x256xf32>
    %235 = math.exp %234 : vector<8x256xf32>
    %cst_58 = arith.constant 1.000000e+00 : f32
    %236 = vector.broadcast %cst_58 : f32 to vector<8x256xf32>
    %237 = arith.addf %236, %235 : vector<8x256xf32>
    %238 = arith.divf %236, %237 : vector<8x256xf32>
    %239 = vector.extract_strided_slice %238 {offsets = [0, 0], sizes = [8, 128], strides = [1, 1]} : vector<8x256xf32> to vector<8x128xf32>
    %240 = vector.extract_strided_slice %238 {offsets = [0, 128], sizes = [8, 128], strides = [1, 1]} : vector<8x256xf32> to vector<8x128xf32>
    %241 = vector.extract_strided_slice %228 {offsets = [0, 256], sizes = [8, 128], strides = [1, 1]} : vector<8x384xf32> to vector<8x128xf32>
    %242 = vector.extract_strided_slice %230 {offsets = [0, 256], sizes = [8, 128], strides = [1, 1]} : vector<8x384xf32> to vector<8x128xf32>
    %243 = arith.addf %242, %6 : vector<8x128xf32>
    %244 = arith.mulf %239, %243 : vector<8x128xf32>
    %245 = arith.addf %241, %244 : vector<8x128xf32>
    %246 = math.tanh %245 : vector<8x128xf32>
    %cst_59 = arith.constant 1.000000e+00 : f32
    %247 = vector.broadcast %cst_59 : f32 to vector<8x128xf32>
    %248 = arith.subf %247, %240 : vector<8x128xf32>
    %249 = arith.mulf %248, %246 : vector<8x128xf32>
    %250 = arith.mulf %240, %220 : vector<8x128xf32>
    %251 = arith.addf %249, %250 : vector<8x128xf32>
    %252 = arith.index_cast %c7_i32 : i32 to index
    %c0_60 = arith.constant 0 : index
    %c0_61 = arith.constant 0 : index
    %253 = vector.load %arg5[%252, %c0_60, %c0_61] : memref<8x8x128xf32, #tpu.memory_space<vmem>>, vector<1x8x128xf32>
    %254 = vector.shape_cast %253 : vector<1x8x128xf32> to vector<8x128xf32>
    %255 = vector.shape_cast %251 : vector<8x128xf32> to vector<1x8x128xf32>
    tpu.vector_store %arg5[%252, %c0_60, %c0_61], %255 {strides = array<i32>} : memref<8x8x128xf32, #tpu.memory_space<vmem>>, vector<1x8x128xf32>,
    %c8_i32 = arith.constant 8 : i32
    %c0_62 = arith.constant 0 : index
    %c0_63 = arith.constant 0 : index
    %256 = vector.load %arg6[%c0_62, %c0_63] : memref<8x128xf32, #tpu.memory_space<vmem>>, vector<8x128xf32>
    tpu.vector_store %arg6[%c0_62, %c0_63], %251 {strides = array<i32>} : memref<8x128xf32, #tpu.memory_space<vmem>>, vector<8x128xf32>,
    return
  }
  func.func @transform_0(%arg0: i32, %arg1: i32) -> (i32, i32, i32) {
    %c0_i32 = arith.constant 0 : i32
    %c0_i32_0 = arith.constant 0 : i32
    return %arg1, %arg0, %c0_i32 : i32, i32, i32
  }
  func.func @transform_1(%arg0: i32, %arg1: i32) -> (i32, i32) {
    %c0_i32 = arith.constant 0 : i32
    %c0_i32_0 = arith.constant 0 : i32
    %c0_i32_1 = arith.constant 0 : i32
    return %c0_i32, %c0_i32_0 : i32, i32
  }
  func.func @transform_2(%arg0: i32, %arg1: i32) -> (i32, i32) {
    %c0_i32 = arith.constant 0 : i32
    %c0_i32_0 = arith.constant 0 : i32
    %c0_i32_1 = arith.constant 0 : i32
    return %c0_i32, %c0_i32_0 : i32, i32
  }
  func.func @transform_3(%arg0: i32, %arg1: i32) -> (i32, i32, i32) {
    %c0_i32 = arith.constant 0 : i32
    %c0_i32_0 = arith.constant 0 : i32
    return %arg1, %arg0, %c0_i32 : i32, i32, i32
  }
}

</mosaic_0001>

<bundles_post_ra>
// kernel: gru_encoder_forward.3
= control target key start
LH: loop header
LB: loop body
LE: loop exit
PB: predicated region body
PF: predicated region fallthrough
CT: control target
= control target key end

     0   :  { %v1483_v1 = vmov 0.0   ;;  %v1484_v2 = vmov 0   ;;  %vm1485_vm0 = vmmov 0   ;;  %v1486_v25 = vmov 0.0|0.0   ;;  %s2015_s1 = inlined_call_operand.vmem [shape: bf16[128,384], index: 1, kind: input, shape index: {}]   ;;  %s2016_s0 = inlined_call_operand.vmem [shape: bf16[8,8,384], index: 0, kind: input, shape index: {}]   ;;  %s2017_s2 = inlined_call_operand.vmem [shape: f32[1,128], index: 2, kind: input, shape index: {}]   ;;  %s2018_s3 = inlined_call_operand.vmem [shape: f32[8,128], index: 3, kind: output, shape index: {}]  }
   0x1   :  { %v1510_v0 = vld [vmem:[%s2015_s1 + $0x4] ss:$12 sps:$4 sm:$0xff]   ;;  %1200 = vmatprep.subr.bf16.mxu1 %v1483_v1  ;;  %226 = vmatprep.mubr.bf16.mxu0 %v1484_v2  ;;  %v1517_v3 = vld [vmem:[%s2015_s1] ss:$12 sps:$4 sm:$0xff]   ;;  %v1525_v4 = vld [vmem:[%s2015_s1 + $0x1c] ss:$12 sps:$4 sm:$0xff]  }
   0x2   :  { %1216 = vmatprep.mubr.msk.bf16.mxu1 %vm1485_vm0, %v1483_v1  ;;  %194 = vmatprep.subr.bf16.mxu0 %v1510_v0  ;;  %v1531_v5 = vld [vmem:[%s2015_s1 + $0x18] ss:$12 sps:$4 sm:$0xff]   ;;  %v1537_v6 = vld [vmem:[%s2015_s1 + $0x34] ss:$12 sps:$4 sm:$0xff]   ;;  %v1543_v7 = vld [vmem:[%s2015_s1 + $0x30] ss:$12 sps:$4 sm:$0xff]  }
   0x3   :  { %195 = vmatpush1.bf16.msra.mxu0 %v1517_v3  ;;  %v1549_v8 = vld [vmem:[%s2015_s1 + $0x4c] ss:$12 sps:$4 sm:$0xff]   ;;  %v1554_v9 = vld [vmem:[%s2015_s1 + $0x8] ss:$12 sps:$4 sm:$0xff]   ;;  %v1567_v11 = vld [vmem:[%s2015_s1 + $0x64] ss:$12 sps:$4 sm:$0xff]  }
   0x4   :  { %196 = vmatprep.subr.bf16.mxu0 %v1525_v4  ;;  %v1560_v10 = vld [vmem:[%s2015_s1 + $0x48] ss:$12 sps:$4 sm:$0xff]   ;;  %1201 = vmatpush3.bf16.msra.mxu1 %v1554_v9  ;;  %v1573_v12 = vld [vmem:[%s2015_s1 + $0x20] ss:$12 sps:$4 sm:$0xff]   ;;  %v1585_v14 = vld [vmem:[%s2015_s1 + $0x38] ss:$12 sps:$4 sm:$0xff]  }
   0x5   :  { %1202 = vmatprep.subr.bf16.mxu1 %v1483_v1  ;;  %v1578_v13 = vld [vmem:[%s2015_s1 + $0x60] ss:$12 sps:$4 sm:$0xff]   ;;  %v1591_v15 = vld [vmem:[%s2015_s1 + $0x7c] ss:$12 sps:$4 sm:$0xff]   ;;  %v1598_v16 = vld [vmem:[%s2015_s1 + $0x78] ss:$12 sps:$4 sm:$0xff]  }
   0x6   :  { %v1604_v17 = vld [vmem:[%s2015_s1 + $0x50] ss:$12 sps:$4 sm:$0xff]   ;;  %v1610_v18 = vld [vmem:[%s2015_s1 + $0x94] ss:$12 sps:$4 sm:$0xff]   ;;  %v1629_v21 = vld [vmem:[%s2015_s1 + $0xac] ss:$12 sps:$4 sm:$0xff]  }
   0x7   :  { %197 = vmatpush1.bf16.msra.mxu0 %v1531_v5  ;;  %v1617_v19 = vld [vmem:[%s2015_s1 + $0x90] ss:$12 sps:$4 sm:$0xff]   ;;  %v1623_v20 = vld [vmem:[%s2015_s1 + $0x68] ss:$12 sps:$4 sm:$0xff]   ;;  %v1642_v23 = vld [vmem:[%s2015_s1 + $0x80] ss:$12 sps:$4 sm:$0xff]  }
   0x8   :  { %198 = vmatprep.subr.bf16.mxu0 %v1537_v6  ;;  %1203 = vmatpush3.bf16.msra.mxu1 %v1573_v12  ;;  %v1636_v22 = vld [vmem:[%s2015_s1 + $0xa8] ss:$12 sps:$4 sm:$0xff]   ;;  %v1651_v24 = vld [vmem:[%s2015_s1 + $0x98] ss:$12 sps:$4 sm:$0xff]   ;;  %v1659_v26 = vld [vmem:[%s2015_s1 + $0xb0] ss:$12 sps:$4 sm:$0xff]  }
   0x9   :  { %1204 = vmatprep.subr.bf16.mxu1 %v1483_v1  ;;  %v60_v27 = vld [vmem:[%s2016_s0] sm:$0xff]  ;;  %v1710_v46 = vld [vmem:[%s2016_s0 + $0x8] ss:$12 sps:$4 sm:$0xff]   ;;  %v1100_v60 = vld [vmem:[%s2016_s0 + $0xc] sm:$0xff] }
   0xa   :  { %v62_v28 = vunpack.c.l.bf16 %v60_v27  ;;  %v63_v30 = vunpack.c.h.bf16 %v60_v27  ;;  %v1705_v45 = vld [vmem:[%s2017_s2] ss:$0 sm:$0xff]  ;;  %v64_v49 = vunpack.c.l.bf16 %v1710_v46  ;;  %v300_v61 = vunpack.c.l.bf16 %v1100_v60 }
   0xb   :  { %199 = vmatpush1.bf16.msra.mxu0 %v1543_v7 }
   0xc   :  { %200 = vmatprep.subr.bf16.mxu0 %v1549_v8  ;;  %1205 = vmatpush3.bf16.msra.mxu1 %v1585_v14 }
   0xd   :  { %1206 = vmatprep.subr.bf16.mxu1 %v1483_v1 }
   0xf   :  { %201 = vmatpush1.bf16.msra.mxu0 %v1560_v10 }
  0x10   :  { %202 = vmatprep.subr.bf16.mxu0 %v1567_v11  ;;  %1207 = vmatpush3.bf16.msra.mxu1 %v1604_v17 }
  0x11   :  { %1208 = vmatprep.subr.bf16.mxu1 %v1483_v1 }
  0x13   :  { %203 = vmatpush1.bf16.msra.mxu0 %v1578_v13 }
  0x14   :  { %204 = vmatprep.subr.bf16.mxu0 %v1591_v15  ;;  %1209 = vmatpush3.bf16.msra.mxu1 %v1623_v20 }
  0x15   :  { %1210 = vmatprep.subr.bf16.mxu1 %v1483_v1 }
  0x17   :  { %205 = vmatpush1.bf16.msra.mxu0 %v1598_v16 }
  0x18   :  { %206 = vmatprep.subr.bf16.mxu0 %v1610_v18  ;;  %1211 = vmatpush3.bf16.msra.mxu1 %v1642_v23 }
  0x19   :  { %1212 = vmatprep.subr.bf16.mxu1 %v1483_v1 }
  0x1b   :  { %207 = vmatpush1.bf16.msra.mxu0 %v1617_v19 }
  0x1c   :  { %208 = vmatprep.subr.bf16.mxu0 %v1629_v21  ;;  %1213 = vmatpush3.bf16.msra.mxu1 %v1651_v24 }
  0x1d   :  { %1214 = vmatprep.subr.bf16.mxu1 %v1483_v1 }
  0x1f   :  { %209 = vmatpush1.bf16.msra.mxu0 %v1636_v22 }
  0x20   :  { %304 = vmatprep.subr.bf16.mxu0 %v1510_v0  ;;  %1215 = vmatpush3.bf16.msra.mxu1 %v1659_v26 }
  0x21   :  { %1220 = vmatprep.subr.bf16.mxu1 %v1483_v1 }
  0x22   :  { %227 = vmatmul.mubr.bf16.vlgmr.msra.gmra.mrb[0].mxu0 %v1486_v25 }
  0x23   :  { %305 = vmatpush1.bf16.msra.mxu0 %v1517_v3  ;;  %336 = vmatprep.mubr.bf16.mxu0 %v1484_v2 }
  0x24   :  { %306 = vmatprep.subr.bf16.mxu0 %v1525_v4  ;;  %1217 = vmatmul.mubr.bf16.vlgmr.msra.gmra.mrb[0].mxu1 %v1486_v25  ;;  %v301_v25 = vunpack.c.h.bf16 %v1100_v60 }
  0x25   :  { %1221 = vmatpush3.bf16.msra.mxu1 %v1554_v9  ;;  %1236 = vmatprep.mubr.msk.bf16.mxu1 %vm1485_vm0, %v1483_v1 }
  0x26   :  { %1222 = vmatprep.subr.bf16.mxu1 %v1483_v1 }
  0x27   :  { %307 = vmatpush1.bf16.msra.mxu0 %v1531_v5 }
  0x28   :  { %308 = vmatprep.subr.bf16.mxu0 %v1537_v6 }
  0x29   :  { %1223 = vmatpush3.bf16.msra.mxu1 %v1573_v12 }
  0x2a   :  { %1224 = vmatprep.subr.bf16.mxu1 %v1483_v1 }
  0x2b   :  { %309 = vmatpush1.bf16.msra.mxu0 %v1543_v7 }
  0x2c   :  { %310 = vmatprep.subr.bf16.mxu0 %v1549_v8 }
  0x2d   :  { %1225 = vmatpush3.bf16.msra.mxu1 %v1585_v14 }
  0x2e   :  { %1226 = vmatprep.subr.bf16.mxu1 %v1483_v1 }
  0x2f   :  { %311 = vmatpush1.bf16.msra.mxu0 %v1560_v10 }
  0x30   :  { %312 = vmatprep.subr.bf16.mxu0 %v1567_v11 }
  0x31   :  { %1227 = vmatpush3.bf16.msra.mxu1 %v1604_v17 }
  0x32   :  { %1228 = vmatprep.subr.bf16.mxu1 %v1483_v1 }
  0x33   :  { %313 = vmatpush1.bf16.msra.mxu0 %v1578_v13 }
  0x34   :  { %314 = vmatprep.subr.bf16.mxu0 %v1591_v15 }
  0x35   :  { %1229 = vmatpush3.bf16.msra.mxu1 %v1623_v20 }
  0x36   :  { %1230 = vmatprep.subr.bf16.mxu1 %v1483_v1 }
  0x37   :  { %315 = vmatpush1.bf16.msra.mxu0 %v1598_v16 }
  0x38   :  { %316 = vmatprep.subr.bf16.mxu0 %v1610_v18 }
  0x39   :  { %1231 = vmatpush3.bf16.msra.mxu1 %v1642_v23 }
  0x3a   :  { %1232 = vmatprep.subr.bf16.mxu1 %v1483_v1 }
  0x3b   :  { %317 = vmatpush1.bf16.msra.mxu0 %v1617_v19 }
  0x3c   :  { %318 = vmatprep.subr.bf16.mxu0 %v1629_v21 }
  0x3d   :  { %1233 = vmatpush3.bf16.msra.mxu1 %v1651_v24 }
  0x3e   :  { %1234 = vmatprep.subr.bf16.mxu1 %v1483_v1 }
  0x3f   :  { %319 = vmatpush1.bf16.msra.mxu0 %v1636_v22 }
  0x40   :  { %414 = vmatprep.subr.bf16.mxu0 %v1510_v0 }
  0x41   :  { %1235 = vmatpush3.bf16.msra.mxu1 %v1659_v26 }
  0x42   :  { %1240 = vmatprep.subr.bf16.mxu1 %v1483_v1 }
  0xf5   :  { %v228_v29 = vpop.f32.mrb[0].mxu0 }
  0xf6   :  { %v275_v31 = vadd.f32 %v228_v29, %v62_v28  ;;  %v230_v32 = vpop.f32.mrb[1].mxu0 }
  0xf7   :  { %v232_v33 = vpop.f32.mrb[2].mxu0  ;;  %v276_v36 = vadd.f32 %v230_v32, %v63_v30  ;;  %v269_v38 = vpop.f32.mrb[0].mxu1 }
  0xf8   :  { %v1098_v34 = vmul.f32 -1.442695, %v275_v31  ;;  %v233_v35 = vpop.f32.mrb[3].mxu0  ;;  %v1218_v39 = vpop.f32.mrb[1].mxu1  ;;  %v289_v48 = vadd.f32 %v1705_v45, %v269_v38 }
  0xf9   :  { %v1099_v37 = vmul.f32 -1.442695, %v276_v36  ;;  %v272_v40 = vpop.f32.mrb[2].mxu1 }
  0xfa   :  { %1396 = vpow2.f32 %v1098_v34  ;;  %v1219_v41 = vpop.f32.mrb[3].mxu1 }
  0xfb   :  { %1398 = vpow2.f32 %v1099_v37  ;;  %v302_v41 = vunpack.c.h.bf16 %v1710_v46  ;;  %v1104_v46 = vld [vmem:[%s2016_s0 + $0x18] sm:$0xff] }
 0x104   :  { %v1397_v42 = vpop.eup %1396 }
 0x105   :  { %v283_v43 = vadd.f32 1.0, %v1397_v42  ;;  %v1399_v44 = vpop.eup %1398 }
 0x106   :  { %v284_v47 = vadd.f32 1.0, %v1399_v44 }
 0x107   :  { %1400 = vrcp.f32 %v283_v43 }
 0x108   :  { %1402 = vrcp.f32 %v284_v47 }
 0x111   :  { %v1401_v50 = vpop.eup %1400 }
 0x112   :  { %v290_v51 = vmul.f32 %v1401_v50, %v289_v48  ;;  %v1403_v53 = vpop.eup %1402 }
 0x113   :  { %v293_v54 = vsub.f32 1.0, %v1403_v53  ;;  %v295_v57 = vmul.f32 0.0, %v1403_v53 }
 0x114   :  { %v291_v52 = vadd.f32 %v290_v51, %v64_v49 }
 0x116   :  { %1404 = vtanh.f32 %v291_v52 }
 0x120   :  { %v1405_v55 = vpop.eup %1404 }
 0x121   :  { %v294_v56 = vmul.f32 %v1405_v55, %v293_v54  ;;  %v410_v55 = vunpack.c.l.bf16 %v1104_v46 }
 0x123   :  { %v1714_v58 = vadd.f32 %v295_v57, %v294_v56 }
 0x125   :  { %v303_v59 = vpack.c.bf16 %v1714_v58, %v1714_v58 }
 0x127   :  { %337 = vmatmul.mubr.bf16.vlgmr.msra.gmra.mrb[4].mxu0 %v303_v59  ;;  %1237 = vmatmul.mubr.bf16.vlgmr.msra.gmra.mrb[4].mxu1 %v303_v59 }
 0x128   :  { %415 = vmatpush1.bf16.msra.mxu0 %v1517_v3  ;;  %1241 = vmatpush3.bf16.msra.mxu1 %v1554_v9 }
 0x129   :  { %416 = vmatprep.subr.bf16.mxu0 %v1525_v4  ;;  %1242 = vmatprep.subr.bf16.mxu1 %v1483_v1 }
 0x12a   :  { %446 = vmatprep.mubr.bf16.mxu0 %v1484_v2  ;;  %1256 = vmatprep.mubr.msk.bf16.mxu1 %vm1485_vm0, %v1483_v1 }
 0x12c   :  { %417 = vmatpush1.bf16.msra.mxu0 %v1531_v5  ;;  %1243 = vmatpush3.bf16.msra.mxu1 %v1573_v12 }
 0x12d   :  { %418 = vmatprep.subr.bf16.mxu0 %v1537_v6  ;;  %1244 = vmatprep.subr.bf16.mxu1 %v1483_v1 }
 0x130   :  { %419 = vmatpush1.bf16.msra.mxu0 %v1543_v7  ;;  %1245 = vmatpush3.bf16.msra.mxu1 %v1585_v14 }
 0x131   :  { %420 = vmatprep.subr.bf16.mxu0 %v1549_v8  ;;  %1246 = vmatprep.subr.bf16.mxu1 %v1483_v1 }
 0x134   :  { %421 = vmatpush1.bf16.msra.mxu0 %v1560_v10  ;;  %1247 = vmatpush3.bf16.msra.mxu1 %v1604_v17 }
 0x135   :  { %422 = vmatprep.subr.bf16.mxu0 %v1567_v11  ;;  %1248 = vmatprep.subr.bf16.mxu1 %v1483_v1 }
 0x138   :  { %423 = vmatpush1.bf16.msra.mxu0 %v1578_v13  ;;  %1249 = vmatpush3.bf16.msra.mxu1 %v1623_v20 }
 0x139   :  { %424 = vmatprep.subr.bf16.mxu0 %v1591_v15  ;;  %1250 = vmatprep.subr.bf16.mxu1 %v1483_v1 }
 0x13c   :  { %425 = vmatpush1.bf16.msra.mxu0 %v1598_v16  ;;  %1251 = vmatpush3.bf16.msra.mxu1 %v1642_v23 }
 0x13d   :  { %426 = vmatprep.subr.bf16.mxu0 %v1610_v18  ;;  %1252 = vmatprep.subr.bf16.mxu1 %v1483_v1 }
 0x140   :  { %427 = vmatpush1.bf16.msra.mxu0 %v1617_v19  ;;  %1253 = vmatpush3.bf16.msra.mxu1 %v1651_v24 }
 0x141   :  { %428 = vmatprep.subr.bf16.mxu0 %v1629_v21  ;;  %1254 = vmatprep.subr.bf16.mxu1 %v1483_v1 }
 0x144   :  { %429 = vmatpush1.bf16.msra.mxu0 %v1636_v22  ;;  %1255 = vmatpush3.bf16.msra.mxu1 %v1659_v26 }
 0x145   :  { %524 = vmatprep.subr.bf16.mxu0 %v1510_v0  ;;  %1260 = vmatprep.subr.bf16.mxu1 %v1483_v1 }
 0x1fa   :  { %v338_v62 = vpop.f32.mrb[4].mxu0  ;;  %v379_v63 = vpop.f32.mrb[4].mxu1 }
 0x1fb   :  { %v385_v27 = vadd.f32 %v338_v62, %v300_v61  ;;  %v340_v28 = vpop.f32.mrb[5].mxu0  ;;  %v1238_v29 = vpop.f32.mrb[5].mxu1  ;;  %v399_v42 = vadd.f32 %v1705_v45, %v379_v63 }
 0x1fc   :  { %v342_v30 = vpop.f32.mrb[6].mxu0  ;;  %v382_v31 = vpop.f32.mrb[6].mxu1  ;;  %v386_v35 = vadd.f32 %v340_v28, %v301_v25 }
 0x1fd   :  { %v1102_v32 = vmul.f32 -1.442695, %v385_v27  ;;  %v343_v33 = vpop.f32.mrb[7].mxu0  ;;  %v1239_v34 = vpop.f32.mrb[7].mxu1 }
 0x1fe   :  { %v1103_v36 = vmul.f32 -1.442695, %v386_v35  ;;  %v1804_v34 = vld [vmem:[%s2016_s0 + $0x20] ss:$12 sps:$4 sm:$0xff]  }
 0x1ff   :  { %1406 = vpow2.f32 %v1102_v32 }
 0x200   :  { %1408 = vpow2.f32 %v1103_v36  ;;  %v412_v36 = vunpack.c.l.bf16 %v1804_v34 }
 0x209   :  { %v1407_v37 = vpop.eup %1406 }
 0x20a   :  { %v393_v38 = vadd.f32 1.0, %v1407_v37  ;;  %v1409_v39 = vpop.eup %1408 }
 0x20b   :  { %v394_v40 = vadd.f32 1.0, %v1409_v39 }
 0x20c   :  { %1410 = vrcp.f32 %v393_v38 }
 0x20d   :  { %1412 = vrcp.f32 %v394_v40 }
 0x216   :  { %v1411_v43 = vpop.eup %1410 }
 0x217   :  { %v400_v44 = vmul.f32 %v1411_v43, %v399_v42  ;;  %v1413_v48 = vpop.eup %1412 }
 0x218   :  { %v403_v49 = vsub.f32 1.0, %v1413_v48  ;;  %v405_v52 = vmul.f32 %v1413_v48, %v1714_v58  ;;  %v411_v58 = vunpack.c.h.bf16 %v1104_v46 }
 0x219   :  { %v401_v47 = vadd.f32 %v400_v44, %v302_v41 }
 0x21b   :  { %1414 = vtanh.f32 %v401_v47 }
 0x225   :  { %v1415_v50 = vpop.eup %1414 }
 0x226   :  { %v404_v51 = vmul.f32 %v1415_v50, %v403_v49  ;;  %v1108_v50 = vld [vmem:[%s2016_s0 + $0x24] sm:$0xff] }
 0x228   :  { %v1759_v53 = vadd.f32 %v405_v52, %v404_v51  ;;  %v520_v51 = vunpack.c.l.bf16 %v1108_v50 }
 0x22a   :  { %v413_v54 = vpack.c.bf16 %v1759_v53, %v1759_v53 }
 0x22c   :  { %447 = vmatmul.mubr.bf16.vlgmr.msra.gmra.mrb[8].mxu0 %v413_v54  ;;  %1257 = vmatmul.mubr.bf16.vlgmr.msra.gmra.mrb[8].mxu1 %v413_v54  ;;  %v521_v54 = vunpack.c.h.bf16 %v1108_v50 }
 0x22d   :  { %525 = vmatpush1.bf16.msra.mxu0 %v1517_v3  ;;  %1261 = vmatpush3.bf16.msra.mxu1 %v1554_v9 }
 0x22e   :  { %526 = vmatprep.subr.bf16.mxu0 %v1525_v4  ;;  %1262 = vmatprep.subr.bf16.mxu1 %v1483_v1 }
 0x22f   :  { %556 = vmatprep.mubr.bf16.mxu0 %v1484_v2  ;;  %1276 = vmatprep.mubr.msk.bf16.mxu1 %vm1485_vm0, %v1483_v1 }
 0x231   :  { %527 = vmatpush1.bf16.msra.mxu0 %v1531_v5  ;;  %1263 = vmatpush3.bf16.msra.mxu1 %v1573_v12 }
 0x232   :  { %528 = vmatprep.subr.bf16.mxu0 %v1537_v6  ;;  %1264 = vmatprep.subr.bf16.mxu1 %v1483_v1 }
 0x235   :  { %529 = vmatpush1.bf16.msra.mxu0 %v1543_v7  ;;  %1265 = vmatpush3.bf16.msra.mxu1 %v1585_v14 }
 0x236   :  { %530 = vmatprep.subr.bf16.mxu0 %v1549_v8  ;;  %1266 = vmatprep.subr.bf16.mxu1 %v1483_v1 }
 0x239   :  { %531 = vmatpush1.bf16.msra.mxu0 %v1560_v10  ;;  %1267 = vmatpush3.bf16.msra.mxu1 %v1604_v17 }
 0x23a   :  { %532 = vmatprep.subr.bf16.mxu0 %v1567_v11  ;;  %1268 = vmatprep.subr.bf16.mxu1 %v1483_v1 }
 0x23d   :  { %533 = vmatpush1.bf16.msra.mxu0 %v1578_v13  ;;  %1269 = vmatpush3.bf16.msra.mxu1 %v1623_v20 }
 0x23e   :  { %534 = vmatprep.subr.bf16.mxu0 %v1591_v15  ;;  %1270 = vmatprep.subr.bf16.mxu1 %v1483_v1 }
 0x241   :  { %535 = vmatpush1.bf16.msra.mxu0 %v1598_v16  ;;  %1271 = vmatpush3.bf16.msra.mxu1 %v1642_v23 }
 0x242   :  { %536 = vmatprep.subr.bf16.mxu0 %v1610_v18  ;;  %1272 = vmatprep.subr.bf16.mxu1 %v1483_v1 }
 0x245   :  { %537 = vmatpush1.bf16.msra.mxu0 %v1617_v19  ;;  %1273 = vmatpush3.bf16.msra.mxu1 %v1651_v24 }
 0x246   :  { %538 = vmatprep.subr.bf16.mxu0 %v1629_v21  ;;  %1274 = vmatprep.subr.bf16.mxu1 %v1483_v1 }
 0x249   :  { %539 = vmatpush1.bf16.msra.mxu0 %v1636_v22  ;;  %1275 = vmatpush3.bf16.msra.mxu1 %v1659_v26 }
 0x24a   :  { %634 = vmatprep.subr.bf16.mxu0 %v1510_v0  ;;  %1280 = vmatprep.subr.bf16.mxu1 %v1483_v1 }
 0x2ff   :  { %v448_v56 = vpop.f32.mrb[8].mxu0  ;;  %v489_v57 = vpop.f32.mrb[8].mxu1 }
 0x300   :  { %v495_v59 = vadd.f32 %v448_v56, %v410_v55  ;;  %v450_v60 = vpop.f32.mrb[9].mxu0  ;;  %v1258_v61 = vpop.f32.mrb[9].mxu1  ;;  %v509_v37 = vadd.f32 %v1705_v45, %v489_v57 }
 0x301   :  { %v452_v62 = vpop.f32.mrb[10].mxu0  ;;  %v492_v63 = vpop.f32.mrb[10].mxu1  ;;  %v496_v29 = vadd.f32 %v450_v60, %v411_v58 }
 0x302   :  { %v1106_v25 = vmul.f32 -1.442695, %v495_v59  ;;  %v453_v27 = vpop.f32.mrb[11].mxu0  ;;  %v1259_v28 = vpop.f32.mrb[11].mxu1 }
 0x303   :  { %v1107_v30 = vmul.f32 -1.442695, %v496_v29 }
 0x304   :  { %1416 = vpow2.f32 %v1106_v25 }
 0x305   :  { %1418 = vpow2.f32 %v1107_v30  ;;  %v522_v30 = vunpack.c.h.bf16 %v1804_v34  ;;  %v1112_v34 = vld [vmem:[%s2016_s0 + $0x30] sm:$0xff] }
 0x30e   :  { %v1417_v31 = vpop.eup %1416 }
 0x30f   :  { %v503_v32 = vadd.f32 1.0, %v1417_v31  ;;  %v1419_v33 = vpop.eup %1418 }
 0x310   :  { %v504_v35 = vadd.f32 1.0, %v1419_v33 }
 0x311   :  { %1420 = vrcp.f32 %v503_v32 }
 0x312   :  { %1422 = vrcp.f32 %v504_v35 }
 0x31b   :  { %v1421_v38 = vpop.eup %1420 }
 0x31c   :  { %v510_v39 = vmul.f32 %v1421_v38, %v509_v37  ;;  %v1423_v41 = vpop.eup %1422 }
 0x31d   :  { %v513_v42 = vsub.f32 1.0, %v1423_v41  ;;  %v515_v47 = vmul.f32 %v1423_v41, %v1759_v53 }
 0x31e   :  { %v511_v40 = vadd.f32 %v510_v39, %v412_v36 }
 0x320   :  { %1424 = vtanh.f32 %v511_v40 }
 0x32a   :  { %v1425_v43 = vpop.eup %1424 }
 0x32b   :  { %v514_v44 = vmul.f32 %v1425_v43, %v513_v42  ;;  %v630_v43 = vunpack.c.l.bf16 %v1112_v34 }
 0x32d   :  { %v1809_v48 = vadd.f32 %v515_v47, %v514_v44 }
 0x32f   :  { %v523_v49 = vpack.c.bf16 %v1809_v48, %v1809_v48 }
 0x331   :  { %557 = vmatmul.mubr.bf16.vlgmr.msra.gmra.mrb[12].mxu0 %v523_v49  ;;  %1277 = vmatmul.mubr.bf16.vlgmr.msra.gmra.mrb[12].mxu1 %v523_v49 }
 0x332   :  { %635 = vmatpush1.bf16.msra.mxu0 %v1517_v3  ;;  %1281 = vmatpush3.bf16.msra.mxu1 %v1554_v9 }
 0x333   :  { %636 = vmatprep.subr.bf16.mxu0 %v1525_v4  ;;  %1282 = vmatprep.subr.bf16.mxu1 %v1483_v1 }
 0x334   :  { %666 = vmatprep.mubr.bf16.mxu0 %v1484_v2  ;;  %1296 = vmatprep.mubr.msk.bf16.mxu1 %vm1485_vm0, %v1483_v1 }
 0x336   :  { %637 = vmatpush1.bf16.msra.mxu0 %v1531_v5  ;;  %1283 = vmatpush3.bf16.msra.mxu1 %v1573_v12 }
 0x337   :  { %638 = vmatprep.subr.bf16.mxu0 %v1537_v6  ;;  %1284 = vmatprep.subr.bf16.mxu1 %v1483_v1 }
 0x33a   :  { %639 = vmatpush1.bf16.msra.mxu0 %v1543_v7  ;;  %1285 = vmatpush3.bf16.msra.mxu1 %v1585_v14 }
 0x33b   :  { %640 = vmatprep.subr.bf16.mxu0 %v1549_v8  ;;  %1286 = vmatprep.subr.bf16.mxu1 %v1483_v1 }
 0x33e   :  { %641 = vmatpush1.bf16.msra.mxu0 %v1560_v10  ;;  %1287 = vmatpush3.bf16.msra.mxu1 %v1604_v17 }
 0x33f   :  { %642 = vmatprep.subr.bf16.mxu0 %v1567_v11  ;;  %1288 = vmatprep.subr.bf16.mxu1 %v1483_v1 }
 0x342   :  { %643 = vmatpush1.bf16.msra.mxu0 %v1578_v13  ;;  %1289 = vmatpush3.bf16.msra.mxu1 %v1623_v20 }
 0x343   :  { %644 = vmatprep.subr.bf16.mxu0 %v1591_v15  ;;  %1290 = vmatprep.subr.bf16.mxu1 %v1483_v1 }
 0x346   :  { %645 = vmatpush1.bf16.msra.mxu0 %v1598_v16  ;;  %1291 = vmatpush3.bf16.msra.mxu1 %v1642_v23 }
 0x347   :  { %646 = vmatprep.subr.bf16.mxu0 %v1610_v18  ;;  %1292 = vmatprep.subr.bf16.mxu1 %v1483_v1 }
 0x34a   :  { %647 = vmatpush1.bf16.msra.mxu0 %v1617_v19  ;;  %1293 = vmatpush3.bf16.msra.mxu1 %v1651_v24 }
 0x34b   :  { %648 = vmatprep.subr.bf16.mxu0 %v1629_v21  ;;  %1294 = vmatprep.subr.bf16.mxu1 %v1483_v1 }
 0x34e   :  { %649 = vmatpush1.bf16.msra.mxu0 %v1636_v22  ;;  %1295 = vmatpush3.bf16.msra.mxu1 %v1659_v26 }
 0x34f   :  { %744 = vmatprep.subr.bf16.mxu0 %v1510_v0  ;;  %1300 = vmatprep.subr.bf16.mxu1 %v1483_v1 }
 0x404   :  { %v558_v52 = vpop.f32.mrb[12].mxu0  ;;  %v599_v53 = vpop.f32.mrb[12].mxu1 }
 0x405   :  { %v605_v46 = vadd.f32 %v558_v52, %v520_v51  ;;  %v560_v55 = vpop.f32.mrb[13].mxu0  ;;  %v1278_v56 = vpop.f32.mrb[13].mxu1  ;;  %v619_v31 = vadd.f32 %v1705_v45, %v599_v53 }
 0x406   :  { %v562_v57 = vpop.f32.mrb[14].mxu0  ;;  %v602_v58 = vpop.f32.mrb[14].mxu1  ;;  %v606_v62 = vadd.f32 %v560_v55, %v521_v54 }
 0x407   :  { %v1110_v59 = vmul.f32 -1.442695, %v605_v46  ;;  %v563_v60 = vpop.f32.mrb[15].mxu0  ;;  %v1279_v61 = vpop.f32.mrb[15].mxu1 }
 0x408   :  { %v1111_v63 = vmul.f32 -1.442695, %v606_v62  ;;  %v1899_v61 = vld [vmem:[%s2016_s0 + $0x38] ss:$12 sps:$4 sm:$0xff]  }
 0x409   :  { %1426 = vpow2.f32 %v1110_v59 }
 0x40a   :  { %1428 = vpow2.f32 %v1111_v63  ;;  %v632_v63 = vunpack.c.l.bf16 %v1899_v61 }
 0x413   :  { %v1427_v25 = vpop.eup %1426 }
 0x414   :  { %v613_v27 = vadd.f32 1.0, %v1427_v25  ;;  %v1429_v28 = vpop.eup %1428 }
 0x415   :  { %v614_v29 = vadd.f32 1.0, %v1429_v28 }
 0x416   :  { %1430 = vrcp.f32 %v613_v27 }
 0x417   :  { %1432 = vrcp.f32 %v614_v29 }
 0x420   :  { %v1431_v32 = vpop.eup %1430 }
 0x421   :  { %v620_v33 = vmul.f32 %v1431_v32, %v619_v31  ;;  %v1433_v36 = vpop.eup %1432 }
 0x422   :  { %v623_v37 = vsub.f32 1.0, %v1433_v36  ;;  %v625_v40 = vmul.f32 %v1433_v36, %v1809_v48  ;;  %v631_v48 = vunpack.c.h.bf16 %v1112_v34 }
 0x423   :  { %v621_v35 = vadd.f32 %v620_v33, %v522_v30 }
 0x425   :  { %1434 = vtanh.f32 %v621_v35 }
 0x42f   :  { %v1435_v38 = vpop.eup %1434 }
 0x430   :  { %v624_v39 = vmul.f32 %v1435_v38, %v623_v37 }
 0x432   :  { %v1854_v41 = vadd.f32 %v625_v40, %v624_v39 }
 0x434   :  { %v633_v42 = vpack.c.bf16 %v1854_v41, %v1854_v41 }
 0x436   :  { %667 = vmatmul.mubr.bf16.vlgmr.msra.gmra.mrb[16].mxu0 %v633_v42  ;;  %1297 = vmatmul.mubr.bf16.vlgmr.msra.gmra.mrb[16].mxu1 %v633_v42 }
 0x437   :  { %745 = vmatpush1.bf16.msra.mxu0 %v1517_v3  ;;  %1301 = vmatpush3.bf16.msra.mxu1 %v1554_v9 }
 0x438   :  { %746 = vmatprep.subr.bf16.mxu0 %v1525_v4  ;;  %1302 = vmatprep.subr.bf16.mxu1 %v1483_v1 }
 0x439   :  { %776 = vmatprep.mubr.bf16.mxu0 %v1484_v2  ;;  %1316 = vmatprep.mubr.msk.bf16.mxu1 %vm1485_vm0, %v1483_v1 }
 0x43b   :  { %747 = vmatpush1.bf16.msra.mxu0 %v1531_v5  ;;  %1303 = vmatpush3.bf16.msra.mxu1 %v1573_v12 }
 0x43c   :  { %748 = vmatprep.subr.bf16.mxu0 %v1537_v6  ;;  %1304 = vmatprep.subr.bf16.mxu1 %v1483_v1 }
 0x43f   :  { %749 = vmatpush1.bf16.msra.mxu0 %v1543_v7  ;;  %1305 = vmatpush3.bf16.msra.mxu1 %v1585_v14 }
 0x440   :  { %750 = vmatprep.subr.bf16.mxu0 %v1549_v8  ;;  %1306 = vmatprep.subr.bf16.mxu1 %v1483_v1 }
 0x443   :  { %751 = vmatpush1.bf16.msra.mxu0 %v1560_v10  ;;  %1307 = vmatpush3.bf16.msra.mxu1 %v1604_v17 }
 0x444   :  { %752 = vmatprep.subr.bf16.mxu0 %v1567_v11  ;;  %1308 = vmatprep.subr.bf16.mxu1 %v1483_v1 }
 0x447   :  { %753 = vmatpush1.bf16.msra.mxu0 %v1578_v13  ;;  %1309 = vmatpush3.bf16.msra.mxu1 %v1623_v20 }
 0x448   :  { %754 = vmatprep.subr.bf16.mxu0 %v1591_v15  ;;  %1310 = vmatprep.subr.bf16.mxu1 %v1483_v1 }
 0x44b   :  { %755 = vmatpush1.bf16.msra.mxu0 %v1598_v16  ;;  %1311 = vmatpush3.bf16.msra.mxu1 %v1642_v23 }
 0x44c   :  { %756 = vmatprep.subr.bf16.mxu0 %v1610_v18  ;;  %1312 = vmatprep.subr.bf16.mxu1 %v1483_v1 }
 0x44f   :  { %757 = vmatpush1.bf16.msra.mxu0 %v1617_v19  ;;  %1313 = vmatpush3.bf16.msra.mxu1 %v1651_v24 }
 0x450   :  { %758 = vmatprep.subr.bf16.mxu0 %v1629_v21  ;;  %1314 = vmatprep.subr.bf16.mxu1 %v1483_v1 }
 0x453   :  { %759 = vmatpush1.bf16.msra.mxu0 %v1636_v22  ;;  %1315 = vmatpush3.bf16.msra.mxu1 %v1659_v26 }
 0x454   :  { %854 = vmatprep.subr.bf16.mxu0 %v1510_v0  ;;  %1320 = vmatprep.subr.bf16.mxu1 %v1483_v1 }
 0x509   :  { %v668_v44 = vpop.f32.mrb[16].mxu0  ;;  %v709_v47 = vpop.f32.mrb[16].mxu1 }
 0x50a   :  { %v715_v49 = vadd.f32 %v668_v44, %v630_v43  ;;  %v670_v50 = vpop.f32.mrb[17].mxu0  ;;  %v1298_v51 = vpop.f32.mrb[17].mxu1  ;;  %v729_v25 = vadd.f32 %v1705_v45, %v709_v47 }
 0x50b   :  { %v672_v52 = vpop.f32.mrb[18].mxu0  ;;  %v712_v53 = vpop.f32.mrb[18].mxu1  ;;  %v716_v56 = vadd.f32 %v670_v50, %v631_v48  ;;  %v742_v50 = vunpack.c.h.bf16 %v1899_v61  ;;  %v1476_v61 = vld [vmem:[%s2015_s1] ss:$12 sps:$4 sm:$0xff]  }
 0x50c   :  { %v1114_v54 = vmul.f32 -1.442695, %v715_v49  ;;  %v673_v46 = vpop.f32.mrb[19].mxu0  ;;  %v1299_v55 = vpop.f32.mrb[19].mxu1 }
 0x50d   :  { %v1115_v57 = vmul.f32 -1.442695, %v716_v56 }
 0x50e   :  { %1436 = vpow2.f32 %v1114_v54 }
 0x50f   :  { %1438 = vpow2.f32 %v1115_v57 }
 0x518   :  { %v1437_v58 = vpop.eup %1436 }
 0x519   :  { %v723_v59 = vadd.f32 1.0, %v1437_v58  ;;  %v1439_v60 = vpop.eup %1438 }
 0x51a   :  { %v724_v62 = vadd.f32 1.0, %v1439_v60 }
 0x51b   :  { %1440 = vrcp.f32 %v723_v59 }
 0x51c   :  { %1442 = vrcp.f32 %v724_v62  ;;  %v1477_v62 = vld [vmem:[%s2015_s1 + $0x1c] ss:$12 sps:$4 sm:$0xff]  }
 0x525   :  { %v1441_v27 = vpop.eup %1440 }
 0x526   :  { %v730_v28 = vmul.f32 %v1441_v27, %v729_v25  ;;  %v1443_v30 = vpop.eup %1442  ;;  %v1481_v25 = vld [vmem:[%s2015_s1 + $0x4c] ss:$12 sps:$4 sm:$0xff]  }
 0x527   :  { %v733_v31 = vsub.f32 1.0, %v1443_v30  ;;  %v735_v35 = vmul.f32 %v1443_v30, %v1854_v41  ;;  %v1121_v30 = vld [vmem:[%s2016_s0 + $0x50] ss:$12 sps:$4 sm:$0xff]  }
 0x528   :  { %v731_v29 = vadd.f32 %v730_v28, %v632_v63  ;;  %v1478_v63 = vld [vmem:[%s2015_s1 + $0x18] ss:$12 sps:$4 sm:$0xff]  }
 0x52a   :  { %1444 = vtanh.f32 %v731_v29 }
 0x534   :  { %v1445_v32 = vpop.eup %1444 }
 0x535   :  { %v734_v33 = vmul.f32 %v1445_v32, %v733_v31  ;;  %v852_v32 = vunpack.c.l.bf16 %v1121_v30 }
 0x537   :  { %v1904_v36 = vadd.f32 %v735_v35, %v734_v33 }
 0x539   :  { %v743_v37 = vpack.c.bf16 %v1904_v36, %v1904_v36 }
 0x53b   :  { %777 = vmatmul.mubr.bf16.vlgmr.msra.gmra.mrb[20].mxu0 %v743_v37  ;;  %1317 = vmatmul.mubr.bf16.vlgmr.msra.gmra.mrb[20].mxu1 %v743_v37 }
 0x53c   :  { %855 = vmatpush1.bf16.msra.mxu0 %v1517_v3  ;;  %1321 = vmatpush3.bf16.msra.mxu1 %v1554_v9  ;;  %v1116_v3 = vld [vmem:[%s2016_s0 + $0x3c] sm:$0xff] }
 0x53d   :  { %856 = vmatprep.subr.bf16.mxu0 %v1525_v4  ;;  %1322 = vmatprep.subr.bf16.mxu1 %v1483_v1  ;;  %v740_v4 = vunpack.c.l.bf16 %v1116_v3 }
 0x53e   :  { %886 = vmatprep.mubr.bf16.mxu0 %v1484_v2  ;;  %1336 = vmatprep.mubr.msk.bf16.mxu1 %vm1485_vm0, %v1483_v1 }
 0x540   :  { %857 = vmatpush1.bf16.msra.mxu0 %v1531_v5  ;;  %1323 = vmatpush3.bf16.msra.mxu1 %v1573_v12 }
 0x541   :  { %858 = vmatprep.subr.bf16.mxu0 %v1537_v6  ;;  %1324 = vmatprep.subr.bf16.mxu1 %v1483_v1 }
 0x544   :  { %859 = vmatpush1.bf16.msra.mxu0 %v1543_v7  ;;  %1325 = vmatpush3.bf16.msra.mxu1 %v1585_v14  ;;  %v741_v7 = vunpack.c.h.bf16 %v1116_v3 }
 0x545   :  { %860 = vmatprep.subr.bf16.mxu0 %v1549_v8  ;;  %1326 = vmatprep.subr.bf16.mxu1 %v1483_v1 }
 0x548   :  { %861 = vmatpush1.bf16.msra.mxu0 %v1560_v10  ;;  %1327 = vmatpush3.bf16.msra.mxu1 %v1604_v17 }
 0x549   :  { %862 = vmatprep.subr.bf16.mxu0 %v1567_v11  ;;  %1328 = vmatprep.subr.bf16.mxu1 %v1483_v1 }
 0x54c   :  { %863 = vmatpush1.bf16.msra.mxu0 %v1578_v13  ;;  %1329 = vmatpush3.bf16.msra.mxu1 %v1623_v20 }
 0x54d   :  { %864 = vmatprep.subr.bf16.mxu0 %v1591_v15  ;;  %1330 = vmatprep.subr.bf16.mxu1 %v1483_v1 }
 0x550   :  { %865 = vmatpush1.bf16.msra.mxu0 %v1598_v16  ;;  %1331 = vmatpush3.bf16.msra.mxu1 %v1642_v23 }
 0x551   :  { %866 = vmatprep.subr.bf16.mxu0 %v1610_v18  ;;  %1332 = vmatprep.subr.bf16.mxu1 %v1483_v1 }
 0x554   :  { %867 = vmatpush1.bf16.msra.mxu0 %v1617_v19  ;;  %1333 = vmatpush3.bf16.msra.mxu1 %v1651_v24 }
 0x555   :  { %868 = vmatprep.subr.bf16.mxu0 %v1629_v21  ;;  %1334 = vmatprep.subr.bf16.mxu1 %v1483_v1 }
 0x558   :  { %869 = vmatpush1.bf16.msra.mxu0 %v1636_v22  ;;  %1335 = vmatpush3.bf16.msra.mxu1 %v1659_v26 }
 0x559   :  { %964 = vmatprep.subr.bf16.mxu0 %v1510_v0  ;;  %1340 = vmatprep.subr.bf16.mxu1 %v1483_v1 }
 0x60e   :  { %v778_v5 = vpop.f32.mrb[20].mxu0  ;;  %v819_v6 = vpop.f32.mrb[20].mxu1 }
 0x60f   :  { %v825_v8 = vadd.f32 %v778_v5, %v740_v4  ;;  %v780_v10 = vpop.f32.mrb[21].mxu0  ;;  %v1318_v38 = vpop.f32.mrb[21].mxu1  ;;  %v839_v51 = vadd.f32 %v1705_v45, %v819_v6 }
 0x610   :  { %v782_v39 = vpop.f32.mrb[22].mxu0  ;;  %v822_v40 = vpop.f32.mrb[22].mxu1  ;;  %v826_v43 = vadd.f32 %v780_v10, %v741_v7  ;;  %v1124_v38 = vld [vmem:[%s2016_s0 + $0x54] sm:$0xff] }
 0x611   :  { %v1118_v41 = vmul.f32 -1.442695, %v825_v8  ;;  %v783_v42 = vpop.f32.mrb[23].mxu0  ;;  %v1319_v34 = vpop.f32.mrb[23].mxu1  ;;  %v960_v39 = vunpack.c.l.bf16 %v1124_v38 }
 0x612   :  { %v1119_v0 = vmul.f32 -1.442695, %v826_v43  ;;  %v961_v42 = vunpack.c.h.bf16 %v1124_v38 }
 0x613   :  { %1446 = vpow2.f32 %v1118_v41 }
 0x614   :  { %1448 = vpow2.f32 %v1119_v0 }
 0x61d   :  { %v1447_v44 = vpop.eup %1446 }
 0x61e   :  { %v833_v47 = vadd.f32 1.0, %v1447_v44  ;;  %v1449_v48 = vpop.eup %1448 }
 0x61f   :  { %v834_v49 = vadd.f32 1.0, %v1449_v48 }
 0x620   :  { %1450 = vrcp.f32 %v833_v47 }
 0x621   :  { %1452 = vrcp.f32 %v834_v49 }
 0x62a   :  { %v1451_v52 = vpop.eup %1450 }
 0x62b   :  { %v840_v53 = vmul.f32 %v1451_v52, %v839_v51  ;;  %v1453_v46 = vpop.eup %1452 }
 0x62c   :  { %v843_v55 = vsub.f32 1.0, %v1453_v46  ;;  %v845_v58 = vmul.f32 %v1453_v46, %v1904_v36 }
 0x62d   :  { %v841_v54 = vadd.f32 %v840_v53, %v742_v50 }
 0x62f   :  { %1454 = vtanh.f32 %v841_v54 }
 0x639   :  { %v1455_v56 = vpop.eup %1454 }
 0x63a   :  { %v844_v57 = vmul.f32 %v1455_v56, %v843_v55  ;;  %v962_v56 = vunpack.c.h.bf16 %v1121_v30 }
 0x63c   :  { %v1949_v59 = vadd.f32 %v845_v58, %v844_v57 }
 0x63e   :  { %v853_v60 = vpack.c.bf16 %v1949_v59, %v1949_v59 }
 0x640   :  { %887 = vmatmul.mubr.bf16.vlgmr.msra.gmra.mrb[24].mxu0 %v853_v60  ;;  %1337 = vmatmul.mubr.bf16.vlgmr.msra.gmra.mrb[24].mxu1 %v853_v60 }
 0x641   :  { %965 = vmatpush1.bf16.msra.mxu0 %v1476_v61  ;;  %1341 = vmatpush3.bf16.msra.mxu1 %v1554_v9  ;;  %v1479_v9 = vld [vmem:[%s2015_s1 + $0x34] ss:$12 sps:$4 sm:$0xff]  }
 0x642   :  { %966 = vmatprep.subr.bf16.mxu0 %v1477_v62  ;;  %1342 = vmatprep.subr.bf16.mxu1 %v1483_v1 }
 0x643   :  { %996 = vmatprep.mubr.bf16.mxu0 %v1484_v2  ;;  %1356 = vmatprep.mubr.msk.bf16.mxu1 %vm1485_vm0, %v1483_v1  ;;  %v1480_v2 = vld [vmem:[%s2015_s1 + $0x30] ss:$12 sps:$4 sm:$0xff]  }
 0x645   :  { %967 = vmatpush1.bf16.msra.mxu0 %v1478_v63  ;;  %1343 = vmatpush3.bf16.msra.mxu1 %v1573_v12  ;;  %v1482_v12 = vld [vmem:[%s2015_s1 + $0x48] ss:$12 sps:$4 sm:$0xff]  }
 0x646   :  { %968 = vmatprep.subr.bf16.mxu0 %v1479_v9  ;;  %1344 = vmatprep.subr.bf16.mxu1 %v1483_v1 }
 0x649   :  { %969 = vmatpush1.bf16.msra.mxu0 %v1480_v2  ;;  %1345 = vmatpush3.bf16.msra.mxu1 %v1585_v14 }
 0x64a   :  { %970 = vmatprep.subr.bf16.mxu0 %v1481_v25  ;;  %1346 = vmatprep.subr.bf16.mxu1 %v1483_v1 }
 0x64d   :  { %971 = vmatpush1.bf16.msra.mxu0 %v1482_v12  ;;  %1347 = vmatpush3.bf16.msra.mxu1 %v1604_v17 }
 0x64e   :  { %972 = vmatprep.subr.bf16.mxu0 %v1567_v11  ;;  %1348 = vmatprep.subr.bf16.mxu1 %v1483_v1  ;;  %v1120_v11 = vld [vmem:[%s2016_s0 + $0x48] sm:$0xff] }
 0x651   :  { %973 = vmatpush1.bf16.msra.mxu0 %v1578_v13  ;;  %1349 = vmatpush3.bf16.msra.mxu1 %v1623_v20  ;;  %v850_v13 = vunpack.c.l.bf16 %v1120_v11 }
 0x652   :  { %974 = vmatprep.subr.bf16.mxu0 %v1591_v15  ;;  %1350 = vmatprep.subr.bf16.mxu1 %v1483_v1 }
 0x655   :  { %975 = vmatpush1.bf16.msra.mxu0 %v1598_v16  ;;  %1351 = vmatpush3.bf16.msra.mxu1 %v1642_v23  ;;  %v851_v16 = vunpack.c.h.bf16 %v1120_v11 }
 0x656   :  { %976 = vmatprep.subr.bf16.mxu0 %v1610_v18  ;;  %1352 = vmatprep.subr.bf16.mxu1 %v1483_v1 }
 0x659   :  { %977 = vmatpush1.bf16.msra.mxu0 %v1617_v19  ;;  %1353 = vmatpush3.bf16.msra.mxu1 %v1651_v24 }
 0x65a   :  { %978 = vmatprep.subr.bf16.mxu0 %v1629_v21  ;;  %1354 = vmatprep.subr.bf16.mxu1 %v1483_v1 }
 0x65d   :  { %979 = vmatpush1.bf16.msra.mxu0 %v1636_v22  ;;  %1355 = vmatpush3.bf16.msra.mxu1 %v1659_v26 }
 0x713   :  { %v888_v14 = vpop.f32.mrb[24].mxu0  ;;  %v929_v15 = vpop.f32.mrb[24].mxu1 }
 0x714   :  { %v935_v17 = vadd.f32 %v888_v14, %v850_v13  ;;  %v890_v18 = vpop.f32.mrb[25].mxu0  ;;  %v1338_v19 = vpop.f32.mrb[25].mxu1  ;;  %v949_v33 = vadd.f32 %v1705_v45, %v929_v15 }
 0x715   :  { %v892_v20 = vpop.f32.mrb[26].mxu0  ;;  %v932_v23 = vpop.f32.mrb[26].mxu1  ;;  %v936_v27 = vadd.f32 %v890_v18, %v851_v16 }
 0x716   :  { %v1122_v21 = vmul.f32 -1.442695, %v935_v17  ;;  %v893_v24 = vpop.f32.mrb[27].mxu0  ;;  %v1339_v1 = vpop.f32.mrb[27].mxu1 }
 0x717   :  { %v1123_v22 = vmul.f32 -1.442695, %v936_v27 }
 0x718   :  { %1456 = vpow2.f32 %v1122_v21 }
 0x719   :  { %1458 = vpow2.f32 %v1123_v22 }
 0x722   :  { %v1457_v26 = vpop.eup %1456 }
 0x723   :  { %v943_v28 = vadd.f32 1.0, %v1457_v26  ;;  %v1459_v29 = vpop.eup %1458 }
 0x724   :  { %v944_v31 = vadd.f32 1.0, %v1459_v29 }
 0x725   :  { %1460 = vrcp.f32 %v943_v28 }
 0x726   :  { %1462 = vrcp.f32 %v944_v31 }
 0x72f   :  { %v1461_v35 = vpop.eup %1460 }
 0x730   :  { %v950_v36 = vmul.f32 %v1461_v35, %v949_v33  ;;  %v1463_v3 = vpop.eup %1462 }
 0x731   :  { %v953_v4 = vsub.f32 1.0, %v1463_v3  ;;  %v955_v7 = vmul.f32 %v1463_v3, %v1949_v59 }
 0x732   :  { %v951_v37 = vadd.f32 %v950_v36, %v852_v32 }
 0x734   :  { %1464 = vtanh.f32 %v951_v37 }
 0x73e   :  { %v1465_v5 = vpop.eup %1464 }
 0x73f   :  { %v954_v6 = vmul.f32 %v1465_v5, %v953_v4 }
 0x741   :  { %v956_v8 = vadd.f32 %v955_v7, %v954_v6 }
 0x743   :  { %v963_v10 = vpack.c.bf16 %v956_v8, %v956_v8 }
 0x745   :  { %997 = vmatmul.mubr.bf16.vlgmr.msra.gmra.mrb[28].mxu0 %v963_v10  ;;  %1357 = vmatmul.mubr.bf16.vlgmr.msra.gmra.mrb[28].mxu1 %v963_v10 }
 0x818   :  { %v998_v40 = vpop.f32.mrb[28].mxu0  ;;  %v1039_v41 = vpop.f32.mrb[28].mxu1 }
 0x819   :  { %v1045_v34 = vadd.f32 %v998_v40, %v960_v39  ;;  %v1000_v43 = vpop.f32.mrb[29].mxu0  ;;  %v1358_v0 = vpop.f32.mrb[29].mxu1  ;;  %v1059_v57 = vadd.f32 %v1705_v45, %v1039_v41 }
 0x81a   :  { %v1002_v44 = vpop.f32.mrb[30].mxu0  ;;  %v1042_v47 = vpop.f32.mrb[30].mxu1  ;;  %v1046_v51 = vadd.f32 %v1000_v43, %v961_v42 }
 0x81b   :  { %v1126_v48 = vmul.f32 -1.442695, %v1045_v34  ;;  %v1003_v49 = vpop.f32.mrb[31].mxu0  ;;  %v1359_v50 = vpop.f32.mrb[31].mxu1 }
 0x81c   :  { %v1127_v52 = vmul.f32 -1.442695, %v1046_v51 }
 0x81d   :  { %1466 = vpow2.f32 %v1126_v48 }
 0x81e   :  { %1468 = vpow2.f32 %v1127_v52 }
 0x827   :  { %v1467_v53 = vpop.eup %1466 }
 0x828   :  { %v1053_v54 = vadd.f32 1.0, %v1467_v53  ;;  %v1469_v46 = vpop.eup %1468 }
 0x829   :  { %v1054_v55 = vadd.f32 1.0, %v1469_v46 }
 0x82a   :  { %1470 = vrcp.f32 %v1053_v54 }
 0x82b   :  { %1472 = vrcp.f32 %v1054_v55 }
 0x834   :  { %v1471_v58 = vpop.eup %1470 }
 0x835   :  { %v1060_v59 = vmul.f32 %v1471_v58, %v1059_v57  ;;  %v1473_v61 = vpop.eup %1472 }
 0x836   :  { %v1063_v62 = vsub.f32 1.0, %v1473_v61  ;;  %v1065_v2 = vmul.f32 %v1473_v61, %v956_v8 }
 0x837   :  { %v1061_v60 = vadd.f32 %v1060_v59, %v962_v56 }
 0x839   :  { %1474 = vtanh.f32 %v1061_v60 }
 0x843   :  { %v1475_v63 = vpop.eup %1474 }
 0x844   :  { %v1064_v9 = vmul.f32 %v1475_v63, %v1063_v62 }
 0x846   :  { %v1066_v25 = vadd.f32 %v1065_v2, %v1064_v9 }
 0x848   :  { %1068 = vst [vmem:[%s2018_s3] sm:$0xff] %v1066_v25 }

// kernel: gru_encoder_forward.2
= control target key start
LH: loop header
LB: loop body
LE: loop exit
PB: predicated region body
PF: predicated region fallthrough
CT: control target
= control target key end

     0   :  { %v1506_v1 = vmov 0.0   ;;  %v1507_v2 = vmov 0   ;;  %vm1508_vm0 = vmmov 0   ;;  %v1509_v25 = vmov 0.0|0.0   ;;  %s2072_s1 = inlined_call_operand.vmem [shape: bf16[128,384], index: 1, kind: input, shape index: {}]   ;;  %s2073_s0 = inlined_call_operand.vmem [shape: bf16[8,8,384], index: 0, kind: input, shape index: {}]   ;;  %s2074_s2 = inlined_call_operand.vmem [shape: f32[1,128], index: 2, kind: input, shape index: {}]   ;;  %s2075_s3 = inlined_call_operand.vmem [shape: f32[8,8,128], index: 3, kind: output, shape index: {}]  }
   0x1   :  { %v1533_v0 = vld [vmem:[%s2072_s1 + $0x4] ss:$12 sps:$4 sm:$0xff]   ;;  %1221 = vmatprep.subr.bf16.mxu1 %v1506_v1  ;;  %226 = vmatprep.mubr.bf16.mxu0 %v1507_v2  ;;  %v1540_v3 = vld [vmem:[%s2072_s1] ss:$12 sps:$4 sm:$0xff]   ;;  %v1548_v4 = vld [vmem:[%s2072_s1 + $0x1c] ss:$12 sps:$4 sm:$0xff]  }
   0x2   :  { %1237 = vmatprep.mubr.msk.bf16.mxu1 %vm1508_vm0, %v1506_v1  ;;  %194 = vmatprep.subr.bf16.mxu0 %v1533_v0  ;;  %v1554_v5 = vld [vmem:[%s2072_s1 + $0x18] ss:$12 sps:$4 sm:$0xff]   ;;  %v1560_v6 = vld [vmem:[%s2072_s1 + $0x34] ss:$12 sps:$4 sm:$0xff]   ;;  %v1566_v7 = vld [vmem:[%s2072_s1 + $0x30] ss:$12 sps:$4 sm:$0xff]  }
   0x3   :  { %195 = vmatpush1.bf16.msra.mxu0 %v1540_v3  ;;  %v1572_v8 = vld [vmem:[%s2072_s1 + $0x4c] ss:$12 sps:$4 sm:$0xff]   ;;  %v1577_v9 = vld [vmem:[%s2072_s1 + $0x8] ss:$12 sps:$4 sm:$0xff]   ;;  %v1590_v11 = vld [vmem:[%s2072_s1 + $0x64] ss:$12 sps:$4 sm:$0xff]  }
   0x4   :  { %196 = vmatprep.subr.bf16.mxu0 %v1548_v4  ;;  %v1583_v10 = vld [vmem:[%s2072_s1 + $0x48] ss:$12 sps:$4 sm:$0xff]   ;;  %1222 = vmatpush3.bf16.msra.mxu1 %v1577_v9  ;;  %v1596_v12 = vld [vmem:[%s2072_s1 + $0x20] ss:$12 sps:$4 sm:$0xff]   ;;  %v1608_v14 = vld [vmem:[%s2072_s1 + $0x38] ss:$12 sps:$4 sm:$0xff]  }
   0x5   :  { %1223 = vmatprep.subr.bf16.mxu1 %v1506_v1  ;;  %v1601_v13 = vld [vmem:[%s2072_s1 + $0x60] ss:$12 sps:$4 sm:$0xff]   ;;  %v1614_v15 = vld [vmem:[%s2072_s1 + $0x7c] ss:$12 sps:$4 sm:$0xff]   ;;  %v1621_v16 = vld [vmem:[%s2072_s1 + $0x78] ss:$12 sps:$4 sm:$0xff]  }
   0x6   :  { %v1627_v17 = vld [vmem:[%s2072_s1 + $0x50] ss:$12 sps:$4 sm:$0xff]   ;;  %v1633_v18 = vld [vmem:[%s2072_s1 + $0x94] ss:$12 sps:$4 sm:$0xff]   ;;  %v1652_v21 = vld [vmem:[%s2072_s1 + $0xac] ss:$12 sps:$4 sm:$0xff]  }
   0x7   :  { %197 = vmatpush1.bf16.msra.mxu0 %v1554_v5  ;;  %v1640_v19 = vld [vmem:[%s2072_s1 + $0x90] ss:$12 sps:$4 sm:$0xff]   ;;  %v1646_v20 = vld [vmem:[%s2072_s1 + $0x68] ss:$12 sps:$4 sm:$0xff]   ;;  %v1665_v23 = vld [vmem:[%s2072_s1 + $0x80] ss:$12 sps:$4 sm:$0xff]  }
   0x8   :  { %198 = vmatprep.subr.bf16.mxu0 %v1560_v6  ;;  %1224 = vmatpush3.bf16.msra.mxu1 %v1596_v12  ;;  %v1659_v22 = vld [vmem:[%s2072_s1 + $0xa8] ss:$12 sps:$4 sm:$0xff]   ;;  %v1674_v24 = vld [vmem:[%s2072_s1 + $0x98] ss:$12 sps:$4 sm:$0xff]   ;;  %v1682_v26 = vld [vmem:[%s2072_s1 + $0xb0] ss:$12 sps:$4 sm:$0xff]  }
   0x9   :  { %1225 = vmatprep.subr.bf16.mxu1 %v1506_v1  ;;  %v60_v27 = vld [vmem:[%s2073_s0] sm:$0xff]  ;;  %v61_v46 = vld [vmem:[%s2073_s0 + $0x8] sm:$0xf]  ;;  %v1114_v60 = vld [vmem:[%s2073_s0 + $0xc] sm:$0xff] }
   0xa   :  { %v62_v28 = vunpack.c.l.bf16 %v60_v27  ;;  %v63_v30 = vunpack.c.h.bf16 %v60_v27  ;;  %v1728_v45 = vld [vmem:[%s2074_s2] ss:$0 sm:$0xff]  ;;  %v64_v49 = vunpack.c.l.bf16 %v61_v46  ;;  %v301_v61 = vunpack.c.l.bf16 %v1114_v60 }
   0xb   :  { %199 = vmatpush1.bf16.msra.mxu0 %v1566_v7 }
   0xc   :  { %200 = vmatprep.subr.bf16.mxu0 %v1572_v8  ;;  %1226 = vmatpush3.bf16.msra.mxu1 %v1608_v14 }
   0xd   :  { %1227 = vmatprep.subr.bf16.mxu1 %v1506_v1 }
   0xf   :  { %201 = vmatpush1.bf16.msra.mxu0 %v1583_v10 }
  0x10   :  { %202 = vmatprep.subr.bf16.mxu0 %v1590_v11  ;;  %1228 = vmatpush3.bf16.msra.mxu1 %v1627_v17 }
  0x11   :  { %1229 = vmatprep.subr.bf16.mxu1 %v1506_v1 }
  0x13   :  { %203 = vmatpush1.bf16.msra.mxu0 %v1601_v13 }
  0x14   :  { %204 = vmatprep.subr.bf16.mxu0 %v1614_v15  ;;  %1230 = vmatpush3.bf16.msra.mxu1 %v1646_v20 }
  0x15   :  { %1231 = vmatprep.subr.bf16.mxu1 %v1506_v1 }
  0x17   :  { %205 = vmatpush1.bf16.msra.mxu0 %v1621_v16 }
  0x18   :  { %206 = vmatprep.subr.bf16.mxu0 %v1633_v18  ;;  %1232 = vmatpush3.bf16.msra.mxu1 %v1665_v23 }
  0x19   :  { %1233 = vmatprep.subr.bf16.mxu1 %v1506_v1 }
  0x1b   :  { %207 = vmatpush1.bf16.msra.mxu0 %v1640_v19 }
  0x1c   :  { %208 = vmatprep.subr.bf16.mxu0 %v1652_v21  ;;  %1234 = vmatpush3.bf16.msra.mxu1 %v1674_v24 }
  0x1d   :  { %1235 = vmatprep.subr.bf16.mxu1 %v1506_v1 }
  0x1f   :  { %209 = vmatpush1.bf16.msra.mxu0 %v1659_v22 }
  0x20   :  { %305 = vmatprep.subr.bf16.mxu0 %v1533_v0  ;;  %1236 = vmatpush3.bf16.msra.mxu1 %v1682_v26 }
  0x21   :  { %1241 = vmatprep.subr.bf16.mxu1 %v1506_v1 }
  0x22   :  { %227 = vmatmul.mubr.bf16.vlgmr.msra.gmra.mrb[0].mxu0 %v1509_v25 }
  0x23   :  { %306 = vmatpush1.bf16.msra.mxu0 %v1540_v3  ;;  %337 = vmatprep.mubr.bf16.mxu0 %v1507_v2 }
  0x24   :  { %307 = vmatprep.subr.bf16.mxu0 %v1548_v4  ;;  %1238 = vmatmul.mubr.bf16.vlgmr.msra.gmra.mrb[0].mxu1 %v1509_v25  ;;  %v302_v25 = vunpack.c.h.bf16 %v1114_v60 }
  0x25   :  { %1242 = vmatpush3.bf16.msra.mxu1 %v1577_v9  ;;  %1257 = vmatprep.mubr.msk.bf16.mxu1 %vm1508_vm0, %v1506_v1 }
  0x26   :  { %1243 = vmatprep.subr.bf16.mxu1 %v1506_v1 }
  0x27   :  { %308 = vmatpush1.bf16.msra.mxu0 %v1554_v5 }
  0x28   :  { %309 = vmatprep.subr.bf16.mxu0 %v1560_v6 }
  0x29   :  { %1244 = vmatpush3.bf16.msra.mxu1 %v1596_v12 }
  0x2a   :  { %1245 = vmatprep.subr.bf16.mxu1 %v1506_v1 }
  0x2b   :  { %310 = vmatpush1.bf16.msra.mxu0 %v1566_v7 }
  0x2c   :  { %311 = vmatprep.subr.bf16.mxu0 %v1572_v8 }
  0x2d   :  { %1246 = vmatpush3.bf16.msra.mxu1 %v1608_v14 }
  0x2e   :  { %1247 = vmatprep.subr.bf16.mxu1 %v1506_v1 }
  0x2f   :  { %312 = vmatpush1.bf16.msra.mxu0 %v1583_v10 }
  0x30   :  { %313 = vmatprep.subr.bf16.mxu0 %v1590_v11 }
  0x31   :  { %1248 = vmatpush3.bf16.msra.mxu1 %v1627_v17 }
  0x32   :  { %1249 = vmatprep.subr.bf16.mxu1 %v1506_v1 }
  0x33   :  { %314 = vmatpush1.bf16.msra.mxu0 %v1601_v13 }
  0x34   :  { %315 = vmatprep.subr.bf16.mxu0 %v1614_v15 }
  0x35   :  { %1250 = vmatpush3.bf16.msra.mxu1 %v1646_v20 }
  0x36   :  { %1251 = vmatprep.subr.bf16.mxu1 %v1506_v1 }
  0x37   :  { %316 = vmatpush1.bf16.msra.mxu0 %v1621_v16 }
  0x38   :  { %317 = vmatprep.subr.bf16.mxu0 %v1633_v18 }
  0x39   :  { %1252 = vmatpush3.bf16.msra.mxu1 %v1665_v23 }
  0x3a   :  { %1253 = vmatprep.subr.bf16.mxu1 %v1506_v1 }
  0x3b   :  { %318 = vmatpush1.bf16.msra.mxu0 %v1640_v19 }
  0x3c   :  { %319 = vmatprep.subr.bf16.mxu0 %v1652_v21 }
  0x3d   :  { %1254 = vmatpush3.bf16.msra.mxu1 %v1674_v24 }
  0x3e   :  { %1255 = vmatprep.subr.bf16.mxu1 %v1506_v1 }
  0x3f   :  { %320 = vmatpush1.bf16.msra.mxu0 %v1659_v22 }
  0x40   :  { %417 = vmatprep.subr.bf16.mxu0 %v1533_v0 }
  0x41   :  { %1256 = vmatpush3.bf16.msra.mxu1 %v1682_v26 }
  0x42   :  { %1261 = vmatprep.subr.bf16.mxu1 %v1506_v1 }
  0xf5   :  { %v228_v29 = vpop.f32.mrb[0].mxu0 }
  0xf6   :  { %v275_v31 = vadd.f32 %v228_v29, %v62_v28  ;;  %v230_v32 = vpop.f32.mrb[1].mxu0 }
  0xf7   :  { %v232_v33 = vpop.f32.mrb[2].mxu0  ;;  %v276_v36 = vadd.f32 %v230_v32, %v63_v30  ;;  %v269_v38 = vpop.f32.mrb[0].mxu1 }
  0xf8   :  { %v1112_v34 = vmul.f32 -1.442695, %v275_v31  ;;  %v233_v35 = vpop.f32.mrb[3].mxu0  ;;  %v1239_v39 = vpop.f32.mrb[1].mxu1  ;;  %v289_v48 = vadd.f32 %v1728_v45, %v269_v38 }
  0xf9   :  { %v1113_v37 = vmul.f32 -1.442695, %v276_v36  ;;  %v272_v40 = vpop.f32.mrb[2].mxu1 }
  0xfa   :  { %1417 = vpow2.f32 %v1112_v34  ;;  %v1240_v41 = vpop.f32.mrb[3].mxu1  ;;  %v1783_v40 = vld [vmem:[%s2073_s0 + $0x14] ss:$12 sps:$4 sm:$0xff]  }
  0xfb   :  { %1419 = vpow2.f32 %v1113_v37 }
 0x104   :  { %v1418_v42 = vpop.eup %1417 }
 0x105   :  { %v283_v43 = vadd.f32 1.0, %v1418_v42  ;;  %v1420_v44 = vpop.eup %1419  ;;  %v303_v42 = vunpack.c.l.bf16 %v1783_v40 }
 0x106   :  { %v284_v47 = vadd.f32 1.0, %v1420_v44 }
 0x107   :  { %1421 = vrcp.f32 %v283_v43 }
 0x108   :  { %1423 = vrcp.f32 %v284_v47 }
 0x111   :  { %v1422_v50 = vpop.eup %1421 }
 0x112   :  { %v290_v51 = vmul.f32 %v1422_v50, %v289_v48  ;;  %v1424_v53 = vpop.eup %1423 }
 0x113   :  { %v293_v54 = vsub.f32 1.0, %v1424_v53  ;;  %v295_v57 = vmul.f32 0.0, %v1424_v53 }
 0x114   :  { %v291_v52 = vadd.f32 %v290_v51, %v64_v49 }
 0x116   :  { %1425 = vtanh.f32 %v291_v52 }
 0x120   :  { %v1426_v55 = vpop.eup %1425 }
 0x121   :  { %v294_v56 = vmul.f32 %v1426_v55, %v293_v54  ;;  %v1119_v55 = vld [vmem:[%s2073_s0 + $0x18] sm:$0xff] }
 0x123   :  { %v1734_v58 = vadd.f32 %v295_v57, %v294_v56  ;;  %v413_v56 = vunpack.c.l.bf16 %v1119_v55 }
 0x125   :  { %297 = vst [vmem:[%s2075_s3] sm:$0xff] %v1734_v58  ;;  %v304_v59 = vpack.c.bf16 %v1734_v58, %v1734_v58 }
 0x127   :  { %338 = vmatmul.mubr.bf16.vlgmr.msra.gmra.mrb[4].mxu0 %v304_v59  ;;  %1258 = vmatmul.mubr.bf16.vlgmr.msra.gmra.mrb[4].mxu1 %v304_v59  ;;  %v414_v59 = vunpack.c.h.bf16 %v1119_v55 }
 0x128   :  { %418 = vmatpush1.bf16.msra.mxu0 %v1540_v3  ;;  %1262 = vmatpush3.bf16.msra.mxu1 %v1577_v9 }
 0x129   :  { %419 = vmatprep.subr.bf16.mxu0 %v1548_v4  ;;  %1263 = vmatprep.subr.bf16.mxu1 %v1506_v1 }
 0x12a   :  { %449 = vmatprep.mubr.bf16.mxu0 %v1507_v2  ;;  %1277 = vmatprep.mubr.msk.bf16.mxu1 %vm1508_vm0, %v1506_v1 }
 0x12c   :  { %420 = vmatpush1.bf16.msra.mxu0 %v1554_v5  ;;  %1264 = vmatpush3.bf16.msra.mxu1 %v1596_v12 }
 0x12d   :  { %421 = vmatprep.subr.bf16.mxu0 %v1560_v6  ;;  %1265 = vmatprep.subr.bf16.mxu1 %v1506_v1 }
 0x130   :  { %422 = vmatpush1.bf16.msra.mxu0 %v1566_v7  ;;  %1266 = vmatpush3.bf16.msra.mxu1 %v1608_v14 }
 0x131   :  { %423 = vmatprep.subr.bf16.mxu0 %v1572_v8  ;;  %1267 = vmatprep.subr.bf16.mxu1 %v1506_v1 }
 0x134   :  { %424 = vmatpush1.bf16.msra.mxu0 %v1583_v10  ;;  %1268 = vmatpush3.bf16.msra.mxu1 %v1627_v17 }
 0x135   :  { %425 = vmatprep.subr.bf16.mxu0 %v1590_v11  ;;  %1269 = vmatprep.subr.bf16.mxu1 %v1506_v1 }
 0x138   :  { %426 = vmatpush1.bf16.msra.mxu0 %v1601_v13  ;;  %1270 = vmatpush3.bf16.msra.mxu1 %v1646_v20 }
 0x139   :  { %427 = vmatprep.subr.bf16.mxu0 %v1614_v15  ;;  %1271 = vmatprep.subr.bf16.mxu1 %v1506_v1 }
 0x13c   :  { %428 = vmatpush1.bf16.msra.mxu0 %v1621_v16  ;;  %1272 = vmatpush3.bf16.msra.mxu1 %v1665_v23 }
 0x13d   :  { %429 = vmatprep.subr.bf16.mxu0 %v1633_v18  ;;  %1273 = vmatprep.subr.bf16.mxu1 %v1506_v1 }
 0x140   :  { %430 = vmatpush1.bf16.msra.mxu0 %v1640_v19  ;;  %1274 = vmatpush3.bf16.msra.mxu1 %v1674_v24 }
 0x141   :  { %431 = vmatprep.subr.bf16.mxu0 %v1652_v21  ;;  %1275 = vmatprep.subr.bf16.mxu1 %v1506_v1 }
 0x144   :  { %432 = vmatpush1.bf16.msra.mxu0 %v1659_v22  ;;  %1276 = vmatpush3.bf16.msra.mxu1 %v1682_v26 }
 0x145   :  { %529 = vmatprep.subr.bf16.mxu0 %v1533_v0  ;;  %1281 = vmatprep.subr.bf16.mxu1 %v1506_v1 }
 0x1fa   :  { %v339_v62 = vpop.f32.mrb[4].mxu0  ;;  %v380_v63 = vpop.f32.mrb[4].mxu1 }
 0x1fb   :  { %v386_v27 = vadd.f32 %v339_v62, %v301_v61  ;;  %v341_v28 = vpop.f32.mrb[5].mxu0  ;;  %v1259_v29 = vpop.f32.mrb[5].mxu1  ;;  %v400_v43 = vadd.f32 %v1728_v45, %v380_v63 }
 0x1fc   :  { %v343_v30 = vpop.f32.mrb[6].mxu0  ;;  %v383_v31 = vpop.f32.mrb[6].mxu1  ;;  %v387_v35 = vadd.f32 %v341_v28, %v302_v25 }
 0x1fd   :  { %v1116_v32 = vmul.f32 -1.442695, %v386_v27  ;;  %v344_v33 = vpop.f32.mrb[7].mxu0  ;;  %v1260_v34 = vpop.f32.mrb[7].mxu1 }
 0x1fe   :  { %v1117_v36 = vmul.f32 -1.442695, %v387_v35 }
 0x1ff   :  { %1427 = vpow2.f32 %v1116_v32 }
 0x200   :  { %1429 = vpow2.f32 %v1117_v36  ;;  %v415_v36 = vunpack.c.h.bf16 %v1783_v40 }
 0x209   :  { %v1428_v37 = vpop.eup %1427 }
 0x20a   :  { %v394_v38 = vadd.f32 1.0, %v1428_v37  ;;  %v1430_v39 = vpop.eup %1429 }
 0x20b   :  { %v395_v41 = vadd.f32 1.0, %v1430_v39 }
 0x20c   :  { %1431 = vrcp.f32 %v394_v38 }
 0x20d   :  { %1433 = vrcp.f32 %v395_v41 }
 0x216   :  { %v1432_v44 = vpop.eup %1431 }
 0x217   :  { %v401_v46 = vmul.f32 %v1432_v44, %v400_v43  ;;  %v1434_v48 = vpop.eup %1433 }
 0x218   :  { %v404_v49 = vsub.f32 1.0, %v1434_v48  ;;  %v406_v52 = vmul.f32 %v1434_v48, %v1734_v58 }
 0x219   :  { %v402_v47 = vadd.f32 %v401_v46, %v303_v42 }
 0x21b   :  { %1435 = vtanh.f32 %v402_v47 }
 0x225   :  { %v1436_v50 = vpop.eup %1435 }
 0x226   :  { %v405_v51 = vmul.f32 %v1436_v50, %v404_v49  ;;  %v1124_v49 = vld [vmem:[%s2073_s0 + $0x24] sm:$0xff] }
 0x227   :  { %v525_v50 = vunpack.c.l.bf16 %v1124_v49 }
 0x228   :  { %v1788_v53 = vadd.f32 %v406_v52, %v405_v51 }
 0x22a   :  { %1118 = vst [vmem:[%s2075_s3 + $0x8] sm:$0xff] %v1788_v53  ;;  %v416_v54 = vpack.c.bf16 %v1788_v53, %v1788_v53 }
 0x22c   :  { %450 = vmatmul.mubr.bf16.vlgmr.msra.gmra.mrb[8].mxu0 %v416_v54  ;;  %1278 = vmatmul.mubr.bf16.vlgmr.msra.gmra.mrb[8].mxu1 %v416_v54 }
 0x22d   :  { %530 = vmatpush1.bf16.msra.mxu0 %v1540_v3  ;;  %1282 = vmatpush3.bf16.msra.mxu1 %v1577_v9 }
 0x22e   :  { %531 = vmatprep.subr.bf16.mxu0 %v1548_v4  ;;  %1283 = vmatprep.subr.bf16.mxu1 %v1506_v1 }
 0x22f   :  { %561 = vmatprep.mubr.bf16.mxu0 %v1507_v2  ;;  %1297 = vmatprep.mubr.msk.bf16.mxu1 %vm1508_vm0, %v1506_v1 }
 0x231   :  { %532 = vmatpush1.bf16.msra.mxu0 %v1554_v5  ;;  %1284 = vmatpush3.bf16.msra.mxu1 %v1596_v12 }
 0x232   :  { %533 = vmatprep.subr.bf16.mxu0 %v1560_v6  ;;  %1285 = vmatprep.subr.bf16.mxu1 %v1506_v1 }
 0x235   :  { %534 = vmatpush1.bf16.msra.mxu0 %v1566_v7  ;;  %1286 = vmatpush3.bf16.msra.mxu1 %v1608_v14 }
 0x236   :  { %535 = vmatprep.subr.bf16.mxu0 %v1572_v8  ;;  %1287 = vmatprep.subr.bf16.mxu1 %v1506_v1 }
 0x239   :  { %536 = vmatpush1.bf16.msra.mxu0 %v1583_v10  ;;  %1288 = vmatpush3.bf16.msra.mxu1 %v1627_v17 }
 0x23a   :  { %537 = vmatprep.subr.bf16.mxu0 %v1590_v11  ;;  %1289 = vmatprep.subr.bf16.mxu1 %v1506_v1 }
 0x23d   :  { %538 = vmatpush1.bf16.msra.mxu0 %v1601_v13  ;;  %1290 = vmatpush3.bf16.msra.mxu1 %v1646_v20 }
 0x23e   :  { %539 = vmatprep.subr.bf16.mxu0 %v1614_v15  ;;  %1291 = vmatprep.subr.bf16.mxu1 %v1506_v1 }
 0x241   :  { %540 = vmatpush1.bf16.msra.mxu0 %v1621_v16  ;;  %1292 = vmatpush3.bf16.msra.mxu1 %v1665_v23 }
 0x242   :  { %541 = vmatprep.subr.bf16.mxu0 %v1633_v18  ;;  %1293 = vmatprep.subr.bf16.mxu1 %v1506_v1 }
 0x245   :  { %542 = vmatpush1.bf16.msra.mxu0 %v1640_v19  ;;  %1294 = vmatpush3.bf16.msra.mxu1 %v1674_v24 }
 0x246   :  { %543 = vmatprep.subr.bf16.mxu0 %v1652_v21  ;;  %1295 = vmatprep.subr.bf16.mxu1 %v1506_v1 }
 0x249   :  { %544 = vmatpush1.bf16.msra.mxu0 %v1659_v22  ;;  %1296 = vmatpush3.bf16.msra.mxu1 %v1682_v26 }
 0x24a   :  { %641 = vmatprep.subr.bf16.mxu0 %v1533_v0  ;;  %1301 = vmatprep.subr.bf16.mxu1 %v1506_v1 }
 0x2ff   :  { %v451_v57 = vpop.f32.mrb[8].mxu0  ;;  %v492_v58 = vpop.f32.mrb[8].mxu1 }
 0x300   :  { %v498_v60 = vadd.f32 %v451_v57, %v413_v56  ;;  %v453_v61 = vpop.f32.mrb[9].mxu0  ;;  %v1279_v62 = vpop.f32.mrb[9].mxu1  ;;  %v512_v37 = vadd.f32 %v1728_v45, %v492_v58 }
 0x301   :  { %v455_v63 = vpop.f32.mrb[10].mxu0  ;;  %v495_v25 = vpop.f32.mrb[10].mxu1  ;;  %v499_v30 = vadd.f32 %v453_v61, %v414_v59 }
 0x302   :  { %v1121_v27 = vmul.f32 -1.442695, %v498_v60  ;;  %v456_v28 = vpop.f32.mrb[11].mxu0  ;;  %v1280_v29 = vpop.f32.mrb[11].mxu1 }
 0x303   :  { %v1122_v31 = vmul.f32 -1.442695, %v499_v30  ;;  %v1886_v29 = vld [vmem:[%s2073_s0 + $0x2c] ss:$12 sps:$4 sm:$0xff]  }
 0x304   :  { %1437 = vpow2.f32 %v1121_v27 }
 0x305   :  { %1439 = vpow2.f32 %v1122_v31  ;;  %v527_v31 = vunpack.c.l.bf16 %v1886_v29 }
 0x30e   :  { %v1438_v32 = vpop.eup %1437 }
 0x30f   :  { %v506_v33 = vadd.f32 1.0, %v1438_v32  ;;  %v1440_v34 = vpop.eup %1439 }
 0x310   :  { %v507_v35 = vadd.f32 1.0, %v1440_v34 }
 0x311   :  { %1441 = vrcp.f32 %v506_v33 }
 0x312   :  { %1443 = vrcp.f32 %v507_v35 }
 0x31b   :  { %v1442_v38 = vpop.eup %1441 }
 0x31c   :  { %v513_v39 = vmul.f32 %v1442_v38, %v512_v37  ;;  %v1444_v42 = vpop.eup %1443 }
 0x31d   :  { %v516_v43 = vsub.f32 1.0, %v1444_v42  ;;  %v518_v47 = vmul.f32 %v1444_v42, %v1788_v53  ;;  %v526_v53 = vunpack.c.h.bf16 %v1124_v49 }
 0x31e   :  { %v514_v41 = vadd.f32 %v513_v39, %v415_v36 }
 0x320   :  { %1445 = vtanh.f32 %v514_v41 }
 0x32a   :  { %v1446_v44 = vpop.eup %1445 }
 0x32b   :  { %v517_v46 = vmul.f32 %v1446_v44, %v516_v43  ;;  %v1129_v44 = vld [vmem:[%s2073_s0 + $0x30] sm:$0xff] }
 0x32d   :  { %v1837_v48 = vadd.f32 %v518_v47, %v517_v46  ;;  %v637_v46 = vunpack.c.l.bf16 %v1129_v44 }
 0x32f   :  { %1123 = vst [vmem:[%s2075_s3 + $0x10] sm:$0xff] %v1837_v48  ;;  %v528_v40 = vpack.c.bf16 %v1837_v48, %v1837_v48 }
 0x331   :  { %562 = vmatmul.mubr.bf16.vlgmr.msra.gmra.mrb[12].mxu0 %v528_v40  ;;  %1298 = vmatmul.mubr.bf16.vlgmr.msra.gmra.mrb[12].mxu1 %v528_v40  ;;  %v638_v40 = vunpack.c.h.bf16 %v1129_v44 }
 0x332   :  { %642 = vmatpush1.bf16.msra.mxu0 %v1540_v3  ;;  %1302 = vmatpush3.bf16.msra.mxu1 %v1577_v9 }
 0x333   :  { %643 = vmatprep.subr.bf16.mxu0 %v1548_v4  ;;  %1303 = vmatprep.subr.bf16.mxu1 %v1506_v1 }
 0x334   :  { %673 = vmatprep.mubr.bf16.mxu0 %v1507_v2  ;;  %1317 = vmatprep.mubr.msk.bf16.mxu1 %vm1508_vm0, %v1506_v1 }
 0x336   :  { %644 = vmatpush1.bf16.msra.mxu0 %v1554_v5  ;;  %1304 = vmatpush3.bf16.msra.mxu1 %v1596_v12 }
 0x337   :  { %645 = vmatprep.subr.bf16.mxu0 %v1560_v6  ;;  %1305 = vmatprep.subr.bf16.mxu1 %v1506_v1 }
 0x33a   :  { %646 = vmatpush1.bf16.msra.mxu0 %v1566_v7  ;;  %1306 = vmatpush3.bf16.msra.mxu1 %v1608_v14 }
 0x33b   :  { %647 = vmatprep.subr.bf16.mxu0 %v1572_v8  ;;  %1307 = vmatprep.subr.bf16.mxu1 %v1506_v1 }
 0x33e   :  { %648 = vmatpush1.bf16.msra.mxu0 %v1583_v10  ;;  %1308 = vmatpush3.bf16.msra.mxu1 %v1627_v17 }
 0x33f   :  { %649 = vmatprep.subr.bf16.mxu0 %v1590_v11  ;;  %1309 = vmatprep.subr.bf16.mxu1 %v1506_v1 }
 0x342   :  { %650 = vmatpush1.bf16.msra.mxu0 %v1601_v13  ;;  %1310 = vmatpush3.bf16.msra.mxu1 %v1646_v20 }
 0x343   :  { %651 = vmatprep.subr.bf16.mxu0 %v1614_v15  ;;  %1311 = vmatprep.subr.bf16.mxu1 %v1506_v1 }
 0x346   :  { %652 = vmatpush1.bf16.msra.mxu0 %v1621_v16  ;;  %1312 = vmatpush3.bf16.msra.mxu1 %v1665_v23 }
 0x347   :  { %653 = vmatprep.subr.bf16.mxu0 %v1633_v18  ;;  %1313 = vmatprep.subr.bf16.mxu1 %v1506_v1 }
 0x34a   :  { %654 = vmatpush1.bf16.msra.mxu0 %v1640_v19  ;;  %1314 = vmatpush3.bf16.msra.mxu1 %v1674_v24 }
 0x34b   :  { %655 = vmatprep.subr.bf16.mxu0 %v1652_v21  ;;  %1315 = vmatprep.subr.bf16.mxu1 %v1506_v1 }
 0x34e   :  { %656 = vmatpush1.bf16.msra.mxu0 %v1659_v22  ;;  %1316 = vmatpush3.bf16.msra.mxu1 %v1682_v26 }
 0x34f   :  { %753 = vmatprep.subr.bf16.mxu0 %v1533_v0  ;;  %1321 = vmatprep.subr.bf16.mxu1 %v1506_v1 }
 0x404   :  { %v563_v51 = vpop.f32.mrb[12].mxu0  ;;  %v604_v52 = vpop.f32.mrb[12].mxu1 }
 0x405   :  { %v610_v54 = vadd.f32 %v563_v51, %v525_v50  ;;  %v565_v55 = vpop.f32.mrb[13].mxu0  ;;  %v1299_v56 = vpop.f32.mrb[13].mxu1  ;;  %v624_v32 = vadd.f32 %v1728_v45, %v604_v52 }
 0x406   :  { %v567_v57 = vpop.f32.mrb[14].mxu0  ;;  %v607_v58 = vpop.f32.mrb[14].mxu1  ;;  %v611_v62 = vadd.f32 %v565_v55, %v526_v53 }
 0x407   :  { %v1126_v59 = vmul.f32 -1.442695, %v610_v54  ;;  %v568_v60 = vpop.f32.mrb[15].mxu0  ;;  %v1300_v61 = vpop.f32.mrb[15].mxu1 }
 0x408   :  { %v1127_v63 = vmul.f32 -1.442695, %v611_v62 }
 0x409   :  { %1447 = vpow2.f32 %v1126_v59 }
 0x40a   :  { %1449 = vpow2.f32 %v1127_v63  ;;  %v639_v63 = vunpack.c.h.bf16 %v1886_v29 }
 0x413   :  { %v1448_v25 = vpop.eup %1447 }
 0x414   :  { %v618_v27 = vadd.f32 1.0, %v1448_v25  ;;  %v1450_v28 = vpop.eup %1449 }
 0x415   :  { %v619_v30 = vadd.f32 1.0, %v1450_v28 }
 0x416   :  { %1451 = vrcp.f32 %v618_v27 }
 0x417   :  { %1453 = vrcp.f32 %v619_v30 }
 0x420   :  { %v1452_v33 = vpop.eup %1451 }
 0x421   :  { %v625_v34 = vmul.f32 %v1452_v33, %v624_v32  ;;  %v1454_v36 = vpop.eup %1453 }
 0x422   :  { %v628_v37 = vsub.f32 1.0, %v1454_v36  ;;  %v630_v41 = vmul.f32 %v1454_v36, %v1837_v48 }
 0x423   :  { %v626_v35 = vadd.f32 %v625_v34, %v527_v31 }
 0x425   :  { %1455 = vtanh.f32 %v626_v35 }
 0x42f   :  { %v1456_v38 = vpop.eup %1455 }
 0x430   :  { %v629_v39 = vmul.f32 %v1456_v38, %v628_v37 }
 0x432   :  { %v1891_v42 = vadd.f32 %v630_v41, %v629_v39 }
 0x434   :  { %1128 = vst [vmem:[%s2075_s3 + $0x18] sm:$0xff] %v1891_v42  ;;  %v640_v43 = vpack.c.bf16 %v1891_v42, %v1891_v42 }
 0x436   :  { %674 = vmatmul.mubr.bf16.vlgmr.msra.gmra.mrb[16].mxu0 %v640_v43  ;;  %1318 = vmatmul.mubr.bf16.vlgmr.msra.gmra.mrb[16].mxu1 %v640_v43 }
 0x437   :  { %754 = vmatpush1.bf16.msra.mxu0 %v1540_v3  ;;  %1322 = vmatpush3.bf16.msra.mxu1 %v1577_v9 }
 0x438   :  { %755 = vmatprep.subr.bf16.mxu0 %v1548_v4  ;;  %1323 = vmatprep.subr.bf16.mxu1 %v1506_v1 }
 0x439   :  { %785 = vmatprep.mubr.bf16.mxu0 %v1507_v2  ;;  %1337 = vmatprep.mubr.msk.bf16.mxu1 %vm1508_vm0, %v1506_v1 }
 0x43b   :  { %756 = vmatpush1.bf16.msra.mxu0 %v1554_v5  ;;  %1324 = vmatpush3.bf16.msra.mxu1 %v1596_v12 }
 0x43c   :  { %757 = vmatprep.subr.bf16.mxu0 %v1560_v6  ;;  %1325 = vmatprep.subr.bf16.mxu1 %v1506_v1 }
 0x43f   :  { %758 = vmatpush1.bf16.msra.mxu0 %v1566_v7  ;;  %1326 = vmatpush3.bf16.msra.mxu1 %v1608_v14 }
 0x440   :  { %759 = vmatprep.subr.bf16.mxu0 %v1572_v8  ;;  %1327 = vmatprep.subr.bf16.mxu1 %v1506_v1 }
 0x443   :  { %760 = vmatpush1.bf16.msra.mxu0 %v1583_v10  ;;  %1328 = vmatpush3.bf16.msra.mxu1 %v1627_v17 }
 0x444   :  { %761 = vmatprep.subr.bf16.mxu0 %v1590_v11  ;;  %1329 = vmatprep.subr.bf16.mxu1 %v1506_v1 }
 0x447   :  { %762 = vmatpush1.bf16.msra.mxu0 %v1601_v13  ;;  %1330 = vmatpush3.bf16.msra.mxu1 %v1646_v20 }
 0x448   :  { %763 = vmatprep.subr.bf16.mxu0 %v1614_v15  ;;  %1331 = vmatprep.subr.bf16.mxu1 %v1506_v1 }
 0x44b   :  { %764 = vmatpush1.bf16.msra.mxu0 %v1621_v16  ;;  %1332 = vmatpush3.bf16.msra.mxu1 %v1665_v23 }
 0x44c   :  { %765 = vmatprep.subr.bf16.mxu0 %v1633_v18  ;;  %1333 = vmatprep.subr.bf16.mxu1 %v1506_v1 }
 0x44f   :  { %766 = vmatpush1.bf16.msra.mxu0 %v1640_v19  ;;  %1334 = vmatpush3.bf16.msra.mxu1 %v1674_v24 }
 0x450   :  { %767 = vmatprep.subr.bf16.mxu0 %v1652_v21  ;;  %1335 = vmatprep.subr.bf16.mxu1 %v1506_v1 }
 0x453   :  { %768 = vmatpush1.bf16.msra.mxu0 %v1659_v22  ;;  %1336 = vmatpush3.bf16.msra.mxu1 %v1682_v26 }
 0x454   :  { %865 = vmatprep.subr.bf16.mxu0 %v1533_v0  ;;  %1341 = vmatprep.subr.bf16.mxu1 %v1506_v1 }
 0x509   :  { %v675_v47 = vpop.f32.mrb[16].mxu0  ;;  %v716_v48 = vpop.f32.mrb[16].mxu1 }
 0x50a   :  { %v722_v49 = vadd.f32 %v675_v47, %v637_v46  ;;  %v677_v50 = vpop.f32.mrb[17].mxu0  ;;  %v1319_v51 = vpop.f32.mrb[17].mxu1  ;;  %v736_v25 = vadd.f32 %v1728_v45, %v716_v48  ;;  %v1989_v47 = vld [vmem:[%s2073_s0 + $0x44] ss:$12 sps:$4 sm:$0xff]  }
 0x50b   :  { %v679_v52 = vpop.f32.mrb[18].mxu0  ;;  %v719_v53 = vpop.f32.mrb[18].mxu1  ;;  %v723_v57 = vadd.f32 %v677_v50, %v638_v40  ;;  %v751_v40 = vunpack.c.l.bf16 %v1989_v47 }
 0x50c   :  { %v1131_v54 = vmul.f32 -1.442695, %v722_v49  ;;  %v680_v55 = vpop.f32.mrb[19].mxu0  ;;  %v1320_v56 = vpop.f32.mrb[19].mxu1 }
 0x50d   :  { %v1132_v58 = vmul.f32 -1.442695, %v723_v57 }
 0x50e   :  { %1457 = vpow2.f32 %v1131_v54 }
 0x50f   :  { %1459 = vpow2.f32 %v1132_v58 }
 0x518   :  { %v1458_v59 = vpop.eup %1457 }
 0x519   :  { %v730_v60 = vadd.f32 1.0, %v1458_v59  ;;  %v1460_v61 = vpop.eup %1459 }
 0x51a   :  { %v731_v62 = vadd.f32 1.0, %v1460_v61  ;;  %v1498_v61 = vld [vmem:[%s2072_s1 + $0x1c] ss:$12 sps:$4 sm:$0xff]  }
 0x51b   :  { %1461 = vrcp.f32 %v730_v60  ;;  %v1497_v60 = vld [vmem:[%s2072_s1] ss:$12 sps:$4 sm:$0xff]  }
 0x51c   :  { %1463 = vrcp.f32 %v731_v62  ;;  %v1499_v62 = vld [vmem:[%s2072_s1 + $0x18] ss:$12 sps:$4 sm:$0xff]  }
 0x525   :  { %v1462_v27 = vpop.eup %1461 }
 0x526   :  { %v737_v28 = vmul.f32 %v1462_v27, %v736_v25  ;;  %v1464_v31 = vpop.eup %1463  ;;  %v1504_v25 = vld [vmem:[%s2072_s1 + $0x64] ss:$12 sps:$4 sm:$0xff]  }
 0x527   :  { %v740_v32 = vsub.f32 1.0, %v1464_v31  ;;  %v742_v35 = vmul.f32 %v1464_v31, %v1891_v42 }
 0x528   :  { %v738_v30 = vadd.f32 %v737_v28, %v639_v63  ;;  %v1502_v63 = vld [vmem:[%s2072_s1 + $0x4c] ss:$12 sps:$4 sm:$0xff]  }
 0x52a   :  { %1465 = vtanh.f32 %v738_v30 }
 0x534   :  { %v1466_v33 = vpop.eup %1465 }
 0x535   :  { %v741_v34 = vmul.f32 %v1466_v33, %v740_v32 }
 0x537   :  { %v1940_v36 = vadd.f32 %v742_v35, %v741_v34  ;;  %v863_v35 = vunpack.c.h.bf16 %v1989_v47 }
 0x539   :  { %1133 = vst [vmem:[%s2075_s3 + $0x20] sm:$0xff] %v1940_v36  ;;  %v752_v29 = vpack.c.bf16 %v1940_v36, %v1940_v36 }
 0x53b   :  { %786 = vmatmul.mubr.bf16.vlgmr.msra.gmra.mrb[20].mxu0 %v752_v29  ;;  %1338 = vmatmul.mubr.bf16.vlgmr.msra.gmra.mrb[20].mxu1 %v752_v29 }
 0x53c   :  { %866 = vmatpush1.bf16.msra.mxu0 %v1540_v3  ;;  %1342 = vmatpush3.bf16.msra.mxu1 %v1577_v9  ;;  %v1134_v3 = vld [vmem:[%s2073_s0 + $0x3c] sm:$0xff] }
 0x53d   :  { %867 = vmatprep.subr.bf16.mxu0 %v1548_v4  ;;  %1343 = vmatprep.subr.bf16.mxu1 %v1506_v1  ;;  %v749_v4 = vunpack.c.l.bf16 %v1134_v3 }
 0x53e   :  { %897 = vmatprep.mubr.bf16.mxu0 %v1507_v2  ;;  %1357 = vmatprep.mubr.msk.bf16.mxu1 %vm1508_vm0, %v1506_v1 }
 0x540   :  { %868 = vmatpush1.bf16.msra.mxu0 %v1554_v5  ;;  %1344 = vmatpush3.bf16.msra.mxu1 %v1596_v12 }
 0x541   :  { %869 = vmatprep.subr.bf16.mxu0 %v1560_v6  ;;  %1345 = vmatprep.subr.bf16.mxu1 %v1506_v1 }
 0x544   :  { %870 = vmatpush1.bf16.msra.mxu0 %v1566_v7  ;;  %1346 = vmatpush3.bf16.msra.mxu1 %v1608_v14  ;;  %v750_v7 = vunpack.c.h.bf16 %v1134_v3 }
 0x545   :  { %871 = vmatprep.subr.bf16.mxu0 %v1572_v8  ;;  %1347 = vmatprep.subr.bf16.mxu1 %v1506_v1 }
 0x548   :  { %872 = vmatpush1.bf16.msra.mxu0 %v1583_v10  ;;  %1348 = vmatpush3.bf16.msra.mxu1 %v1627_v17 }
 0x549   :  { %873 = vmatprep.subr.bf16.mxu0 %v1590_v11  ;;  %1349 = vmatprep.subr.bf16.mxu1 %v1506_v1 }
 0x54c   :  { %874 = vmatpush1.bf16.msra.mxu0 %v1601_v13  ;;  %1350 = vmatpush3.bf16.msra.mxu1 %v1646_v20 }
 0x54d   :  { %875 = vmatprep.subr.bf16.mxu0 %v1614_v15  ;;  %1351 = vmatprep.subr.bf16.mxu1 %v1506_v1 }
 0x550   :  { %876 = vmatpush1.bf16.msra.mxu0 %v1621_v16  ;;  %1352 = vmatpush3.bf16.msra.mxu1 %v1665_v23 }
 0x551   :  { %877 = vmatprep.subr.bf16.mxu0 %v1633_v18  ;;  %1353 = vmatprep.subr.bf16.mxu1 %v1506_v1 }
 0x554   :  { %878 = vmatpush1.bf16.msra.mxu0 %v1640_v19  ;;  %1354 = vmatpush3.bf16.msra.mxu1 %v1674_v24 }
 0x555   :  { %879 = vmatprep.subr.bf16.mxu0 %v1652_v21  ;;  %1355 = vmatprep.subr.bf16.mxu1 %v1506_v1 }
 0x558   :  { %880 = vmatpush1.bf16.msra.mxu0 %v1659_v22  ;;  %1356 = vmatpush3.bf16.msra.mxu1 %v1682_v26 }
 0x559   :  { %977 = vmatprep.subr.bf16.mxu0 %v1533_v0  ;;  %1361 = vmatprep.subr.bf16.mxu1 %v1506_v1 }
 0x60e   :  { %v787_v5 = vpop.f32.mrb[20].mxu0  ;;  %v828_v6 = vpop.f32.mrb[20].mxu1 }
 0x60f   :  { %v834_v8 = vadd.f32 %v787_v5, %v749_v4  ;;  %v789_v10 = vpop.f32.mrb[21].mxu0  ;;  %v1339_v11 = vpop.f32.mrb[21].mxu1  ;;  %v848_v49 = vadd.f32 %v1728_v45, %v828_v6 }
 0x610   :  { %v791_v13 = vpop.f32.mrb[22].mxu0  ;;  %v831_v37 = vpop.f32.mrb[22].mxu1  ;;  %v835_v42 = vadd.f32 %v789_v10, %v750_v7 }
 0x611   :  { %v1136_v38 = vmul.f32 -1.442695, %v834_v8  ;;  %v792_v39 = vpop.f32.mrb[23].mxu0  ;;  %v1340_v41 = vpop.f32.mrb[23].mxu1  ;;  %v1144_v37 = vld [vmem:[%s2073_s0 + $0x54] sm:$0xff] }
 0x612   :  { %v1137_v0 = vmul.f32 -1.442695, %v835_v42  ;;  %v974_v42 = vunpack.c.h.bf16 %v1144_v37 }
 0x613   :  { %1467 = vpow2.f32 %v1136_v38  ;;  %v973_v38 = vunpack.c.l.bf16 %v1144_v37 }
 0x614   :  { %1469 = vpow2.f32 %v1137_v0 }
 0x61d   :  { %v1468_v43 = vpop.eup %1467 }
 0x61e   :  { %v842_v44 = vadd.f32 1.0, %v1468_v43  ;;  %v1470_v46 = vpop.eup %1469 }
 0x61f   :  { %v843_v48 = vadd.f32 1.0, %v1470_v46 }
 0x620   :  { %1471 = vrcp.f32 %v842_v44 }
 0x621   :  { %1473 = vrcp.f32 %v843_v48 }
 0x62a   :  { %v1472_v50 = vpop.eup %1471 }
 0x62b   :  { %v849_v51 = vmul.f32 %v1472_v50, %v848_v49  ;;  %v1474_v53 = vpop.eup %1473 }
 0x62c   :  { %v852_v54 = vsub.f32 1.0, %v1474_v53  ;;  %v854_v57 = vmul.f32 %v1474_v53, %v1940_v36 }
 0x62d   :  { %v850_v52 = vadd.f32 %v849_v51, %v751_v40 }
 0x62f   :  { %1475 = vtanh.f32 %v850_v52 }
 0x639   :  { %v1476_v55 = vpop.eup %1475 }
 0x63a   :  { %v853_v56 = vmul.f32 %v1476_v55, %v852_v54  ;;  %v1145_v55 = vld [vmem:[%s2073_s0 + $0x5c] sm:$0xf] }
 0x63c   :  { %v1994_v58 = vadd.f32 %v854_v57, %v853_v56  ;;  %v975_v57 = vunpack.c.l.bf16 %v1145_v55 }
 0x63e   :  { %1138 = vst [vmem:[%s2075_s3 + $0x28] sm:$0xff] %v1994_v58  ;;  %v864_v59 = vpack.c.bf16 %v1994_v58, %v1994_v58 }
 0x640   :  { %898 = vmatmul.mubr.bf16.vlgmr.msra.gmra.mrb[24].mxu0 %v864_v59  ;;  %1358 = vmatmul.mubr.bf16.vlgmr.msra.gmra.mrb[24].mxu1 %v864_v59 }
 0x641   :  { %978 = vmatpush1.bf16.msra.mxu0 %v1497_v60  ;;  %1362 = vmatpush3.bf16.msra.mxu1 %v1577_v9  ;;  %v1500_v9 = vld [vmem:[%s2072_s1 + $0x34] ss:$12 sps:$4 sm:$0xff]  }
 0x642   :  { %979 = vmatprep.subr.bf16.mxu0 %v1498_v61  ;;  %1363 = vmatprep.subr.bf16.mxu1 %v1506_v1 }
 0x643   :  { %1009 = vmatprep.mubr.bf16.mxu0 %v1507_v2  ;;  %1377 = vmatprep.mubr.msk.bf16.mxu1 %vm1508_vm0, %v1506_v1  ;;  %v1501_v2 = vld [vmem:[%s2072_s1 + $0x30] ss:$12 sps:$4 sm:$0xff]  }
 0x645   :  { %980 = vmatpush1.bf16.msra.mxu0 %v1499_v62  ;;  %1364 = vmatpush3.bf16.msra.mxu1 %v1596_v12  ;;  %v1503_v12 = vld [vmem:[%s2072_s1 + $0x48] ss:$12 sps:$4 sm:$0xff]  }
 0x646   :  { %981 = vmatprep.subr.bf16.mxu0 %v1500_v9  ;;  %1365 = vmatprep.subr.bf16.mxu1 %v1506_v1 }
 0x649   :  { %982 = vmatpush1.bf16.msra.mxu0 %v1501_v2  ;;  %1366 = vmatpush3.bf16.msra.mxu1 %v1608_v14  ;;  %v1505_v14 = vld [vmem:[%s2072_s1 + $0x60] ss:$12 sps:$4 sm:$0xff]  }
 0x64a   :  { %983 = vmatprep.subr.bf16.mxu0 %v1502_v63  ;;  %1367 = vmatprep.subr.bf16.mxu1 %v1506_v1 }
 0x64d   :  { %984 = vmatpush1.bf16.msra.mxu0 %v1503_v12  ;;  %1368 = vmatpush3.bf16.msra.mxu1 %v1627_v17 }
 0x64e   :  { %985 = vmatprep.subr.bf16.mxu0 %v1504_v25  ;;  %1369 = vmatprep.subr.bf16.mxu1 %v1506_v1 }
 0x651   :  { %986 = vmatpush1.bf16.msra.mxu0 %v1505_v14  ;;  %1370 = vmatpush3.bf16.msra.mxu1 %v1646_v20 }
 0x652   :  { %987 = vmatprep.subr.bf16.mxu0 %v1614_v15  ;;  %1371 = vmatprep.subr.bf16.mxu1 %v1506_v1  ;;  %v1139_v15 = vld [vmem:[%s2073_s0 + $0x48] sm:$0xff] }
 0x653   :  { %v862_v20 = vunpack.c.h.bf16 %v1139_v15 }
 0x655   :  { %988 = vmatpush1.bf16.msra.mxu0 %v1621_v16  ;;  %1372 = vmatpush3.bf16.msra.mxu1 %v1665_v23  ;;  %v861_v16 = vunpack.c.l.bf16 %v1139_v15 }
 0x656   :  { %989 = vmatprep.subr.bf16.mxu0 %v1633_v18  ;;  %1373 = vmatprep.subr.bf16.mxu1 %v1506_v1 }
 0x659   :  { %990 = vmatpush1.bf16.msra.mxu0 %v1640_v19  ;;  %1374 = vmatpush3.bf16.msra.mxu1 %v1674_v24 }
 0x65a   :  { %991 = vmatprep.subr.bf16.mxu0 %v1652_v21  ;;  %1375 = vmatprep.subr.bf16.mxu1 %v1506_v1 }
 0x65d   :  { %992 = vmatpush1.bf16.msra.mxu0 %v1659_v22  ;;  %1376 = vmatpush3.bf16.msra.mxu1 %v1682_v26 }
 0x713   :  { %v899_v17 = vpop.f32.mrb[24].mxu0  ;;  %v940_v18 = vpop.f32.mrb[24].mxu1 }
 0x714   :  { %v946_v23 = vadd.f32 %v899_v17, %v861_v16  ;;  %v901_v19 = vpop.f32.mrb[25].mxu0  ;;  %v1359_v27 = vpop.f32.mrb[25].mxu1  ;;  %v960_v36 = vadd.f32 %v1728_v45, %v940_v18 }
 0x715   :  { %v903_v24 = vpop.f32.mrb[26].mxu0  ;;  %v943_v28 = vpop.f32.mrb[26].mxu1  ;;  %v947_v31 = vadd.f32 %v901_v19, %v862_v20 }
 0x716   :  { %v1141_v21 = vmul.f32 -1.442695, %v946_v23  ;;  %v904_v30 = vpop.f32.mrb[27].mxu0  ;;  %v1360_v1 = vpop.f32.mrb[27].mxu1 }
 0x717   :  { %v1142_v22 = vmul.f32 -1.442695, %v947_v31 }
 0x718   :  { %1477 = vpow2.f32 %v1141_v21 }
 0x719   :  { %1479 = vpow2.f32 %v1142_v22 }
 0x722   :  { %v1478_v26 = vpop.eup %1477 }
 0x723   :  { %v954_v32 = vadd.f32 1.0, %v1478_v26  ;;  %v1480_v33 = vpop.eup %1479 }
 0x724   :  { %v955_v34 = vadd.f32 1.0, %v1480_v33 }
 0x725   :  { %1481 = vrcp.f32 %v954_v32 }
 0x726   :  { %1483 = vrcp.f32 %v955_v34 }
 0x72f   :  { %v1482_v29 = vpop.eup %1481 }
 0x730   :  { %v961_v3 = vmul.f32 %v1482_v29, %v960_v36  ;;  %v1484_v5 = vpop.eup %1483 }
 0x731   :  { %v964_v6 = vsub.f32 1.0, %v1484_v5  ;;  %v966_v10 = vmul.f32 %v1484_v5, %v1994_v58 }
 0x732   :  { %v962_v4 = vadd.f32 %v961_v3, %v863_v35 }
 0x734   :  { %1485 = vtanh.f32 %v962_v4 }
 0x73e   :  { %v1486_v7 = vpop.eup %1485 }
 0x73f   :  { %v965_v8 = vmul.f32 %v1486_v7, %v964_v6 }
 0x741   :  { %v967_v11 = vadd.f32 %v966_v10, %v965_v8 }
 0x743   :  { %1143 = vst [vmem:[%s2075_s3 + $0x30] sm:$0xff] %v967_v11  ;;  %v976_v13 = vpack.c.bf16 %v967_v11, %v967_v11 }
 0x745   :  { %1010 = vmatmul.mubr.bf16.vlgmr.msra.gmra.mrb[28].mxu0 %v976_v13  ;;  %1378 = vmatmul.mubr.bf16.vlgmr.msra.gmra.mrb[28].mxu1 %v976_v13 }
 0x818   :  { %v1011_v39 = vpop.f32.mrb[28].mxu0  ;;  %v1052_v41 = vpop.f32.mrb[28].mxu1 }
 0x819   :  { %v1058_v0 = vadd.f32 %v1011_v39, %v973_v38  ;;  %v1013_v43 = vpop.f32.mrb[29].mxu0  ;;  %v1379_v44 = vpop.f32.mrb[29].mxu1  ;;  %v1072_v58 = vadd.f32 %v1728_v45, %v1052_v41 }
 0x81a   :  { %v1015_v46 = vpop.f32.mrb[30].mxu0  ;;  %v1055_v47 = vpop.f32.mrb[30].mxu1  ;;  %v1059_v50 = vadd.f32 %v1013_v43, %v974_v42 }
 0x81b   :  { %v1146_v48 = vmul.f32 -1.442695, %v1058_v0  ;;  %v1016_v40 = vpop.f32.mrb[31].mxu0  ;;  %v1380_v49 = vpop.f32.mrb[31].mxu1 }
 0x81c   :  { %v1147_v51 = vmul.f32 -1.442695, %v1059_v50 }
 0x81d   :  { %1487 = vpow2.f32 %v1146_v48 }
 0x81e   :  { %1489 = vpow2.f32 %v1147_v51 }
 0x827   :  { %v1488_v52 = vpop.eup %1487 }
 0x828   :  { %v1066_v53 = vadd.f32 1.0, %v1488_v52  ;;  %v1490_v54 = vpop.eup %1489 }
 0x829   :  { %v1067_v56 = vadd.f32 1.0, %v1490_v54 }
 0x82a   :  { %1491 = vrcp.f32 %v1066_v53 }
 0x82b   :  { %1493 = vrcp.f32 %v1067_v56 }
 0x834   :  { %v1492_v59 = vpop.eup %1491 }
 0x835   :  { %v1073_v60 = vmul.f32 %v1492_v59, %v1072_v58  ;;  %v1494_v62 = vpop.eup %1493 }
 0x836   :  { %v1076_v9 = vsub.f32 1.0, %v1494_v62  ;;  %v1078_v12 = vmul.f32 %v1494_v62, %v967_v11 }
 0x837   :  { %v1074_v61 = vadd.f32 %v1073_v60, %v975_v57 }
 0x839   :  { %1495 = vtanh.f32 %v1074_v61 }
 0x843   :  { %v1496_v2 = vpop.eup %1495 }
 0x844   :  { %v1077_v63 = vmul.f32 %v1496_v2, %v1076_v9 }
 0x846   :  { %v1079_v25 = vadd.f32 %v1078_v12, %v1077_v63 }
 0x848   :  { %1148 = vst [vmem:[%s2075_s3 + $0x38] sm:$0xff] %v1079_v25 }

// kernel: gru_encoder_forward.3
= control target key start
LH: loop header
LB: loop body
LE: loop exit
PB: predicated region body
PF: predicated region fallthrough
CT: control target
= control target key end

     0   :  { %v1483_v1 = vmov 0.0   ;;  %v1484_v2 = vmov 0   ;;  %vm1485_vm0 = vmmov 0   ;;  %v1486_v25 = vmov 0.0|0.0   ;;  %s2015_s1 = inlined_call_operand.vmem [shape: bf16[128,384], index: 1, kind: input, shape index: {}]   ;;  %s2016_s0 = inlined_call_operand.vmem [shape: bf16[8,8,384], index: 0, kind: input, shape index: {}]   ;;  %s2017_s2 = inlined_call_operand.vmem [shape: f32[1,128], index: 2, kind: input, shape index: {}]   ;;  %s2018_s3 = inlined_call_operand.vmem [shape: f32[8,128], index: 3, kind: output, shape index: {}]  }
   0x1   :  { %v1510_v0 = vld [vmem:[%s2015_s1 + $0x4] ss:$12 sps:$4 sm:$0xff]   ;;  %1200 = vmatprep.subr.bf16.mxu1 %v1483_v1  ;;  %226 = vmatprep.mubr.bf16.mxu0 %v1484_v2  ;;  %v1517_v3 = vld [vmem:[%s2015_s1] ss:$12 sps:$4 sm:$0xff]   ;;  %v1525_v4 = vld [vmem:[%s2015_s1 + $0x1c] ss:$12 sps:$4 sm:$0xff]  }
   0x2   :  { %1216 = vmatprep.mubr.msk.bf16.mxu1 %vm1485_vm0, %v1483_v1  ;;  %194 = vmatprep.subr.bf16.mxu0 %v1510_v0  ;;  %v1531_v5 = vld [vmem:[%s2015_s1 + $0x18] ss:$12 sps:$4 sm:$0xff]   ;;  %v1537_v6 = vld [vmem:[%s2015_s1 + $0x34] ss:$12 sps:$4 sm:$0xff]   ;;  %v1543_v7 = vld [vmem:[%s2015_s1 + $0x30] ss:$12 sps:$4 sm:$0xff]  }
   0x3   :  { %195 = vmatpush1.bf16.msra.mxu0 %v1517_v3  ;;  %v1549_v8 = vld [vmem:[%s2015_s1 + $0x4c] ss:$12 sps:$4 sm:$0xff]   ;;  %v1554_v9 = vld [vmem:[%s2015_s1 + $0x8] ss:$12 sps:$4 sm:$0xff]   ;;  %v1567_v11 = vld [vmem:[%s2015_s1 + $0x64] ss:$12 sps:$4 sm:$0xff]  }
   0x4   :  { %196 = vmatprep.subr.bf16.mxu0 %v1525_v4  ;;  %v1560_v10 = vld [vmem:[%s2015_s1 + $0x48] ss:$12 sps:$4 sm:$0xff]   ;;  %1201 = vmatpush3.bf16.msra.mxu1 %v1554_v9  ;;  %v1573_v12 = vld [vmem:[%s2015_s1 + $0x20] ss:$12 sps:$4 sm:$0xff]   ;;  %v1585_v14 = vld [vmem:[%s2015_s1 + $0x38] ss:$12 sps:$4 sm:$0xff]  }
   0x5   :  { %1202 = vmatprep.subr.bf16.mxu1 %v1483_v1  ;;  %v1578_v13 = vld [vmem:[%s2015_s1 + $0x60] ss:$12 sps:$4 sm:$0xff]   ;;  %v1591_v15 = vld [vmem:[%s2015_s1 + $0x7c] ss:$12 sps:$4 sm:$0xff]   ;;  %v1598_v16 = vld [vmem:[%s2015_s1 + $0x78] ss:$12 sps:$4 sm:$0xff]  }
   0x6   :  { %v1604_v17 = vld [vmem:[%s2015_s1 + $0x50] ss:$12 sps:$4 sm:$0xff]   ;;  %v1610_v18 = vld [vmem:[%s2015_s1 + $0x94] ss:$12 sps:$4 sm:$0xff]   ;;  %v1629_v21 = vld [vmem:[%s2015_s1 + $0xac] ss:$12 sps:$4 sm:$0xff]  }
   0x7   :  { %197 = vmatpush1.bf16.msra.mxu0 %v1531_v5  ;;  %v1617_v19 = vld [vmem:[%s2015_s1 + $0x90] ss:$12 sps:$4 sm:$0xff]   ;;  %v1623_v20 = vld [vmem:[%s2015_s1 + $0x68] ss:$12 sps:$4 sm:$0xff]   ;;  %v1642_v23 = vld [vmem:[%s2015_s1 + $0x80] ss:$12 sps:$4 sm:$0xff]  }
   0x8   :  { %198 = vmatprep.subr.bf16.mxu0 %v1537_v6  ;;  %1203 = vmatpush3.bf16.msra.mxu1 %v1573_v12  ;;  %v1636_v22 = vld [vmem:[%s2015_s1 + $0xa8] ss:$12 sps:$4 sm:$0xff]   ;;  %v1651_v24 = vld [vmem:[%s2015_s1 + $0x98] ss:$12 sps:$4 sm:$0xff]   ;;  %v1659_v26 = vld [vmem:[%s2015_s1 + $0xb0] ss:$12 sps:$4 sm:$0xff]  }
   0x9   :  { %1204 = vmatprep.subr.bf16.mxu1 %v1483_v1  ;;  %v60_v27 = vld [vmem:[%s2016_s0] sm:$0xff]  ;;  %v1710_v46 = vld [vmem:[%s2016_s0 + $0x8] ss:$12 sps:$4 sm:$0xff]   ;;  %v1100_v60 = vld [vmem:[%s2016_s0 + $0xc] sm:$0xff] }
   0xa   :  { %v62_v28 = vunpack.c.l.bf16 %v60_v27  ;;  %v63_v30 = vunpack.c.h.bf16 %v60_v27  ;;  %v1705_v45 = vld [vmem:[%s2017_s2] ss:$0 sm:$0xff]  ;;  %v64_v49 = vunpack.c.l.bf16 %v1710_v46  ;;  %v300_v61 = vunpack.c.l.bf16 %v1100_v60 }
   0xb   :  { %199 = vmatpush1.bf16.msra.mxu0 %v1543_v7 }
   0xc   :  { %200 = vmatprep.subr.bf16.mxu0 %v1549_v8  ;;  %1205 = vmatpush3.bf16.msra.mxu1 %v1585_v14 }
   0xd   :  { %1206 = vmatprep.subr.bf16.mxu1 %v1483_v1 }
   0xf   :  { %201 = vmatpush1.bf16.msra.mxu0 %v1560_v10 }
  0x10   :  { %202 = vmatprep.subr.bf16.mxu0 %v1567_v11  ;;  %1207 = vmatpush3.bf16.msra.mxu1 %v1604_v17 }
  0x11   :  { %1208 = vmatprep.subr.bf16.mxu1 %v1483_v1 }
  0x13   :  { %203 = vmatpush1.bf16.msra.mxu0 %v1578_v13 }
  0x14   :  { %204 = vmatprep.subr.bf16.mxu0 %v1591_v15  ;;  %1209 = vmatpush3.bf16.msra.mxu1 %v1623_v20 }
  0x15   :  { %1210 = vmatprep.subr.bf16.mxu1 %v1483_v1 }
  0x17   :  { %205 = vmatpush1.bf16.msra.mxu0 %v1598_v16 }
  0x18   :  { %206 = vmatprep.subr.bf16.mxu0 %v1610_v18  ;;  %1211 = vmatpush3.bf16.msra.mxu1 %v1642_v23 }
  0x19   :  { %1212 = vmatprep.subr.bf16.mxu1 %v1483_v1 }
  0x1b   :  { %207 = vmatpush1.bf16.msra.mxu0 %v1617_v19 }
  0x1c   :  { %208 = vmatprep.subr.bf16.mxu0 %v1629_v21  ;;  %1213 = vmatpush3.bf16.msra.mxu1 %v1651_v24 }
  0x1d   :  { %1214 = vmatprep.subr.bf16.mxu1 %v1483_v1 }
  0x1f   :  { %209 = vmatpush1.bf16.msra.mxu0 %v1636_v22 }
  0x20   :  { %304 = vmatprep.subr.bf16.mxu0 %v1510_v0  ;;  %1215 = vmatpush3.bf16.msra.mxu1 %v1659_v26 }
  0x21   :  { %1220 = vmatprep.subr.bf16.mxu1 %v1483_v1 }
  0x22   :  { %227 = vmatmul.mubr.bf16.vlgmr.msra.gmra.mrb[0].mxu0 %v1486_v25 }
  0x23   :  { %305 = vmatpush1.bf16.msra.mxu0 %v1517_v3  ;;  %336 = vmatprep.mubr.bf16.mxu0 %v1484_v2 }
  0x24   :  { %306 = vmatprep.subr.bf16.mxu0 %v1525_v4  ;;  %1217 = vmatmul.mubr.bf16.vlgmr.msra.gmra.mrb[0].mxu1 %v1486_v25  ;;  %v301_v25 = vunpack.c.h.bf16 %v1100_v60 }
  0x25   :  { %1221 = vmatpush3.bf16.msra.mxu1 %v1554_v9  ;;  %1236 = vmatprep.mubr.msk.bf16.mxu1 %vm1485_vm0, %v1483_v1 }
  0x26   :  { %1222 = vmatprep.subr.bf16.mxu1 %v1483_v1 }
  0x27   :  { %307 = vmatpush1.bf16.msra.mxu0 %v1531_v5 }
  0x28   :  { %308 = vmatprep.subr.bf16.mxu0 %v1537_v6 }
  0x29   :  { %1223 = vmatpush3.bf16.msra.mxu1 %v1573_v12 }
  0x2a   :  { %1224 = vmatprep.subr.bf16.mxu1 %v1483_v1 }
  0x2b   :  { %309 = vmatpush1.bf16.msra.mxu0 %v1543_v7 }
  0x2c   :  { %310 = vmatprep.subr.bf16.mxu0 %v1549_v8 }
  0x2d   :  { %1225 = vmatpush3.bf16.msra.mxu1 %v1585_v14 }
  0x2e   :  { %1226 = vmatprep.subr.bf16.mxu1 %v1483_v1 }
  0x2f   :  { %311 = vmatpush1.bf16.msra.mxu0 %v1560_v10 }
  0x30   :  { %312 = vmatprep.subr.bf16.mxu0 %v1567_v11 }
  0x31   :  { %1227 = vmatpush3.bf16.msra.mxu1 %v1604_v17 }
  0x32   :  { %1228 = vmatprep.subr.bf16.mxu1 %v1483_v1 }
  0x33   :  { %313 = vmatpush1.bf16.msra.mxu0 %v1578_v13 }
  0x34   :  { %314 = vmatprep.subr.bf16.mxu0 %v1591_v15 }
  0x35   :  { %1229 = vmatpush3.bf16.msra.mxu1 %v1623_v20 }
  0x36   :  { %1230 = vmatprep.subr.bf16.mxu1 %v1483_v1 }
  0x37   :  { %315 = vmatpush1.bf16.msra.mxu0 %v1598_v16 }
  0x38   :  { %316 = vmatprep.subr.bf16.mxu0 %v1610_v18 }
  0x39   :  { %1231 = vmatpush3.bf16.msra.mxu1 %v1642_v23 }
  0x3a   :  { %1232 = vmatprep.subr.bf16.mxu1 %v1483_v1 }
  0x3b   :  { %317 = vmatpush1.bf16.msra.mxu0 %v1617_v19 }
  0x3c   :  { %318 = vmatprep.subr.bf16.mxu0 %v1629_v21 }
  0x3d   :  { %1233 = vmatpush3.bf16.msra.mxu1 %v1651_v24 }
  0x3e   :  { %1234 = vmatprep.subr.bf16.mxu1 %v1483_v1 }
  0x3f   :  { %319 = vmatpush1.bf16.msra.mxu0 %v1636_v22 }
  0x40   :  { %414 = vmatprep.subr.bf16.mxu0 %v1510_v0 }
  0x41   :  { %1235 = vmatpush3.bf16.msra.mxu1 %v1659_v26 }
  0x42   :  { %1240 = vmatprep.subr.bf16.mxu1 %v1483_v1 }
  0xf5   :  { %v228_v29 = vpop.f32.mrb[0].mxu0 }
  0xf6   :  { %v275_v31 = vadd.f32 %v228_v29, %v62_v28  ;;  %v230_v32 = vpop.f32.mrb[1].mxu0 }
  0xf7   :  { %v232_v33 = vpop.f32.mrb[2].mxu0  ;;  %v276_v36 = vadd.f32 %v230_v32, %v63_v30  ;;  %v269_v38 = vpop.f32.mrb[0].mxu1 }
  0xf8   :  { %v1098_v34 = vmul.f32 -1.442695, %v275_v31  ;;  %v233_v35 = vpop.f32.mrb[3].mxu0  ;;  %v1218_v39 = vpop.f32.mrb[1].mxu1  ;;  %v289_v48 = vadd.f32 %v1705_v45, %v269_v38 }
  0xf9   :  { %v1099_v37 = vmul.f32 -1.442695, %v276_v36  ;;  %v272_v40 = vpop.f32.mrb[2].mxu1 }
  0xfa   :  { %1396 = vpow2.f32 %v1098_v34  ;;  %v1219_v41 = vpop.f32.mrb[3].mxu1 }
  0xfb   :  { %1398 = vpow2.f32 %v1099_v37  ;;  %v302_v41 = vunpack.c.h.bf16 %v1710_v46  ;;  %v1104_v46 = vld [vmem:[%s2016_s0 + $0x18] sm:$0xff] }
 0x104   :  { %v1397_v42 = vpop.eup %1396 }
 0x105   :  { %v283_v43 = vadd.f32 1.0, %v1397_v42  ;;  %v1399_v44 = vpop.eup %1398 }
 0x106   :  { %v284_v47 = vadd.f32 1.0, %v1399_v44 }
 0x107   :  { %1400 = vrcp.f32 %v283_v43 }
 0x108   :  { %1402 = vrcp.f32 %v284_v47 }
 0x111   :  { %v1401_v50 = vpop.eup %1400 }
 0x112   :  { %v290_v51 = vmul.f32 %v1401_v50, %v289_v48  ;;  %v1403_v53 = vpop.eup %1402 }
 0x113   :  { %v293_v54 = vsub.f32 1.0, %v1403_v53  ;;  %v295_v57 = vmul.f32 0.0, %v1403_v53 }
 0x114   :  { %v291_v52 = vadd.f32 %v290_v51, %v64_v49 }
 0x116   :  { %1404 = vtanh.f32 %v291_v52 }
 0x120   :  { %v1405_v55 = vpop.eup %1404 }
 0x121   :  { %v294_v56 = vmul.f32 %v1405_v55, %v293_v54  ;;  %v410_v55 = vunpack.c.l.bf16 %v1104_v46 }
 0x123   :  { %v1714_v58 = vadd.f32 %v295_v57, %v294_v56 }
 0x125   :  { %v303_v59 = vpack.c.bf16 %v1714_v58, %v1714_v58 }
 0x127   :  { %337 = vmatmul.mubr.bf16.vlgmr.msra.gmra.mrb[4].mxu0 %v303_v59  ;;  %1237 = vmatmul.mubr.bf16.vlgmr.msra.gmra.mrb[4].mxu1 %v303_v59 }
 0x128   :  { %415 = vmatpush1.bf16.msra.mxu0 %v1517_v3  ;;  %1241 = vmatpush3.bf16.msra.mxu1 %v1554_v9 }
 0x129   :  { %416 = vmatprep.subr.bf16.mxu0 %v1525_v4  ;;  %1242 = vmatprep.subr.bf16.mxu1 %v1483_v1 }
 0x12a   :  { %446 = vmatprep.mubr.bf16.mxu0 %v1484_v2  ;;  %1256 = vmatprep.mubr.msk.bf16.mxu1 %vm1485_vm0, %v1483_v1 }
 0x12c   :  { %417 = vmatpush1.bf16.msra.mxu0 %v1531_v5  ;;  %1243 = vmatpush3.bf16.msra.mxu1 %v1573_v12 }
 0x12d   :  { %418 = vmatprep.subr.bf16.mxu0 %v1537_v6  ;;  %1244 = vmatprep.subr.bf16.mxu1 %v1483_v1 }
 0x130   :  { %419 = vmatpush1.bf16.msra.mxu0 %v1543_v7  ;;  %1245 = vmatpush3.bf16.msra.mxu1 %v1585_v14 }
 0x131   :  { %420 = vmatprep.subr.bf16.mxu0 %v1549_v8  ;;  %1246 = vmatprep.subr.bf16.mxu1 %v1483_v1 }
 0x134   :  { %421 = vmatpush1.bf16.msra.mxu0 %v1560_v10  ;;  %1247 = vmatpush3.bf16.msra.mxu1 %v1604_v17 }
 0x135   :  { %422 = vmatprep.subr.bf16.mxu0 %v1567_v11  ;;  %1248 = vmatprep.subr.bf16.mxu1 %v1483_v1 }
 0x138   :  { %423 = vmatpush1.bf16.msra.mxu0 %v1578_v13  ;;  %1249 = vmatpush3.bf16.msra.mxu1 %v1623_v20 }
 0x139   :  { %424 = vmatprep.subr.bf16.mxu0 %v1591_v15  ;;  %1250 = vmatprep.subr.bf16.mxu1 %v1483_v1 }
 0x13c   :  { %425 = vmatpush1.bf16.msra.mxu0 %v1598_v16  ;;  %1251 = vmatpush3.bf16.msra.mxu1 %v1642_v23 }
 0x13d   :  { %426 = vmatprep.subr.bf16.mxu0 %v1610_v18  ;;  %1252 = vmatprep.subr.bf16.mxu1 %v1483_v1 }
 0x140   :  { %427 = vmatpush1.bf16.msra.mxu0 %v1617_v19  ;;  %1253 = vmatpush3.bf16.msra.mxu1 %v1651_v24 }
 0x141   :  { %428 = vmatprep.subr.bf16.mxu0 %v1629_v21  ;;  %1254 = vmatprep.subr.bf16.mxu1 %v1483_v1 }
 0x144   :  { %429 = vmatpush1.bf16.msra.mxu0 %v1636_v22  ;;  %1255 = vmatpush3.bf16.msra.mxu1 %v1659_v26 }
 0x145   :  { %524 = vmatprep.subr.bf16.mxu0 %v1510_v0  ;;  %1260 = vmatprep.subr.bf16.mxu1 %v1483_v1 }
 0x1fa   :  { %v338_v62 = vpop.f32.mrb[4].mxu0  ;;  %v379_v63 = vpop.f32.mrb[4].mxu1 }
 0x1fb   :  { %v385_v27 = vadd.f32 %v338_v62, %v300_v61  ;;  %v340_v28 = vpop.f32.mrb[5].mxu0  ;;  %v1238_v29 = vpop.f32.mrb[5].mxu1  ;;  %v399_v42 = vadd.f32 %v1705_v45, %v379_v63 }
 0x1fc   :  { %v342_v30 = vpop.f32.mrb[6].mxu0  ;;  %v382_v31 = vpop.f32.mrb[6].mxu1  ;;  %v386_v35 = vadd.f32 %v340_v28, %v301_v25 }
 0x1fd   :  { %v1102_v32 = vmul.f32 -1.442695, %v385_v27  ;;  %v343_v33 = vpop.f32.mrb[7].mxu0  ;;  %v1239_v34 = vpop.f32.mrb[7].mxu1 }
 0x1fe   :  { %v1103_v36 = vmul.f32 -1.442695, %v386_v35  ;;  %v1804_v34 = vld [vmem:[%s2016_s0 + $0x20] ss:$12 sps:$4 sm:$0xff]  }
 0x1ff   :  { %1406 = vpow2.f32 %v1102_v32 }
 0x200   :  { %1408 = vpow2.f32 %v1103_v36  ;;  %v412_v36 = vunpack.c.l.bf16 %v1804_v34 }
 0x209   :  { %v1407_v37 = vpop.eup %1406 }
 0x20a   :  { %v393_v38 = vadd.f32 1.0, %v1407_v37  ;;  %v1409_v39 = vpop.eup %1408 }
 0x20b   :  { %v394_v40 = vadd.f32 1.0, %v1409_v39 }
 0x20c   :  { %1410 = vrcp.f32 %v393_v38 }
 0x20d   :  { %1412 = vrcp.f32 %v394_v40 }
 0x216   :  { %v1411_v43 = vpop.eup %1410 }
 0x217   :  { %v400_v44 = vmul.f32 %v1411_v43, %v399_v42  ;;  %v1413_v48 = vpop.eup %1412 }
 0x218   :  { %v403_v49 = vsub.f32 1.0, %v1413_v48  ;;  %v405_v52 = vmul.f32 %v1413_v48, %v1714_v58  ;;  %v411_v58 = vunpack.c.h.bf16 %v1104_v46 }
 0x219   :  { %v401_v47 = vadd.f32 %v400_v44, %v302_v41 }
 0x21b   :  { %1414 = vtanh.f32 %v401_v47 }
 0x225   :  { %v1415_v50 = vpop.eup %1414 }
 0x226   :  { %v404_v51 = vmul.f32 %v1415_v50, %v403_v49  ;;  %v1108_v50 = vld [vmem:[%s2016_s0 + $0x24] sm:$0xff] }
 0x228   :  { %v1759_v53 = vadd.f32 %v405_v52, %v404_v51  ;;  %v520_v51 = vunpack.c.l.bf16 %v1108_v50 }
 0x22a   :  { %v413_v54 = vpack.c.bf16 %v1759_v53, %v1759_v53 }
 0x22c   :  { %447 = vmatmul.mubr.bf16.vlgmr.msra.gmra.mrb[8].mxu0 %v413_v54  ;;  %1257 = vmatmul.mubr.bf16.vlgmr.msra.gmra.mrb[8].mxu1 %v413_v54  ;;  %v521_v54 = vunpack.c.h.bf16 %v1108_v50 }
 0x22d   :  { %525 = vmatpush1.bf16.msra.mxu0 %v1517_v3  ;;  %1261 = vmatpush3.bf16.msra.mxu1 %v1554_v9 }
 0x22e   :  { %526 = vmatprep.subr.bf16.mxu0 %v1525_v4  ;;  %1262 = vmatprep.subr.bf16.mxu1 %v1483_v1 }
 0x22f   :  { %556 = vmatprep.mubr.bf16.mxu0 %v1484_v2  ;;  %1276 = vmatprep.mubr.msk.bf16.mxu1 %vm1485_vm0, %v1483_v1 }
 0x231   :  { %527 = vmatpush1.bf16.msra.mxu0 %v1531_v5  ;;  %1263 = vmatpush3.bf16.msra.mxu1 %v1573_v12 }
 0x232   :  { %528 = vmatprep.subr.bf16.mxu0 %v1537_v6  ;;  %1264 = vmatprep.subr.bf16.mxu1 %v1483_v1 }
 0x235   :  { %529 = vmatpush1.bf16.msra.mxu0 %v1543_v7  ;;  %1265 = vmatpush3.bf16.msra.mxu1 %v1585_v14 }
 0x236   :  { %530 = vmatprep.subr.bf16.mxu0 %v1549_v8  ;;  %1266 = vmatprep.subr.bf16.mxu1 %v1483_v1 }
 0x239   :  { %531 = vmatpush1.bf16.msra.mxu0 %v1560_v10  ;;  %1267 = vmatpush3.bf16.msra.mxu1 %v1604_v17 }
 0x23a   :  { %532 = vmatprep.subr.bf16.mxu0 %v1567_v11  ;;  %1268 = vmatprep.subr.bf16.mxu1 %v1483_v1 }
 0x23d   :  { %533 = vmatpush1.bf16.msra.mxu0 %v1578_v13  ;;  %1269 = vmatpush3.bf16.msra.mxu1 %v1623_v20 }
 0x23e   :  { %534 = vmatprep.subr.bf16.mxu0 %v1591_v15  ;;  %1270 = vmatprep.subr.bf16.mxu1 %v1483_v1 }
 0x241   :  { %535 = vmatpush1.bf16.msra.mxu0 %v1598_v16  ;;  %1271 = vmatpush3.bf16.msra.mxu1 %v1642_v23 }
 0x242   :  { %536 = vmatprep.subr.bf16.mxu0 %v1610_v18  ;;  %1272 = vmatprep.subr.bf16.mxu1 %v1483_v1 }
 0x245   :  { %537 = vmatpush1.bf16.msra.mxu0 %v1617_v19  ;;  %1273 = vmatpush3.bf16.msra.mxu1 %v1651_v24 }
 0x246   :  { %538 = vmatprep.subr.bf16.mxu0 %v1629_v21  ;;  %1274 = vmatprep.subr.bf16.mxu1 %v1483_v1 }
 0x249   :  { %539 = vmatpush1.bf16.msra.mxu0 %v1636_v22  ;;  %1275 = vmatpush3.bf16.msra.mxu1 %v1659_v26 }
 0x24a   :  { %634 = vmatprep.subr.bf16.mxu0 %v1510_v0  ;;  %1280 = vmatprep.subr.bf16.mxu1 %v1483_v1 }
 0x2ff   :  { %v448_v56 = vpop.f32.mrb[8].mxu0  ;;  %v489_v57 = vpop.f32.mrb[8].mxu1 }
 0x300   :  { %v495_v59 = vadd.f32 %v448_v56, %v410_v55  ;;  %v450_v60 = vpop.f32.mrb[9].mxu0  ;;  %v1258_v61 = vpop.f32.mrb[9].mxu1  ;;  %v509_v37 = vadd.f32 %v1705_v45, %v489_v57 }
 0x301   :  { %v452_v62 = vpop.f32.mrb[10].mxu0  ;;  %v492_v63 = vpop.f32.mrb[10].mxu1  ;;  %v496_v29 = vadd.f32 %v450_v60, %v411_v58 }
 0x302   :  { %v1106_v25 = vmul.f32 -1.442695, %v495_v59  ;;  %v453_v27 = vpop.f32.mrb[11].mxu0  ;;  %v1259_v28 = vpop.f32.mrb[11].mxu1 }
 0x303   :  { %v1107_v30 = vmul.f32 -1.442695, %v496_v29 }
 0x304   :  { %1416 = vpow2.f32 %v1106_v25 }
 0x305   :  { %1418 = vpow2.f32 %v1107_v30  ;;  %v522_v30 = vunpack.c.h.bf16 %v1804_v34  ;;  %v1112_v34 = vld [vmem:[%s2016_s0 + $0x30] sm:$0xff] }
 0x30e   :  { %v1417_v31 = vpop.eup %1416 }
 0x30f   :  { %v503_v32 = vadd.f32 1.0, %v1417_v31  ;;  %v1419_v33 = vpop.eup %1418 }
 0x310   :  { %v504_v35 = vadd.f32 1.0, %v1419_v33 }
 0x311   :  { %1420 = vrcp.f32 %v503_v32 }
 0x312   :  { %1422 = vrcp.f32 %v504_v35 }
 0x31b   :  { %v1421_v38 = vpop.eup %1420 }
 0x31c   :  { %v510_v39 = vmul.f32 %v1421_v38, %v509_v37  ;;  %v1423_v41 = vpop.eup %1422 }
 0x31d   :  { %v513_v42 = vsub.f32 1.0, %v1423_v41  ;;  %v515_v47 = vmul.f32 %v1423_v41, %v1759_v53 }
 0x31e   :  { %v511_v40 = vadd.f32 %v510_v39, %v412_v36 }
 0x320   :  { %1424 = vtanh.f32 %v511_v40 }
 0x32a   :  { %v1425_v43 = vpop.eup %1424 }
 0x32b   :  { %v514_v44 = vmul.f32 %v1425_v43, %v513_v42  ;;  %v630_v43 = vunpack.c.l.bf16 %v1112_v34 }
 0x32d   :  { %v1809_v48 = vadd.f32 %v515_v47, %v514_v44 }
 0x32f   :  { %v523_v49 = vpack.c.bf16 %v1809_v48, %v1809_v48 }
 0x331   :  { %557 = vmatmul.mubr.bf16.vlgmr.msra.gmra.mrb[12].mxu0 %v523_v49  ;;  %1277 = vmatmul.mubr.bf16.vlgmr.msra.gmra.mrb[12].mxu1 %v523_v49 }
 0x332   :  { %635 = vmatpush1.bf16.msra.mxu0 %v1517_v3  ;;  %1281 = vmatpush3.bf16.msra.mxu1 %v1554_v9 }
 0x333   :  { %636 = vmatprep.subr.bf16.mxu0 %v1525_v4  ;;  %1282 = vmatprep.subr.bf16.mxu1 %v1483_v1 }
 0x334   :  { %666 = vmatprep.mubr.bf16.mxu0 %v1484_v2  ;;  %1296 = vmatprep.mubr.msk.bf16.mxu1 %vm1485_vm0, %v1483_v1 }
 0x336   :  { %637 = vmatpush1.bf16.msra.mxu0 %v1531_v5  ;;  %1283 = vmatpush3.bf16.msra.mxu1 %v1573_v12 }
 0x337   :  { %638 = vmatprep.subr.bf16.mxu0 %v1537_v6  ;;  %1284 = vmatprep.subr.bf16.mxu1 %v1483_v1 }
 0x33a   :  { %639 = vmatpush1.bf16.msra.mxu0 %v1543_v7  ;;  %1285 = vmatpush3.bf16.msra.mxu1 %v1585_v14 }
 0x33b   :  { %640 = vmatprep.subr.bf16.mxu0 %v1549_v8  ;;  %1286 = vmatprep.subr.bf16.mxu1 %v1483_v1 }
 0x33e   :  { %641 = vmatpush1.bf16.msra.mxu0 %v1560_v10  ;;  %1287 = vmatpush3.bf16.msra.mxu1 %v1604_v17 }
 0x33f   :  { %642 = vmatprep.subr.bf16.mxu0 %v1567_v11  ;;  %1288 = vmatprep.subr.bf16.mxu1 %v1483_v1 }
 0x342   :  { %643 = vmatpush1.bf16.msra.mxu0 %v1578_v13  ;;  %1289 = vmatpush3.bf16.msra.mxu1 %v1623_v20 }
 0x343   :  { %644 = vmatprep.subr.bf16.mxu0 %v1591_v15  ;;  %1290 = vmatprep.subr.bf16.mxu1 %v1483_v1 }
 0x346   :  { %645 = vmatpush1.bf16.msra.mxu0 %v1598_v16  ;;  %1291 = vmatpush3.bf16.msra.mxu1 %v1642_v23 }
 0x347   :  { %646 = vmatprep.subr.bf16.mxu0 %v1610_v18  ;;  %1292 = vmatprep.subr.bf16.mxu1 %v1483_v1 }
 0x34a   :  { %647 = vmatpush1.bf16.msra.mxu0 %v1617_v19  ;;  %1293 = vmatpush3.bf16.msra.mxu1 %v1651_v24 }
 0x34b   :  { %648 = vmatprep.subr.bf16.mxu0 %v1629_v21  ;;  %1294 = vmatprep.subr.bf16.mxu1 %v1483_v1 }
 0x34e   :  { %649 = vmatpush1.bf16.msra.mxu0 %v1636_v22  ;;  %1295 = vmatpush3.bf16.msra.mxu1 %v1659_v26 }
 0x34f   :  { %744 = vmatprep.subr.bf16.mxu0 %v1510_v0  ;;  %1300 = vmatprep.subr.bf16.mxu1 %v1483_v1 }
 0x404   :  { %v558_v52 = vpop.f32.mrb[12].mxu0  ;;  %v599_v53 = vpop.f32.mrb[12].mxu1 }
 0x405   :  { %v605_v46 = vadd.f32 %v558_v52, %v520_v51  ;;  %v560_v55 = vpop.f32.mrb[13].mxu0  ;;  %v1278_v56 = vpop.f32.mrb[13].mxu1  ;;  %v619_v31 = vadd.f32 %v1705_v45, %v599_v53 }
 0x406   :  { %v562_v57 = vpop.f32.mrb[14].mxu0  ;;  %v602_v58 = vpop.f32.mrb[14].mxu1  ;;  %v606_v62 = vadd.f32 %v560_v55, %v521_v54 }
 0x407   :  { %v1110_v59 = vmul.f32 -1.442695, %v605_v46  ;;  %v563_v60 = vpop.f32.mrb[15].mxu0  ;;  %v1279_v61 = vpop.f32.mrb[15].mxu1 }
 0x408   :  { %v1111_v63 = vmul.f32 -1.442695, %v606_v62  ;;  %v1899_v61 = vld [vmem:[%s2016_s0 + $0x38] ss:$12 sps:$4 sm:$0xff]  }
 0x409   :  { %1426 = vpow2.f32 %v1110_v59 }
 0x40a   :  { %1428 = vpow2.f32 %v1111_v63  ;;  %v632_v63 = vunpack.c.l.bf16 %v1899_v61 }
 0x413   :  { %v1427_v25 = vpop.eup %1426 }
 0x414   :  { %v613_v27 = vadd.f32 1.0, %v1427_v25  ;;  %v1429_v28 = vpop.eup %1428 }
 0x415   :  { %v614_v29 = vadd.f32 1.0, %v1429_v28 }
 0x416   :  { %1430 = vrcp.f32 %v613_v27 }
 0x417   :  { %1432 = vrcp.f32 %v614_v29 }
 0x420   :  { %v1431_v32 = vpop.eup %1430 }
 0x421   :  { %v620_v33 = vmul.f32 %v1431_v32, %v619_v31  ;;  %v1433_v36 = vpop.eup %1432 }
 0x422   :  { %v623_v37 = vsub.f32 1.0, %v1433_v36  ;;  %v625_v40 = vmul.f32 %v1433_v36, %v1809_v48  ;;  %v631_v48 = vunpack.c.h.bf16 %v1112_v34 }
 0x423   :  { %v621_v35 = vadd.f32 %v620_v33, %v522_v30 }
 0x425   :  { %1434 = vtanh.f32 %v621_v35 }
 0x42f   :  { %v1435_v38 = vpop.eup %1434 }
 0x430   :  { %v624_v39 = vmul.f32 %v1435_v38, %v623_v37 }
 0x432   :  { %v1854_v41 = vadd.f32 %v625_v40, %v624_v39 }
 0x434   :  { %v633_v42 = vpack.c.bf16 %v1854_v41, %v1854_v41 }
 0x436   :  { %667 = vmatmul.mubr.bf16.vlgmr.msra.gmra.mrb[16].mxu0 %v633_v42  ;;  %1297 = vmatmul.mubr.bf16.vlgmr.msra.gmra.mrb[16].mxu1 %v633_v42 }
 0x437   :  { %745 = vmatpush1.bf16.msra.mxu0 %v1517_v3  ;;  %1301 = vmatpush3.bf16.msra.mxu1 %v1554_v9 }
 0x438   :  { %746 = vmatprep.subr.bf16.mxu0 %v1525_v4  ;;  %1302 = vmatprep.subr.bf16.mxu1 %v1483_v1 }
 0x439   :  { %776 = vmatprep.mubr.bf16.mxu0 %v1484_v2  ;;  %1316 = vmatprep.mubr.msk.bf16.mxu1 %vm1485_vm0, %v1483_v1 }
 0x43b   :  { %747 = vmatpush1.bf16.msra.mxu0 %v1531_v5  ;;  %1303 = vmatpush3.bf16.msra.mxu1 %v1573_v12 }
 0x43c   :  { %748 = vmatprep.subr.bf16.mxu0 %v1537_v6  ;;  %1304 = vmatprep.subr.bf16.mxu1 %v1483_v1 }
 0x43f   :  { %749 = vmatpush1.bf16.msra.mxu0 %v1543_v7  ;;  %1305 = vmatpush3.bf16.msra.mxu1 %v1585_v14 }
 0x440   :  { %750 = vmatprep.subr.bf16.mxu0 %v1549_v8  ;;  %1306 = vmatprep.subr.bf16.mxu1 %v1483_v1 }
 0x443   :  { %751 = vmatpush1.bf16.msra.mxu0 %v1560_v10  ;;  %1307 = vmatpush3.bf16.msra.mxu1 %v1604_v17 }
 0x444   :  { %752 = vmatprep.subr.bf16.mxu0 %v1567_v11  ;;  %1308 = vmatprep.subr.bf16.mxu1 %v1483_v1 }
 0x447   :  { %753 = vmatpush1.bf16.msra.mxu0 %v1578_v13  ;;  %1309 = vmatpush3.bf16.msra.mxu1 %v1623_v20 }
 0x448   :  { %754 = vmatprep.subr.bf16.mxu0 %v1591_v15  ;;  %1310 = vmatprep.subr.bf16.mxu1 %v1483_v1 }
 0x44b   :  { %755 = vmatpush1.bf16.msra.mxu0 %v1598_v16  ;;  %1311 = vmatpush3.bf16.msra.mxu1 %v1642_v23 }
 0x44c   :  { %756 = vmatprep.subr.bf16.mxu0 %v1610_v18  ;;  %1312 = vmatprep.subr.bf16.mxu1 %v1483_v1 }
 0x44f   :  { %757 = vmatpush1.bf16.msra.mxu0 %v1617_v19  ;;  %1313 = vmatpush3.bf16.msra.mxu1 %v1651_v24 }
 0x450   :  { %758 = vmatprep.subr.bf16.mxu0 %v1629_v21  ;;  %1314 = vmatprep.subr.bf16.mxu1 %v1483_v1 }
 0x453   :  { %759 = vmatpush1.bf16.msra.mxu0 %v1636_v22  ;;  %1315 = vmatpush3.bf16.msra.mxu1 %v1659_v26 }
 0x454   :  { %854 = vmatprep.subr.bf16.mxu0 %v1510_v0  ;;  %1320 = vmatprep.subr.bf16.mxu1 %v1483_v1 }
 0x509   :  { %v668_v44 = vpop.f32.mrb[16].mxu0  ;;  %v709_v47 = vpop.f32.mrb[16].mxu1 }
 0x50a   :  { %v715_v49 = vadd.f32 %v668_v44, %v630_v43  ;;  %v670_v50 = vpop.f32.mrb[17].mxu0  ;;  %v1298_v51 = vpop.f32.mrb[17].mxu1  ;;  %v729_v25 = vadd.f32 %v1705_v45, %v709_v47 }
 0x50b   :  { %v672_v52 = vpop.f32.mrb[18].mxu0  ;;  %v712_v53 = vpop.f32.mrb[18].mxu1  ;;  %v716_v56 = vadd.f32 %v670_v50, %v631_v48  ;;  %v742_v50 = vunpack.c.h.bf16 %v1899_v61  ;;  %v1476_v61 = vld [vmem:[%s2015_s1] ss:$12 sps:$4 sm:$0xff]  }
 0x50c   :  { %v1114_v54 = vmul.f32 -1.442695, %v715_v49  ;;  %v673_v46 = vpop.f32.mrb[19].mxu0  ;;  %v1299_v55 = vpop.f32.mrb[19].mxu1 }
 0x50d   :  { %v1115_v57 = vmul.f32 -1.442695, %v716_v56 }
 0x50e   :  { %1436 = vpow2.f32 %v1114_v54 }
 0x50f   :  { %1438 = vpow2.f32 %v1115_v57 }
 0x518   :  { %v1437_v58 = vpop.eup %1436 }
 0x519   :  { %v723_v59 = vadd.f32 1.0, %v1437_v58  ;;  %v1439_v60 = vpop.eup %1438 }
 0x51a   :  { %v724_v62 = vadd.f32 1.0, %v1439_v60 }
 0x51b   :  { %1440 = vrcp.f32 %v723_v59 }
 0x51c   :  { %1442 = vrcp.f32 %v724_v62  ;;  %v1477_v62 = vld [vmem:[%s2015_s1 + $0x1c] ss:$12 sps:$4 sm:$0xff]  }
 0x525   :  { %v1441_v27 = vpop.eup %1440 }
 0x526   :  { %v730_v28 = vmul.f32 %v1441_v27, %v729_v25  ;;  %v1443_v30 = vpop.eup %1442  ;;  %v1481_v25 = vld [vmem:[%s2015_s1 + $0x4c] ss:$12 sps:$4 sm:$0xff]  }
 0x527   :  { %v733_v31 = vsub.f32 1.0, %v1443_v30  ;;  %v735_v35 = vmul.f32 %v1443_v30, %v1854_v41  ;;  %v1121_v30 = vld [vmem:[%s2016_s0 + $0x50] ss:$12 sps:$4 sm:$0xff]  }
 0x528   :  { %v731_v29 = vadd.f32 %v730_v28, %v632_v63  ;;  %v1478_v63 = vld [vmem:[%s2015_s1 + $0x18] ss:$12 sps:$4 sm:$0xff]  }
 0x52a   :  { %1444 = vtanh.f32 %v731_v29 }
 0x534   :  { %v1445_v32 = vpop.eup %1444 }
 0x535   :  { %v734_v33 = vmul.f32 %v1445_v32, %v733_v31  ;;  %v852_v32 = vunpack.c.l.bf16 %v1121_v30 }
 0x537   :  { %v1904_v36 = vadd.f32 %v735_v35, %v734_v33 }
 0x539   :  { %v743_v37 = vpack.c.bf16 %v1904_v36, %v1904_v36 }
 0x53b   :  { %777 = vmatmul.mubr.bf16.vlgmr.msra.gmra.mrb[20].mxu0 %v743_v37  ;;  %1317 = vmatmul.mubr.bf16.vlgmr.msra.gmra.mrb[20].mxu1 %v743_v37 }
 0x53c   :  { %855 = vmatpush1.bf16.msra.mxu0 %v1517_v3  ;;  %1321 = vmatpush3.bf16.msra.mxu1 %v1554_v9  ;;  %v1116_v3 = vld [vmem:[%s2016_s0 + $0x3c] sm:$0xff] }
 0x53d   :  { %856 = vmatprep.subr.bf16.mxu0 %v1525_v4  ;;  %1322 = vmatprep.subr.bf16.mxu1 %v1483_v1  ;;  %v740_v4 = vunpack.c.l.bf16 %v1116_v3 }
 0x53e   :  { %886 = vmatprep.mubr.bf16.mxu0 %v1484_v2  ;;  %1336 = vmatprep.mubr.msk.bf16.mxu1 %vm1485_vm0, %v1483_v1 }
 0x540   :  { %857 = vmatpush1.bf16.msra.mxu0 %v1531_v5  ;;  %1323 = vmatpush3.bf16.msra.mxu1 %v1573_v12 }
 0x541   :  { %858 = vmatprep.subr.bf16.mxu0 %v1537_v6  ;;  %1324 = vmatprep.subr.bf16.mxu1 %v1483_v1 }
 0x544   :  { %859 = vmatpush1.bf16.msra.mxu0 %v1543_v7  ;;  %1325 = vmatpush3.bf16.msra.mxu1 %v1585_v14  ;;  %v741_v7 = vunpack.c.h.bf16 %v1116_v3 }
 0x545   :  { %860 = vmatprep.subr.bf16.mxu0 %v1549_v8  ;;  %1326 = vmatprep.subr.bf16.mxu1 %v1483_v1 }
 0x548   :  { %861 = vmatpush1.bf16.msra.mxu0 %v1560_v10  ;;  %1327 = vmatpush3.bf16.msra.mxu1 %v1604_v17 }
 0x549   :  { %862 = vmatprep.subr.bf16.mxu0 %v1567_v11  ;;  %1328 = vmatprep.subr.bf16.mxu1 %v1483_v1 }
 0x54c   :  { %863 = vmatpush1.bf16.msra.mxu0 %v1578_v13  ;;  %1329 = vmatpush3.bf16.msra.mxu1 %v1623_v20 }
 0x54d   :  { %864 = vmatprep.subr.bf16.mxu0 %v1591_v15  ;;  %1330 = vmatprep.subr.bf16.mxu1 %v1483_v1 }
 0x550   :  { %865 = vmatpush1.bf16.msra.mxu0 %v1598_v16  ;;  %1331 = vmatpush3.bf16.msra.mxu1 %v1642_v23 }
 0x551   :  { %866 = vmatprep.subr.bf16.mxu0 %v1610_v18  ;;  %1332 = vmatprep.subr.bf16.mxu1 %v1483_v1 }
 0x554   :  { %867 = vmatpush1.bf16.msra.mxu0 %v1617_v19  ;;  %1333 = vmatpush3.bf16.msra.mxu1 %v1651_v24 }
 0x555   :  { %868 = vmatprep.subr.bf16.mxu0 %v1629_v21  ;;  %1334 = vmatprep.subr.bf16.mxu1 %v1483_v1 }
 0x558   :  { %869 = vmatpush1.bf16.msra.mxu0 %v1636_v22  ;;  %1335 = vmatpush3.bf16.msra.mxu1 %v1659_v26 }
 0x559   :  { %964 = vmatprep.subr.bf16.mxu0 %v1510_v0  ;;  %1340 = vmatprep.subr.bf16.mxu1 %v1483_v1 }
 0x60e   :  { %v778_v5 = vpop.f32.mrb[20].mxu0  ;;  %v819_v6 = vpop.f32.mrb[20].mxu1 }
 0x60f   :  { %v825_v8 = vadd.f32 %v778_v5, %v740_v4  ;;  %v780_v10 = vpop.f32.mrb[21].mxu0  ;;  %v1318_v38 = vpop.f32.mrb[21].mxu1  ;;  %v839_v51 = vadd.f32 %v1705_v45, %v819_v6 }
 0x610   :  { %v782_v39 = vpop.f32.mrb[22].mxu0  ;;  %v822_v40 = vpop.f32.mrb[22].mxu1  ;;  %v826_v43 = vadd.f32 %v780_v10, %v741_v7  ;;  %v1124_v38 = vld [vmem:[%s2016_s0 + $0x54] sm:$0xff] }
 0x611   :  { %v1118_v41 = vmul.f32 -1.442695, %v825_v8  ;;  %v783_v42 = vpop.f32.mrb[23].mxu0  ;;  %v1319_v34 = vpop.f32.mrb[23].mxu1  ;;  %v960_v39 = vunpack.c.l.bf16 %v1124_v38 }
 0x612   :  { %v1119_v0 = vmul.f32 -1.442695, %v826_v43  ;;  %v961_v42 = vunpack.c.h.bf16 %v1124_v38 }
 0x613   :  { %1446 = vpow2.f32 %v1118_v41 }
 0x614   :  { %1448 = vpow2.f32 %v1119_v0 }
 0x61d   :  { %v1447_v44 = vpop.eup %1446 }
 0x61e   :  { %v833_v47 = vadd.f32 1.0, %v1447_v44  ;;  %v1449_v48 = vpop.eup %1448 }
 0x61f   :  { %v834_v49 = vadd.f32 1.0, %v1449_v48 }
 0x620   :  { %1450 = vrcp.f32 %v833_v47 }
 0x621   :  { %1452 = vrcp.f32 %v834_v49 }
 0x62a   :  { %v1451_v52 = vpop.eup %1450 }
 0x62b   :  { %v840_v53 = vmul.f32 %v1451_v52, %v839_v51  ;;  %v1453_v46 = vpop.eup %1452 }
 0x62c   :  { %v843_v55 = vsub.f32 1.0, %v1453_v46  ;;  %v845_v58 = vmul.f32 %v1453_v46, %v1904_v36 }
 0x62d   :  { %v841_v54 = vadd.f32 %v840_v53, %v742_v50 }
 0x62f   :  { %1454 = vtanh.f32 %v841_v54 }
 0x639   :  { %v1455_v56 = vpop.eup %1454 }
 0x63a   :  { %v844_v57 = vmul.f32 %v1455_v56, %v843_v55  ;;  %v962_v56 = vunpack.c.h.bf16 %v1121_v30 }
 0x63c   :  { %v1949_v59 = vadd.f32 %v845_v58, %v844_v57 }
 0x63e   :  { %v853_v60 = vpack.c.bf16 %v1949_v59, %v1949_v59 }
 0x640   :  { %887 = vmatmul.mubr.bf16.vlgmr.msra.gmra.mrb[24].mxu0 %v853_v60  ;;  %1337 = vmatmul.mubr.bf16.vlgmr.msra.gmra.mrb[24].mxu1 %v853_v60 }
 0x641   :  { %965 = vmatpush1.bf16.msra.mxu0 %v1476_v61  ;;  %1341 = vmatpush3.bf16.msra.mxu1 %v1554_v9  ;;  %v1479_v9 = vld [vmem:[%s2015_s1 + $0x34] ss:$12 sps:$4 sm:$0xff]  }
 0x642   :  { %966 = vmatprep.subr.bf16.mxu0 %v1477_v62  ;;  %1342 = vmatprep.subr.bf16.mxu1 %v1483_v1 }
 0x643   :  { %996 = vmatprep.mubr.bf16.mxu0 %v1484_v2  ;;  %1356 = vmatprep.mubr.msk.bf16.mxu1 %vm1485_vm0, %v1483_v1  ;;  %v1480_v2 = vld [vmem:[%s2015_s1 + $0x30] ss:$12 sps:$4 sm:$0xff]  }
 0x645   :  { %967 = vmatpush1.bf16.msra.mxu0 %v1478_v63  ;;  %1343 = vmatpush3.bf16.msra.mxu1 %v1573_v12  ;;  %v1482_v12 = vld [vmem:[%s2015_s1 + $0x48] ss:$12 sps:$4 sm:$0xff]  }
 0x646   :  { %968 = vmatprep.subr.bf16.mxu0 %v1479_v9  ;;  %1344 = vmatprep.subr.bf16.mxu1 %v1483_v1 }
 0x649   :  { %969 = vmatpush1.bf16.msra.mxu0 %v1480_v2  ;;  %1345 = vmatpush3.bf16.msra.mxu1 %v1585_v14 }
 0x64a   :  { %970 = vmatprep.subr.bf16.mxu0 %v1481_v25  ;;  %1346 = vmatprep.subr.bf16.mxu1 %v1483_v1 }
 0x64d   :  { %971 = vmatpush1.bf16.msra.mxu0 %v1482_v12  ;;  %1347 = vmatpush3.bf16.msra.mxu1 %v1604_v17 }
 0x64e   :  { %972 = vmatprep.subr.bf16.mxu0 %v1567_v11  ;;  %1348 = vmatprep.subr.bf16.mxu1 %v1483_v1  ;;  %v1120_v11 = vld [vmem:[%s2016_s0 + $0x48] sm:$0xff] }
 0x651   :  { %973 = vmatpush1.bf16.msra.mxu0 %v1578_v13  ;;  %1349 = vmatpush3.bf16.msra.mxu1 %v1623_v20  ;;  %v850_v13 = vunpack.c.l.bf16 %v1120_v11 }
 0x652   :  { %974 = vmatprep.subr.bf16.mxu0 %v1591_v15  ;;  %1350 = vmatprep.subr.bf16.mxu1 %v1483_v1 }
 0x655   :  { %975 = vmatpush1.bf16.msra.mxu0 %v1598_v16  ;;  %1351 = vmatpush3.bf16.msra.mxu1 %v1642_v23  ;;  %v851_v16 = vunpack.c.h.bf16 %v1120_v11 }
 0x656   :  { %976 = vmatprep.subr.bf16.mxu0 %v1610_v18  ;;  %1352 = vmatprep.subr.bf16.mxu1 %v1483_v1 }
 0x659   :  { %977 = vmatpush1.bf16.msra.mxu0 %v1617_v19  ;;  %1353 = vmatpush3.bf16.msra.mxu1 %v1651_v24 }
 0x65a   :  { %978 = vmatprep.subr.bf16.mxu0 %v1629_v21  ;;  %1354 = vmatprep.subr.bf16.mxu1 %v1483_v1 }
 0x65d   :  { %979 = vmatpush1.bf16.msra.mxu0 %v1636_v22  ;;  %1355 = vmatpush3.bf16.msra.mxu1 %v1659_v26 }
 0x713   :  { %v888_v14 = vpop.f32.mrb[24].mxu0  ;;  %v929_v15 = vpop.f32.mrb[24].mxu1 }
 0x714   :  { %v935_v17 = vadd.f32 %v888_v14, %v850_v13  ;;  %v890_v18 = vpop.f32.mrb[25].mxu0  ;;  %v1338_v19 = vpop.f32.mrb[25].mxu1  ;;  %v949_v33 = vadd.f32 %v1705_v45, %v929_v15 }
 0x715   :  { %v892_v20 = vpop.f32.mrb[26].mxu0  ;;  %v932_v23 = vpop.f32.mrb[26].mxu1  ;;  %v936_v27 = vadd.f32 %v890_v18, %v851_v16 }
 0x716   :  { %v1122_v21 = vmul.f32 -1.442695, %v935_v17  ;;  %v893_v24 = vpop.f32.mrb[27].mxu0  ;;  %v1339_v1 = vpop.f32.mrb[27].mxu1 }
 0x717   :  { %v1123_v22 = vmul.f32 -1.442695, %v936_v27 }
 0x718   :  { %1456 = vpow2.f32 %v1122_v21 }
 0x719   :  { %1458 = vpow2.f32 %v1123_v22 }
 0x722   :  { %v1457_v26 = vpop.eup %1456 }
 0x723   :  { %v943_v28 = vadd.f32 1.0, %v1457_v26  ;;  %v1459_v29 = vpop.eup %1458 }
 0x724   :  { %v944_v31 = vadd.f32 1.0, %v1459_v29 }
 0x725   :  { %1460 = vrcp.f32 %v943_v28 }
 0x726   :  { %1462 = vrcp.f32 %v944_v31 }
 0x72f   :  { %v1461_v35 = vpop.eup %1460 }
 0x730   :  { %v950_v36 = vmul.f32 %v1461_v35, %v949_v33  ;;  %v1463_v3 = vpop.eup %1462 }
 0x731   :  { %v953_v4 = vsub.f32 1.0, %v1463_v3  ;;  %v955_v7 = vmul.f32 %v1463_v3, %v1949_v59 }
 0x732   :  { %v951_v37 = vadd.f32 %v950_v36, %v852_v32 }
 0x734   :  { %1464 = vtanh.f32 %v951_v37 }
 0x73e   :  { %v1465_v5 = vpop.eup %1464 }
 0x73f   :  { %v954_v6 = vmul.f32 %v1465_v5, %v953_v4 }
 0x741   :  { %v956_v8 = vadd.f32 %v955_v7, %v954_v6 }
 0x743   :  { %v963_v10 = vpack.c.bf16 %v956_v8, %v956_v8 }
 0x745   :  { %997 = vmatmul.mubr.bf16.vlgmr.msra.gmra.mrb[28].mxu0 %v963_v10  ;;  %1357 = vmatmul.mubr.bf16.vlgmr.msra.gmra.mrb[28].mxu1 %v963_v10 }
 0x818   :  { %v998_v40 = vpop.f32.mrb[28].mxu0  ;;  %v1039_v41 = vpop.f32.mrb[28].mxu1 }
 0x819   :  { %v1045_v34 = vadd.f32 %v998_v40, %v960_v39  ;;  %v1000_v43 = vpop.f32.mrb[29].mxu0  ;;  %v1358_v0 = vpop.f32.mrb[29].mxu1  ;;  %v1059_v57 = vadd.f32 %v1705_v45, %v1039_v41 }
 0x81a   :  { %v1002_v44 = vpop.f32.mrb[30].mxu0  ;;  %v1042_v47 = vpop.f32.mrb[30].mxu1  ;;  %v1046_v51 = vadd.f32 %v1000_v43, %v961_v42 }
 0x81b   :  { %v1126_v48 = vmul.f32 -1.442695, %v1045_v34  ;;  %v1003_v49 = vpop.f32.mrb[31].mxu0  ;;  %v1359_v50 = vpop.f32.mrb[31].mxu1 }
 0x81c   :  { %v1127_v52 = vmul.f32 -1.442695, %v1046_v51 }
 0x81d   :  { %1466 = vpow2.f32 %v1126_v48 }
 0x81e   :  { %1468 = vpow2.f32 %v1127_v52 }
 0x827   :  { %v1467_v53 = vpop.eup %1466 }
 0x828   :  { %v1053_v54 = vadd.f32 1.0, %v1467_v53  ;;  %v1469_v46 = vpop.eup %1468 }
 0x829   :  { %v1054_v55 = vadd.f32 1.0, %v1469_v46 }
 0x82a   :  { %1470 = vrcp.f32 %v1053_v54 }
 0x82b   :  { %1472 = vrcp.f32 %v1054_v55 }
 0x834   :  { %v1471_v58 = vpop.eup %1470 }
 0x835   :  { %v1060_v59 = vmul.f32 %v1471_v58, %v1059_v57  ;;  %v1473_v61 = vpop.eup %1472 }
 0x836   :  { %v1063_v62 = vsub.f32 1.0, %v1473_v61  ;;  %v1065_v2 = vmul.f32 %v1473_v61, %v956_v8 }
 0x837   :  { %v1061_v60 = vadd.f32 %v1060_v59, %v962_v56 }
 0x839   :  { %1474 = vtanh.f32 %v1061_v60 }
 0x843   :  { %v1475_v63 = vpop.eup %1474 }
 0x844   :  { %v1064_v9 = vmul.f32 %v1475_v63, %v1063_v62 }
 0x846   :  { %v1066_v25 = vadd.f32 %v1065_v2, %v1064_v9 }
 0x848   :  { %1068 = vst [vmem:[%s2018_s3] sm:$0xff] %v1066_v25 }

// kernel: gru_encoder_forward.2
= control target key start
LH: loop header
LB: loop body
LE: loop exit
PB: predicated region body
PF: predicated region fallthrough
CT: control target
= control target key end

     0   :  { %v1506_v1 = vmov 0.0   ;;  %v1507_v2 = vmov 0   ;;  %vm1508_vm0 = vmmov 0   ;;  %v1509_v25 = vmov 0.0|0.0   ;;  %s2072_s1 = inlined_call_operand.vmem [shape: bf16[128,384], index: 1, kind: input, shape index: {}]   ;;  %s2073_s0 = inlined_call_operand.vmem [shape: bf16[8,8,384], index: 0, kind: input, shape index: {}]   ;;  %s2074_s2 = inlined_call_operand.vmem [shape: f32[1,128], index: 2, kind: input, shape index: {}]   ;;  %s2075_s3 = inlined_call_operand.vmem [shape: f32[8,8,128], index: 3, kind: output, shape index: {}]  }
   0x1   :  { %v1533_v0 = vld [vmem:[%s2072_s1 + $0x4] ss:$12 sps:$4 sm:$0xff]   ;;  %1221 = vmatprep.subr.bf16.mxu1 %v1506_v1  ;;  %226 = vmatprep.mubr.bf16.mxu0 %v1507_v2  ;;  %v1540_v3 = vld [vmem:[%s2072_s1] ss:$12 sps:$4 sm:$0xff]   ;;  %v1548_v4 = vld [vmem:[%s2072_s1 + $0x1c] ss:$12 sps:$4 sm:$0xff]  }
   0x2   :  { %1237 = vmatprep.mubr.msk.bf16.mxu1 %vm1508_vm0, %v1506_v1  ;;  %194 = vmatprep.subr.bf16.mxu0 %v1533_v0  ;;  %v1554_v5 = vld [vmem:[%s2072_s1 + $0x18] ss:$12 sps:$4 sm:$0xff]   ;;  %v1560_v6 = vld [vmem:[%s2072_s1 + $0x34] ss:$12 sps:$4 sm:$0xff]   ;;  %v1566_v7 = vld [vmem:[%s2072_s1 + $0x30] ss:$12 sps:$4 sm:$0xff]  }
   0x3   :  { %195 = vmatpush1.bf16.msra.mxu0 %v1540_v3  ;;  %v1572_v8 = vld [vmem:[%s2072_s1 + $0x4c] ss:$12 sps:$4 sm:$0xff]   ;;  %v1577_v9 = vld [vmem:[%s2072_s1 + $0x8] ss:$12 sps:$4 sm:$0xff]   ;;  %v1590_v11 = vld [vmem:[%s2072_s1 + $0x64] ss:$12 sps:$4 sm:$0xff]  }
   0x4   :  { %196 = vmatprep.subr.bf16.mxu0 %v1548_v4  ;;  %v1583_v10 = vld [vmem:[%s2072_s1 + $0x48] ss:$12 sps:$4 sm:$0xff]   ;;  %1222 = vmatpush3.bf16.msra.mxu1 %v1577_v9  ;;  %v1596_v12 = vld [vmem:[%s2072_s1 + $0x20] ss:$12 sps:$4 sm:$0xff]   ;;  %v1608_v14 = vld [vmem:[%s2072_s1 + $0x38] ss:$12 sps:$4 sm:$0xff]  }
   0x5   :  { %1223 = vmatprep.subr.bf16.mxu1 %v1506_v1  ;;  %v1601_v13 = vld [vmem:[%s2072_s1 + $0x60] ss:$12 sps:$4 sm:$0xff]   ;;  %v1614_v15 = vld [vmem:[%s2072_s1 + $0x7c] ss:$12 sps:$4 sm:$0xff]   ;;  %v1621_v16 = vld [vmem:[%s2072_s1 + $0x78] ss:$12 sps:$4 sm:$0xff]  }
   0x6   :  { %v1627_v17 = vld [vmem:[%s2072_s1 + $0x50] ss:$12 sps:$4 sm:$0xff]   ;;  %v1633_v18 = vld [vmem:[%s2072_s1 + $0x94] ss:$12 sps:$4 sm:$0xff]   ;;  %v1652_v21 = vld [vmem:[%s2072_s1 + $0xac] ss:$12 sps:$4 sm:$0xff]  }
   0x7   :  { %197 = vmatpush1.bf16.msra.mxu0 %v1554_v5  ;;  %v1640_v19 = vld [vmem:[%s2072_s1 + $0x90] ss:$12 sps:$4 sm:$0xff]   ;;  %v1646_v20 = vld [vmem:[%s2072_s1 + $0x68] ss:$12 sps:$4 sm:$0xff]   ;;  %v1665_v23 = vld [vmem:[%s2072_s1 + $0x80] ss:$12 sps:$4 sm:$0xff]  }
   0x8   :  { %198 = vmatprep.subr.bf16.mxu0 %v1560_v6  ;;  %1224 = vmatpush3.bf16.msra.mxu1 %v1596_v12  ;;  %v1659_v22 = vld [vmem:[%s2072_s1 + $0xa8] ss:$12 sps:$4 sm:$0xff]   ;;  %v1674_v24 = vld [vmem:[%s2072_s1 + $0x98] ss:$12 sps:$4 sm:$0xff]   ;;  %v1682_v26 = vld [vmem:[%s2072_s1 + $0xb0] ss:$12 sps:$4 sm:$0xff]  }
   0x9   :  { %1225 = vmatprep.subr.bf16.mxu1 %v1506_v1  ;;  %v60_v27 = vld [vmem:[%s2073_s0] sm:$0xff]  ;;  %v61_v46 = vld [vmem:[%s2073_s0 + $0x8] sm:$0xf]  ;;  %v1114_v60 = vld [vmem:[%s2073_s0 + $0xc] sm:$0xff] }
   0xa   :  { %v62_v28 = vunpack.c.l.bf16 %v60_v27  ;;  %v63_v30 = vunpack.c.h.bf16 %v60_v27  ;;  %v1728_v45 = vld [vmem:[%s2074_s2] ss:$0 sm:$0xff]  ;;  %v64_v49 = vunpack.c.l.bf16 %v61_v46  ;;  %v301_v61 = vunpack.c.l.bf16 %v1114_v60 }
   0xb   :  { %199 = vmatpush1.bf16.msra.mxu0 %v1566_v7 }
   0xc   :  { %200 = vmatprep.subr.bf16.mxu0 %v1572_v8  ;;  %1226 = vmatpush3.bf16.msra.mxu1 %v1608_v14 }
   0xd   :  { %1227 = vmatprep.subr.bf16.mxu1 %v1506_v1 }
   0xf   :  { %201 = vmatpush1.bf16.msra.mxu0 %v1583_v10 }
  0x10   :  { %202 = vmatprep.subr.bf16.mxu0 %v1590_v11  ;;  %1228 = vmatpush3.bf16.msra.mxu1 %v1627_v17 }
  0x11   :  { %1229 = vmatprep.subr.bf16.mxu1 %v1506_v1 }
  0x13   :  { %203 = vmatpush1.bf16.msra.mxu0 %v1601_v13 }
  0x14   :  { %204 = vmatprep.subr.bf16.mxu0 %v1614_v15  ;;  %1230 = vmatpush3.bf16.msra.mxu1 %v1646_v20 }
  0x15   :  { %1231 = vmatprep.subr.bf16.mxu1 %v1506_v1 }
  0x17   :  { %205 = vmatpush1.bf16.msra.mxu0 %v1621_v16 }
  0x18   :  { %206 = vmatprep.subr.bf16.mxu0 %v1633_v18  ;;  %1232 = vmatpush3.bf16.msra.mxu1 %v1665_v23 }
  0x19   :  { %1233 = vmatprep.subr.bf16.mxu1 %v1506_v1 }
  0x1b   :  { %207 = vmatpush1.bf16.msra.mxu0 %v1640_v19 }
  0x1c   :  { %208 = vmatprep.subr.bf16.mxu0 %v1652_v21  ;;  %1234 = vmatpush3.bf16.msra.mxu1 %v1674_v24 }
  0x1d   :  { %1235 = vmatprep.subr.bf16.mxu1 %v1506_v1 }
  0x1f   :  { %209 = vmatpush1.bf16.msra.mxu0 %v1659_v22 }
  0x20   :  { %305 = vmatprep.subr.bf16.mxu0 %v1533_v0  ;;  %1236 = vmatpush3.bf16.msra.mxu1 %v1682_v26 }
  0x21   :  { %1241 = vmatprep.subr.bf16.mxu1 %v1506_v1 }
  0x22   :  { %227 = vmatmul.mubr.bf16.vlgmr.msra.gmra.mrb[0].mxu0 %v1509_v25 }
  0x23   :  { %306 = vmatpush1.bf16.msra.mxu0 %v1540_v3  ;;  %337 = vmatprep.mubr.bf16.mxu0 %v1507_v2 }
  0x24   :  { %307 = vmatprep.subr.bf16.mxu0 %v1548_v4  ;;  %1238 = vmatmul.mubr.bf16.vlgmr.msra.gmra.mrb[0].mxu1 %v1509_v25  ;;  %v302_v25 = vunpack.c.h.bf16 %v1114_v60 }
  0x25   :  { %1242 = vmatpush3.bf16.msra.mxu1 %v1577_v9  ;;  %1257 = vmatprep.mubr.msk.bf16.mxu1 %vm1508_vm0, %v1506_v1 }
  0x26   :  { %1243 = vmatprep.subr.bf16.mxu1 %v1506_v1 }
  0x27   :  { %308 = vmatpush1.bf16.msra.mxu0 %v1554_v5 }
  0x28   :  { %309 = vmatprep.subr.bf16.mxu0 %v1560_v6 }
  0x29   :  { %1244 = vmatpush3.bf16.msra.mxu1 %v1596_v12 }
  0x2a   :  { %1245 = vmatprep.subr.bf16.mxu1 %v1506_v1 }
  0x2b   :  { %310 = vmatpush1.bf16.msra.mxu0 %v1566_v7 }
  0x2c   :  { %311 = vmatprep.subr.bf16.mxu0 %v1572_v8 }
  0x2d   :  { %1246 = vmatpush3.bf16.msra.mxu1 %v1608_v14 }
  0x2e   :  { %1247 = vmatprep.subr.bf16.mxu1 %v1506_v1 }
  0x2f   :  { %312 = vmatpush1.bf16.msra.mxu0 %v1583_v10 }
  0x30   :  { %313 = vmatprep.subr.bf16.mxu0 %v1590_v11 }
  0x31   :  { %1248 = vmatpush3.bf16.msra.mxu1 %v1627_v17 }
  0x32   :  { %1249 = vmatprep.subr.bf16.mxu1 %v1506_v1 }
  0x33   :  { %314 = vmatpush1.bf16.msra.mxu0 %v1601_v13 }
  0x34   :  { %315 = vmatprep.subr.bf16.mxu0 %v1614_v15 }
  0x35   :  { %1250 = vmatpush3.bf16.msra.mxu1 %v1646_v20 }
  0x36   :  { %1251 = vmatprep.subr.bf16.mxu1 %v1506_v1 }
  0x37   :  { %316 = vmatpush1.bf16.msra.mxu0 %v1621_v16 }
  0x38   :  { %317 = vmatprep.subr.bf16.mxu0 %v1633_v18 }
  0x39   :  { %1252 = vmatpush3.bf16.msra.mxu1 %v1665_v23 }
  0x3a   :  { %1253 = vmatprep.subr.bf16.mxu1 %v1506_v1 }
  0x3b   :  { %318 = vmatpush1.bf16.msra.mxu0 %v1640_v19 }
  0x3c   :  { %319 = vmatprep.subr.bf16.mxu0 %v1652_v21 }
  0x3d   :  { %1254 = vmatpush3.bf16.msra.mxu1 %v1674_v24 }
  0x3e   :  { %1255 = vmatprep.subr.bf16.mxu1 %v1506_v1 }
  0x3f   :  { %320 = vmatpush1.bf16.msra.mxu0 %v1659_v22 }
  0x40   :  { %417 = vmatprep.subr.bf16.mxu0 %v1533_v0 }
  0x41   :  { %1256 = vmatpush3.bf16.msra.mxu1 %v1682_v26 }
  0x42   :  { %1261 = vmatprep.subr.bf16.mxu1 %v1506_v1 }
  0xf5   :  { %v228_v29 = vpop.f32.mrb[0].mxu0 }
  0xf6   :  { %v275_v31 = vadd.f32 %v228_v29, %v62_v28  ;;  %v230_v32 = vpop.f32.mrb[1].mxu0 }
  0xf7   :  { %v232_v33 = vpop.f32.mrb[2].mxu0  ;;  %v276_v36 = vadd.f32 %v230_v32, %v63_v30  ;;  %v269_v38 = vpop.f32.mrb[0].mxu1 }
  0xf8   :  { %v1112_v34 = vmul.f32 -1.442695, %v275_v31  ;;  %v233_v35 = vpop.f32.mrb[3].mxu0  ;;  %v1239_v39 = vpop.f32.mrb[1].mxu1  ;;  %v289_v48 = vadd.f32 %v1728_v45, %v269_v38 }
  0xf9   :  { %v1113_v37 = vmul.f32 -1.442695, %v276_v36  ;;  %v272_v40 = vpop.f32.mrb[2].mxu1 }
  0xfa   :  { %1417 = vpow2.f32 %v1112_v34  ;;  %v1240_v41 = vpop.f32.mrb[3].mxu1  ;;  %v1783_v40 = vld [vmem:[%s2073_s0 + $0x14] ss:$12 sps:$4 sm:$0xff]  }
  0xfb   :  { %1419 = vpow2.f32 %v1113_v37 }
 0x104   :  { %v1418_v42 = vpop.eup %1417 }
 0x105   :  { %v283_v43 = vadd.f32 1.0, %v1418_v42  ;;  %v1420_v44 = vpop.eup %1419  ;;  %v303_v42 = vunpack.c.l.bf16 %v1783_v40 }
 0x106   :  { %v284_v47 = vadd.f32 1.0, %v1420_v44 }
 0x107   :  { %1421 = vrcp.f32 %v283_v43 }
 0x108   :  { %1423 = vrcp.f32 %v284_v47 }
 0x111   :  { %v1422_v50 = vpop.eup %1421 }
 0x112   :  { %v290_v51 = vmul.f32 %v1422_v50, %v289_v48  ;;  %v1424_v53 = vpop.eup %1423 }
 0x113   :  { %v293_v54 = vsub.f32 1.0, %v1424_v53  ;;  %v295_v57 = vmul.f32 0.0, %v1424_v53 }
 0x114   :  { %v291_v52 = vadd.f32 %v290_v51, %v64_v49 }
 0x116   :  { %1425 = vtanh.f32 %v291_v52 }
 0x120   :  { %v1426_v55 = vpop.eup %1425 }
 0x121   :  { %v294_v56 = vmul.f32 %v1426_v55, %v293_v54  ;;  %v1119_v55 = vld [vmem:[%s2073_s0 + $0x18] sm:$0xff] }
 0x123   :  { %v1734_v58 = vadd.f32 %v295_v57, %v294_v56  ;;  %v413_v56 = vunpack.c.l.bf16 %v1119_v55 }
 0x125   :  { %297 = vst [vmem:[%s2075_s3] sm:$0xff] %v1734_v58  ;;  %v304_v59 = vpack.c.bf16 %v1734_v58, %v1734_v58 }
 0x127   :  { %338 = vmatmul.mubr.bf16.vlgmr.msra.gmra.mrb[4].mxu0 %v304_v59  ;;  %1258 = vmatmul.mubr.bf16.vlgmr.msra.gmra.mrb[4].mxu1 %v304_v59  ;;  %v414_v59 = vunpack.c.h.bf16 %v1119_v55 }
 0x128   :  { %418 = vmatpush1.bf16.msra.mxu0 %v1540_v3  ;;  %1262 = vmatpush3.bf16.msra.mxu1 %v1577_v9 }
 0x129   :  { %419 = vmatprep.subr.bf16.mxu0 %v1548_v4  ;;  %1263 = vmatprep.subr.bf16.mxu1 %v1506_v1 }
 0x12a   :  { %449 = vmatprep.mubr.bf16.mxu0 %v1507_v2  ;;  %1277 = vmatprep.mubr.msk.bf16.mxu1 %vm1508_vm0, %v1506_v1 }
 0x12c   :  { %420 = vmatpush1.bf16.msra.mxu0 %v1554_v5  ;;  %1264 = vmatpush3.bf16.msra.mxu1 %v1596_v12 }
 0x12d   :  { %421 = vmatprep.subr.bf16.mxu0 %v1560_v6  ;;  %1265 = vmatprep.subr.bf16.mxu1 %v1506_v1 }
 0x130   :  { %422 = vmatpush1.bf16.msra.mxu0 %v1566_v7  ;;  %1266 = vmatpush3.bf16.msra.mxu1 %v1608_v14 }
 0x131   :  { %423 = vmatprep.subr.bf16.mxu0 %v1572_v8  ;;  %1267 = vmatprep.subr.bf16.mxu1 %v1506_v1 }
 0x134   :  { %424 = vmatpush1.bf16.msra.mxu0 %v1583_v10  ;;  %1268 = vmatpush3.bf16.msra.mxu1 %v1627_v17 }
 0x135   :  { %425 = vmatprep.subr.bf16.mxu0 %v1590_v11  ;;  %1269 = vmatprep.subr.bf16.mxu1 %v1506_v1 }
 0x138   :  { %426 = vmatpush1.bf16.msra.mxu0 %v1601_v13  ;;  %1270 = vmatpush3.bf16.msra.mxu1 %v1646_v20 }
 0x139   :  { %427 = vmatprep.subr.bf16.mxu0 %v1614_v15  ;;  %1271 = vmatprep.subr.bf16.mxu1 %v1506_v1 }
 0x13c   :  { %428 = vmatpush1.bf16.msra.mxu0 %v1621_v16  ;;  %1272 = vmatpush3.bf16.msra.mxu1 %v1665_v23 }
 0x13d   :  { %429 = vmatprep.subr.bf16.mxu0 %v1633_v18  ;;  %1273 = vmatprep.subr.bf16.mxu1 %v1506_v1 }
 0x140   :  { %430 = vmatpush1.bf16.msra.mxu0 %v1640_v19  ;;  %1274 = vmatpush3.bf16.msra.mxu1 %v1674_v24 }
 0x141   :  { %431 = vmatprep.subr.bf16.mxu0 %v1652_v21  ;;  %1275 = vmatprep.subr.bf16.mxu1 %v1506_v1 }
 0x144   :  { %432 = vmatpush1.bf16.msra.mxu0 %v1659_v22  ;;  %1276 = vmatpush3.bf16.msra.mxu1 %v1682_v26 }
 0x145   :  { %529 = vmatprep.subr.bf16.mxu0 %v1533_v0  ;;  %1281 = vmatprep.subr.bf16.mxu1 %v1506_v1 }
 0x1fa   :  { %v339_v62 = vpop.f32.mrb[4].mxu0  ;;  %v380_v63 = vpop.f32.mrb[4].mxu1 }
 0x1fb   :  { %v386_v27 = vadd.f32 %v339_v62, %v301_v61  ;;  %v341_v28 = vpop.f32.mrb[5].mxu0  ;;  %v1259_v29 = vpop.f32.mrb[5].mxu1  ;;  %v400_v43 = vadd.f32 %v1728_v45, %v380_v63 }
 0x1fc   :  { %v343_v30 = vpop.f32.mrb[6].mxu0  ;;  %v383_v31 = vpop.f32.mrb[6].mxu1  ;;  %v387_v35 = vadd.f32 %v341_v28, %v302_v25 }
 0x1fd   :  { %v1116_v32 = vmul.f32 -1.442695, %v386_v27  ;;  %v344_v33 = vpop.f32.mrb[7].mxu0  ;;  %v1260_v34 = vpop.f32.mrb[7].mxu1 }
 0x1fe   :  { %v1117_v36 = vmul.f32 -1.442695, %v387_v35 }
 0x1ff   :  { %1427 = vpow2.f32 %v1116_v32 }
 0x200   :  { %1429 = vpow2.f32 %v1117_v36  ;;  %v415_v36 = vunpack.c.h.bf16 %v1783_v40 }
 0x209   :  { %v1428_v37 = vpop.eup %1427 }
 0x20a   :  { %v394_v38 = vadd.f32 1.0, %v1428_v37  ;;  %v1430_v39 = vpop.eup %1429 }
 0x20b   :  { %v395_v41 = vadd.f32 1.0, %v1430_v39 }
 0x20c   :  { %1431 = vrcp.f32 %v394_v38 }
 0x20d   :  { %1433 = vrcp.f32 %v395_v41 }
 0x216   :  { %v1432_v44 = vpop.eup %1431 }
 0x217   :  { %v401_v46 = vmul.f32 %v1432_v44, %v400_v43  ;;  %v1434_v48 = vpop.eup %1433 }
 0x218   :  { %v404_v49 = vsub.f32 1.0, %v1434_v48  ;;  %v406_v52 = vmul.f32 %v1434_v48, %v1734_v58 }
 0x219   :  { %v402_v47 = vadd.f32 %v401_v46, %v303_v42 }
 0x21b   :  { %1435 = vtanh.f32 %v402_v47 }
 0x225   :  { %v1436_v50 = vpop.eup %1435 }
 0x226   :  { %v405_v51 = vmul.f32 %v1436_v50, %v404_v49  ;;  %v1124_v49 = vld [vmem:[%s2073_s0 + $0x24] sm:$0xff] }
 0x227   :  { %v525_v50 = vunpack.c.l.bf16 %v1124_v49 }
 0x228   :  { %v1788_v53 = vadd.f32 %v406_v52, %v405_v51 }
 0x22a   :  { %1118 = vst [vmem:[%s2075_s3 + $0x8] sm:$0xff] %v1788_v53  ;;  %v416_v54 = vpack.c.bf16 %v1788_v53, %v1788_v53 }
 0x22c   :  { %450 = vmatmul.mubr.bf16.vlgmr.msra.gmra.mrb[8].mxu0 %v416_v54  ;;  %1278 = vmatmul.mubr.bf16.vlgmr.msra.gmra.mrb[8].mxu1 %v416_v54 }
 0x22d   :  { %530 = vmatpush1.bf16.msra.mxu0 %v1540_v3  ;;  %1282 = vmatpush3.bf16.msra.mxu1 %v1577_v9 }
 0x22e   :  { %531 = vmatprep.subr.bf16.mxu0 %v1548_v4  ;;  %1283 = vmatprep.subr.bf16.mxu1 %v1506_v1 }
 0x22f   :  { %561 = vmatprep.mubr.bf16.mxu0 %v1507_v2  ;;  %1297 = vmatprep.mubr.msk.bf16.mxu1 %vm1508_vm0, %v1506_v1 }
 0x231   :  { %532 = vmatpush1.bf16.msra.mxu0 %v1554_v5  ;;  %1284 = vmatpush3.bf16.msra.mxu1 %v1596_v12 }
 0x232   :  { %533 = vmatprep.subr.bf16.mxu0 %v1560_v6  ;;  %1285 = vmatprep.subr.bf16.mxu1 %v1506_v1 }
 0x235   :  { %534 = vmatpush1.bf16.msra.mxu0 %v1566_v7  ;;  %1286 = vmatpush3.bf16.msra.mxu1 %v1608_v14 }
 0x236   :  { %535 = vmatprep.subr.bf16.mxu0 %v1572_v8  ;;  %1287 = vmatprep.subr.bf16.mxu1 %v1506_v1 }
 0x239   :  { %536 = vmatpush1.bf16.msra.mxu0 %v1583_v10  ;;  %1288 = vmatpush3.bf16.msra.mxu1 %v1627_v17 }
 0x23a   :  { %537 = vmatprep.subr.bf16.mxu0 %v1590_v11  ;;  %1289 = vmatprep.subr.bf16.mxu1 %v1506_v1 }
 0x23d   :  { %538 = vmatpush1.bf16.msra.mxu0 %v1601_v13  ;;  %1290 = vmatpush3.bf16.msra.mxu1 %v1646_v20 }
 0x23e   :  { %539 = vmatprep.subr.bf16.mxu0 %v1614_v15  ;;  %1291 = vmatprep.subr.bf16.mxu1 %v1506_v1 }
 0x241   :  { %540 = vmatpush1.bf16.msra.mxu0 %v1621_v16  ;;  %1292 = vmatpush3.bf16.msra.mxu1 %v1665_v23 }
 0x242   :  { %541 = vmatprep.subr.bf16.mxu0 %v1633_v18  ;;  %1293 = vmatprep.subr.bf16.mxu1 %v1506_v1 }
 0x245   :  { %542 = vmatpush1.bf16.msra.mxu0 %v1640_v19  ;;  %1294 = vmatpush3.bf16.msra.mxu1 %v1674_v24 }
 0x246   :  { %543 = vmatprep.subr.bf16.mxu0 %v1652_v21  ;;  %1295 = vmatprep.subr.bf16.mxu1 %v1506_v1 }
 0x249   :  { %544 = vmatpush1.bf16.msra.mxu0 %v1659_v22  ;;  %1296 = vmatpush3.bf16.msra.mxu1 %v1682_v26 }
 0x24a   :  { %641 = vmatprep.subr.bf16.mxu0 %v1533_v0  ;;  %1301 = vmatprep.subr.bf16.mxu1 %v1506_v1 }
 0x2ff   :  { %v451_v57 = vpop.f32.mrb[8].mxu0  ;;  %v492_v58 = vpop.f32.mrb[8].mxu1 }
 0x300   :  { %v498_v60 = vadd.f32 %v451_v57, %v413_v56  ;;  %v453_v61 = vpop.f32.mrb[9].mxu0  ;;  %v1279_v62 = vpop.f32.mrb[9].mxu1  ;;  %v512_v37 = vadd.f32 %v1728_v45, %v492_v58 }
 0x301   :  { %v455_v63 = vpop.f32.mrb[10].mxu0  ;;  %v495_v25 = vpop.f32.mrb[10].mxu1  ;;  %v499_v30 = vadd.f32 %v453_v61, %v414_v59 }
 0x302   :  { %v1121_v27 = vmul.f32 -1.442695, %v498_v60  ;;  %v456_v28 = vpop.f32.mrb[11].mxu0  ;;  %v1280_v29 = vpop.f32.mrb[11].mxu1 }
 0x303   :  { %v1122_v31 = vmul.f32 -1.442695, %v499_v30  ;;  %v1886_v29 = vld [vmem:[%s2073_s0 + $0x2c] ss:$12 sps:$4 sm:$0xff]  }
 0x304   :  { %1437 = vpow2.f32 %v1121_v27 }
 0x305   :  { %1439 = vpow2.f32 %v1122_v31  ;;  %v527_v31 = vunpack.c.l.bf16 %v1886_v29 }
 0x30e   :  { %v1438_v32 = vpop.eup %1437 }
 0x30f   :  { %v506_v33 = vadd.f32 1.0, %v1438_v32  ;;  %v1440_v34 = vpop.eup %1439 }
 0x310   :  { %v507_v35 = vadd.f32 1.0, %v1440_v34 }
 0x311   :  { %1441 = vrcp.f32 %v506_v33 }
 0x312   :  { %1443 = vrcp.f32 %v507_v35 }
 0x31b   :  { %v1442_v38 = vpop.eup %1441 }
 0x31c   :  { %v513_v39 = vmul.f32 %v1442_v38, %v512_v37  ;;  %v1444_v42 = vpop.eup %1443 }
 0x31d   :  { %v516_v43 = vsub.f32 1.0, %v1444_v42  ;;  %v518_v47 = vmul.f32 %v1444_v42, %v1788_v53  ;;  %v526_v53 = vunpack.c.h.bf16 %v1124_v49 }
 0x31e   :  { %v514_v41 = vadd.f32 %v513_v39, %v415_v36 }
 0x320   :  { %1445 = vtanh.f32 %v514_v41 }
 0x32a   :  { %v1446_v44 = vpop.eup %1445 }
 0x32b   :  { %v517_v46 = vmul.f32 %v1446_v44, %v516_v43  ;;  %v1129_v44 = vld [vmem:[%s2073_s0 + $0x30] sm:$0xff] }
 0x32d   :  { %v1837_v48 = vadd.f32 %v518_v47, %v517_v46  ;;  %v637_v46 = vunpack.c.l.bf16 %v1129_v44 }
 0x32f   :  { %1123 = vst [vmem:[%s2075_s3 + $0x10] sm:$0xff] %v1837_v48  ;;  %v528_v40 = vpack.c.bf16 %v1837_v48, %v1837_v48 }
 0x331   :  { %562 = vmatmul.mubr.bf16.vlgmr.msra.gmra.mrb[12].mxu0 %v528_v40  ;;  %1298 = vmatmul.mubr.bf16.vlgmr.msra.gmra.mrb[12].mxu1 %v528_v40  ;;  %v638_v40 = vunpack.c.h.bf16 %v1129_v44 }
 0x332   :  { %642 = vmatpush1.bf16.msra.mxu0 %v1540_v3  ;;  %1302 = vmatpush3.bf16.msra.mxu1 %v1577_v9 }
 0x333   :  { %643 = vmatprep.subr.bf16.mxu0 %v1548_v4  ;;  %1303 = vmatprep.subr.bf16.mxu1 %v1506_v1 }
 0x334   :  { %673 = vmatprep.mubr.bf16.mxu0 %v1507_v2  ;;  %1317 = vmatprep.mubr.msk.bf16.mxu1 %vm1508_vm0, %v1506_v1 }
 0x336   :  { %644 = vmatpush1.bf16.msra.mxu0 %v1554_v5  ;;  %1304 = vmatpush3.bf16.msra.mxu1 %v1596_v12 }
 0x337   :  { %645 = vmatprep.subr.bf16.mxu0 %v1560_v6  ;;  %1305 = vmatprep.subr.bf16.mxu1 %v1506_v1 }
 0x33a   :  { %646 = vmatpush1.bf16.msra.mxu0 %v1566_v7  ;;  %1306 = vmatpush3.bf16.msra.mxu1 %v1608_v14 }
 0x33b   :  { %647 = vmatprep.subr.bf16.mxu0 %v1572_v8  ;;  %1307 = vmatprep.subr.bf16.mxu1 %v1506_v1 }
 0x33e   :  { %648 = vmatpush1.bf16.msra.mxu0 %v1583_v10  ;;  %1308 = vmatpush3.bf16.msra.mxu1 %v1627_v17 }
 0x33f   :  { %649 = vmatprep.subr.bf16.mxu0 %v1590_v11  ;;  %1309 = vmatprep.subr.bf16.mxu1 %v1506_v1 }
 0x342   :  { %650 = vmatpush1.bf16.msra.mxu0 %v1601_v13  ;;  %1310 = vmatpush3.bf16.msra.mxu1 %v1646_v20 }
 0x343   :  { %651 = vmatprep.subr.bf16.mxu0 %v1614_v15  ;;  %1311 = vmatprep.subr.bf16.mxu1 %v1506_v1 }
 0x346   :  { %652 = vmatpush1.bf16.msra.mxu0 %v1621_v16  ;;  %1312 = vmatpush3.bf16.msra.mxu1 %v1665_v23 }
 0x347   :  { %653 = vmatprep.subr.bf16.mxu0 %v1633_v18  ;;  %1313 = vmatprep.subr.bf16.mxu1 %v1506_v1 }
 0x34a   :  { %654 = vmatpush1.bf16.msra.mxu0 %v1640_v19  ;;  %1314 = vmatpush3.bf16.msra.mxu1 %v1674_v24 }
 0x34b   :  { %655 = vmatprep.subr.bf16.mxu0 %v1652_v21  ;;  %1315 = vmatprep.subr.bf16.mxu1 %v1506_v1 }
 0x34e   :  { %656 = vmatpush1.bf16.msra.mxu0 %v1659_v22  ;;  %1316 = vmatpush3.bf16.msra.mxu1 %v1682_v26 }
 0x34f   :  { %753 = vmatprep.subr.bf16.mxu0 %v1533_v0  ;;  %1321 = vmatprep.subr.bf16.mxu1 %v1506_v1 }
 0x404   :  { %v563_v51 = vpop.f32.mrb[12].mxu0  ;;  %v604_v52 = vpop.f32.mrb[12].mxu1 }
 0x405   :  { %v610_v54 = vadd.f32 %v563_v51, %v525_v50  ;;  %v565_v55 = vpop.f32.mrb[13].mxu0  ;;  %v1299_v56 = vpop.f32.mrb[13].mxu1  ;;  %v624_v32 = vadd.f32 %v1728_v45, %v604_v52 }
 0x406   :  { %v567_v57 = vpop.f32.mrb[14].mxu0  ;;  %v607_v58 = vpop.f32.mrb[14].mxu1  ;;  %v611_v62 = vadd.f32 %v565_v55, %v526_v53 }
 0x407   :  { %v1126_v59 = vmul.f32 -1.442695, %v610_v54  ;;  %v568_v60 = vpop.f32.mrb[15].mxu0  ;;  %v1300_v61 = vpop.f32.mrb[15].mxu1 }
 0x408   :  { %v1127_v63 = vmul.f32 -1.442695, %v611_v62 }
 0x409   :  { %1447 = vpow2.f32 %v1126_v59 }
 0x40a   :  { %1449 = vpow2.f32 %v1127_v63  ;;  %v639_v63 = vunpack.c.h.bf16 %v1886_v29 }
 0x413   :  { %v1448_v25 = vpop.eup %1447 }
 0x414   :  { %v618_v27 = vadd.f32 1.0, %v1448_v25  ;;  %v1450_v28 = vpop.eup %1449 }
 0x415   :  { %v619_v30 = vadd.f32 1.0, %v1450_v28 }
 0x416   :  { %1451 = vrcp.f32 %v618_v27 }
 0x417   :  { %1453 = vrcp.f32 %v619_v30 }
 0x420   :  { %v1452_v33 = vpop.eup %1451 }
 0x421   :  { %v625_v34 = vmul.f32 %v1452_v33, %v624_v32  ;;  %v1454_v36 = vpop.eup %1453 }
 0x422   :  { %v628_v37 = vsub.f32 1.0, %v1454_v36  ;;  %v630_v41 = vmul.f32 %v1454_v36, %v1837_v48 }
 0x423   :  { %v626_v35 = vadd.f32 %v625_v34, %v527_v31 }
 0x425   :  { %1455 = vtanh.f32 %v626_v35 }
 0x42f   :  { %v1456_v38 = vpop.eup %1455 }
 0x430   :  { %v629_v39 = vmul.f32 %v1456_v38, %v628_v37 }
 0x432   :  { %v1891_v42 = vadd.f32 %v630_v41, %v629_v39 }
 0x434   :  { %1128 = vst [vmem:[%s2075_s3 + $0x18] sm:$0xff] %v1891_v42  ;;  %v640_v43 = vpack.c.bf16 %v1891_v42, %v1891_v42 }
 0x436   :  { %674 = vmatmul.mubr.bf16.vlgmr.msra.gmra.mrb[16].mxu0 %v640_v43  ;;  %1318 = vmatmul.mubr.bf16.vlgmr.msra.gmra.mrb[16].mxu1 %v640_v43 }
 0x437   :  { %754 = vmatpush1.bf16.msra.mxu0 %v1540_v3  ;;  %1322 = vmatpush3.bf16.msra.mxu1 %v1577_v9 }
 0x438   :  { %755 = vmatprep.subr.bf16.mxu0 %v1548_v4  ;;  %1323 = vmatprep.subr.bf16.mxu1 %v1506_v1 }
 0x439   :  { %785 = vmatprep.mubr.bf16.mxu0 %v1507_v2  ;;  %1337 = vmatprep.mubr.msk.bf16.mxu1 %vm1508_vm0, %v1506_v1 }
 0x43b   :  { %756 = vmatpush1.bf16.msra.mxu0 %v1554_v5  ;;  %1324 = vmatpush3.bf16.msra.mxu1 %v1596_v12 }
 0x43c   :  { %757 = vmatprep.subr.bf16.mxu0 %v1560_v6  ;;  %1325 = vmatprep.subr.bf16.mxu1 %v1506_v1 }
 0x43f   :  { %758 = vmatpush1.bf16.msra.mxu0 %v1566_v7  ;;  %1326 = vmatpush3.bf16.msra.mxu1 %v1608_v14 }
 0x440   :  { %759 = vmatprep.subr.bf16.mxu0 %v1572_v8  ;;  %1327 = vmatprep.subr.bf16.mxu1 %v1506_v1 }
 0x443   :  { %760 = vmatpush1.bf16.msra.mxu0 %v1583_v10  ;;  %1328 = vmatpush3.bf16.msra.mxu1 %v1627_v17 }
 0x444   :  { %761 = vmatprep.subr.bf16.mxu0 %v1590_v11  ;;  %1329 = vmatprep.subr.bf16.mxu1 %v1506_v1 }
 0x447   :  { %762 = vmatpush1.bf16.msra.mxu0 %v1601_v13  ;;  %1330 = vmatpush3.bf16.msra.mxu1 %v1646_v20 }
 0x448   :  { %763 = vmatprep.subr.bf16.mxu0 %v1614_v15  ;;  %1331 = vmatprep.subr.bf16.mxu1 %v1506_v1 }
 0x44b   :  { %764 = vmatpush1.bf16.msra.mxu0 %v1621_v16  ;;  %1332 = vmatpush3.bf16.msra.mxu1 %v1665_v23 }
 0x44c   :  { %765 = vmatprep.subr.bf16.mxu0 %v1633_v18  ;;  %1333 = vmatprep.subr.bf16.mxu1 %v1506_v1 }
 0x44f   :  { %766 = vmatpush1.bf16.msra.mxu0 %v1640_v19  ;;  %1334 = vmatpush3.bf16.msra.mxu1 %v1674_v24 }
 0x450   :  { %767 = vmatprep.subr.bf16.mxu0 %v1652_v21  ;;  %1335 = vmatprep.subr.bf16.mxu1 %v1506_v1 }
 0x453   :  { %768 = vmatpush1.bf16.msra.mxu0 %v1659_v22  ;;  %1336 = vmatpush3.bf16.msra.mxu1 %v1682_v26 }
 0x454   :  { %865 = vmatprep.subr.bf16.mxu0 %v1533_v0  ;;  %1341 = vmatprep.subr.bf16.mxu1 %v1506_v1 }
 0x509   :  { %v675_v47 = vpop.f32.mrb[16].mxu0  ;;  %v716_v48 = vpop.f32.mrb[16].mxu1 }
 0x50a   :  { %v722_v49 = vadd.f32 %v675_v47, %v637_v46  ;;  %v677_v50 = vpop.f32.mrb[17].mxu0  ;;  %v1319_v51 = vpop.f32.mrb[17].mxu1  ;;  %v736_v25 = vadd.f32 %v1728_v45, %v716_v48  ;;  %v1989_v47 = vld [vmem:[%s2073_s0 + $0x44] ss:$12 sps:$4 sm:$0xff]  }
 0x50b   :  { %v679_v52 = vpop.f32.mrb[18].mxu0  ;;  %v719_v53 = vpop.f32.mrb[18].mxu1  ;;  %v723_v57 = vadd.f32 %v677_v50, %v638_v40  ;;  %v751_v40 = vunpack.c.l.bf16 %v1989_v47 }
 0x50c   :  { %v1131_v54 = vmul.f32 -1.442695, %v722_v49  ;;  %v680_v55 = vpop.f32.mrb[19].mxu0  ;;  %v1320_v56 = vpop.f32.mrb[19].mxu1 }
 0x50d   :  { %v1132_v58 = vmul.f32 -1.442695, %v723_v57 }
 0x50e   :  { %1457 = vpow2.f32 %v1131_v54 }
 0x50f   :  { %1459 = vpow2.f32 %v1132_v58 }
 0x518   :  { %v1458_v59 = vpop.eup %1457 }
 0x519   :  { %v730_v60 = vadd.f32 1.0, %v1458_v59  ;;  %v1460_v61 = vpop.eup %1459 }
 0x51a   :  { %v731_v62 = vadd.f32 1.0, %v1460_v61  ;;  %v1498_v61 = vld [vmem:[%s2072_s1 + $0x1c] ss:$12 sps:$4 sm:$0xff]  }
 0x51b   :  { %1461 = vrcp.f32 %v730_v60  ;;  %v1497_v60 = vld [vmem:[%s2072_s1] ss:$12 sps:$4 sm:$0xff]  }
 0x51c   :  { %1463 = vrcp.f32 %v731_v62  ;;  %v1499_v62 = vld [vmem:[%s2072_s1 + $0x18] ss:$12 sps:$4 sm:$0xff]  }
 0x525   :  { %v1462_v27 = vpop.eup %1461 }
 0x526   :  { %v737_v28 = vmul.f32 %v1462_v27, %v736_v25  ;;  %v1464_v31 = vpop.eup %1463  ;;  %v1504_v25 = vld [vmem:[%s2072_s1 + $0x64] ss:$12 sps:$4 sm:$0xff]  }
 0x527   :  { %v740_v32 = vsub.f32 1.0, %v1464_v31  ;;  %v742_v35 = vmul.f32 %v1464_v31, %v1891_v42 }
 0x528   :  { %v738_v30 = vadd.f32 %v737_v28, %v639_v63  ;;  %v1502_v63 = vld [vmem:[%s2072_s1 + $0x4c] ss:$12 sps:$4 sm:$0xff]  }
 0x52a   :  { %1465 = vtanh.f32 %v738_v30 }
 0x534   :  { %v1466_v33 = vpop.eup %1465 }
 0x535   :  { %v741_v34 = vmul.f32 %v1466_v33, %v740_v32 }
 0x537   :  { %v1940_v36 = vadd.f32 %v742_v35, %v741_v34  ;;  %v863_v35 = vunpack.c.h.bf16 %v1989_v47 }
 0x539   :  { %1133 = vst [vmem:[%s2075_s3 + $0x20] sm:$0xff] %v1940_v36  ;;  %v752_v29 = vpack.c.bf16 %v1940_v36, %v1940_v36 }
 0x53b   :  { %786 = vmatmul.mubr.bf16.vlgmr.msra.gmra.mrb[20].mxu0 %v752_v29  ;;  %1338 = vmatmul.mubr.bf16.vlgmr.msra.gmra.mrb[20].mxu1 %v752_v29 }
 0x53c   :  { %866 = vmatpush1.bf16.msra.mxu0 %v1540_v3  ;;  %1342 = vmatpush3.bf16.msra.mxu1 %v1577_v9  ;;  %v1134_v3 = vld [vmem:[%s2073_s0 + $0x3c] sm:$0xff] }
 0x53d   :  { %867 = vmatprep.subr.bf16.mxu0 %v1548_v4  ;;  %1343 = vmatprep.subr.bf16.mxu1 %v1506_v1  ;;  %v749_v4 = vunpack.c.l.bf16 %v1134_v3 }
 0x53e   :  { %897 = vmatprep.mubr.bf16.mxu0 %v1507_v2  ;;  %1357 = vmatprep.mubr.msk.bf16.mxu1 %vm1508_vm0, %v1506_v1 }
 0x540   :  { %868 = vmatpush1.bf16.msra.mxu0 %v1554_v5  ;;  %1344 = vmatpush3.bf16.msra.mxu1 %v1596_v12 }
 0x541   :  { %869 = vmatprep.subr.bf16.mxu0 %v1560_v6  ;;  %1345 = vmatprep.subr.bf16.mxu1 %v1506_v1 }
 0x544   :  { %870 = vmatpush1.bf16.msra.mxu0 %v1566_v7  ;;  %1346 = vmatpush3.bf16.msra.mxu1 %v1608_v14  ;;  %v750_v7 = vunpack.c.h.bf16 %v1134_v3 }
 0x545   :  { %871 = vmatprep.subr.bf16.mxu0 %v1572_v8  ;;  %1347 = vmatprep.subr.bf16.mxu1 %v1506_v1 }
 0x548   :  { %872 = vmatpush1.bf16.msra.mxu0 %v1583_v10  ;;  %1348 = vmatpush3.bf16.msra.mxu1 %v1627_v17 }
 0x549   :  { %873 = vmatprep.subr.bf16.mxu0 %v1590_v11  ;;  %1349 = vmatprep.subr.bf16.mxu1 %v1506_v1 }
 0x54c   :  { %874 = vmatpush1.bf16.msra.mxu0 %v1601_v13  ;;  %1350 = vmatpush3.bf16.msra.mxu1 %v1646_v20 }
 0x54d   :  { %875 = vmatprep.subr.bf16.mxu0 %v1614_v15  ;;  %1351 = vmatprep.subr.bf16.mxu1 %v1506_v1 }
 0x550   :  { %876 = vmatpush1.bf16.msra.mxu0 %v1621_v16  ;;  %1352 = vmatpush3.bf16.msra.mxu1 %v1665_v23 }
 0x551   :  { %877 = vmatprep.subr.bf16.mxu0 %v1633_v18  ;;  %1353 = vmatprep.subr.bf16.mxu1 %v1506_v1 }
 0x554   :  { %878 = vmatpush1.bf16.msra.mxu0 %v1640_v19  ;;  %1354 = vmatpush3.bf16.msra.mxu1 %v1674_v24 }
 0x555   :  { %879 = vmatprep.subr.bf16.mxu0 %v1652_v21  ;;  %1355 = vmatprep.subr.bf16.mxu1 %v1506_v1 }
 0x558   :  { %880 = vmatpush1.bf16.msra.mxu0 %v1659_v22  ;;  %1356 = vmatpush3.bf16.msra.mxu1 %v1682_v26 }
 0x559   :  { %977 = vmatprep.subr.bf16.mxu0 %v1533_v0  ;;  %1361 = vmatprep.subr.bf16.mxu1 %v1506_v1 }
 0x60e   :  { %v787_v5 = vpop.f32.mrb[20].mxu0  ;;  %v828_v6 = vpop.f32.mrb[20].mxu1 }
 0x60f   :  { %v834_v8 = vadd.f32 %v787_v5, %v749_v4  ;;  %v789_v10 = vpop.f32.mrb[21].mxu0  ;;  %v1339_v11 = vpop.f32.mrb[21].mxu1  ;;  %v848_v49 = vadd.f32 %v1728_v45, %v828_v6 }
 0x610   :  { %v791_v13 = vpop.f32.mrb[22].mxu0  ;;  %v831_v37 = vpop.f32.mrb[22].mxu1  ;;  %v835_v42 = vadd.f32 %v789_v10, %v750_v7 }
 0x611   :  { %v1136_v38 = vmul.f32 -1.442695, %v834_v8  ;;  %v792_v39 = vpop.f32.mrb[23].mxu0  ;;  %v1340_v41 = vpop.f32.mrb[23].mxu1  ;;  %v1144_v37 = vld [vmem:[%s2073_s0 + $0x54] sm:$0xff] }
 0x612   :  { %v1137_v0 = vmul.f32 -1.442695, %v835_v42  ;;  %v974_v42 = vunpack.c.h.bf16 %v1144_v37 }
 0x613   :  { %1467 = vpow2.f32 %v1136_v38  ;;  %v973_v38 = vunpack.c.l.bf16 %v1144_v37 }
 0x614   :  { %1469 = vpow2.f32 %v1137_v0 }
 0x61d   :  { %v1468_v43 = vpop.eup %1467 }
 0x61e   :  { %v842_v44 = vadd.f32 1.0, %v1468_v43  ;;  %v1470_v46 = vpop.eup %1469 }
 0x61f   :  { %v843_v48 = vadd.f32 1.0, %v1470_v46 }
 0x620   :  { %1471 = vrcp.f32 %v842_v44 }
 0x621   :  { %1473 = vrcp.f32 %v843_v48 }
 0x62a   :  { %v1472_v50 = vpop.eup %1471 }
 0x62b   :  { %v849_v51 = vmul.f32 %v1472_v50, %v848_v49  ;;  %v1474_v53 = vpop.eup %1473 }
 0x62c   :  { %v852_v54 = vsub.f32 1.0, %v1474_v53  ;;  %v854_v57 = vmul.f32 %v1474_v53, %v1940_v36 }
 0x62d   :  { %v850_v52 = vadd.f32 %v849_v51, %v751_v40 }
 0x62f   :  { %1475 = vtanh.f32 %v850_v52 }
 0x639   :  { %v1476_v55 = vpop.eup %1475 }
 0x63a   :  { %v853_v56 = vmul.f32 %v1476_v55, %v852_v54  ;;  %v1145_v55 = vld [vmem:[%s2073_s0 + $0x5c] sm:$0xf] }
 0x63c   :  { %v1994_v58 = vadd.f32 %v854_v57, %v853_v56  ;;  %v975_v57 = vunpack.c.l.bf16 %v1145_v55 }
 0x63e   :  { %1138 = vst [vmem:[%s2075_s3 + $0x28] sm:$0xff] %v1994_v58  ;;  %v864_v59 = vpack.c.bf16 %v1994_v58, %v1994_v58 }
 0x640   :  { %898 = vmatmul.mubr.bf16.vlgmr.msra.gmra.mrb[24].mxu0 %v864_v59  ;;  %1358 = vmatmul.mubr.bf16.vlgmr.msra.gmra.mrb[24].mxu1 %v864_v59 }
 0x641   :  { %978 = vmatpush1.bf16.msra.mxu0 %v1497_v60  ;;  %1362 = vmatpush3.bf16.msra.mxu1 %v1577_v9  ;;  %v1500_v9 = vld [vmem:[%s2072_s1 + $0x34] ss:$12 sps:$4 sm:$0xff]  }
 0x642   :  { %979 = vmatprep.subr.bf16.mxu0 %v1498_v61  ;;  %1363 = vmatprep.subr.bf16.mxu1 %v1506_v1 }
 0x643   :  { %1009 = vmatprep.mubr.bf16.mxu0 %v1507_v2  ;;  %1377 = vmatprep.mubr.msk.bf16.mxu1 %vm1508_vm0, %v1506_v1  ;;  %v1501_v2 = vld [vmem:[%s2072_s1 + $0x30] ss:$12 sps:$4 sm:$0xff]  }
 0x645   :  { %980 = vmatpush1.bf16.msra.mxu0 %v1499_v62  ;;  %1364 = vmatpush3.bf16.msra.mxu1 %v1596_v12  ;;  %v1503_v12 = vld [vmem:[%s2072_s1 + $0x48] ss:$12 sps:$4 sm:$0xff]  }
 0x646   :  { %981 = vmatprep.subr.bf16.mxu0 %v1500_v9  ;;  %1365 = vmatprep.subr.bf16.mxu1 %v1506_v1 }
 0x649   :  { %982 = vmatpush1.bf16.msra.mxu0 %v1501_v2  ;;  %1366 = vmatpush3.bf16.msra.mxu1 %v1608_v14  ;;  %v1505_v14 = vld [vmem:[%s2072_s1 + $0x60] ss:$12 sps:$4 sm:$0xff]  }
 0x64a   :  { %983 = vmatprep.subr.bf16.mxu0 %v1502_v63  ;;  %1367 = vmatprep.subr.bf16.mxu1 %v1506_v1 }
 0x64d   :  { %984 = vmatpush1.bf16.msra.mxu0 %v1503_v12  ;;  %1368 = vmatpush3.bf16.msra.mxu1 %v1627_v17 }
 0x64e   :  { %985 = vmatprep.subr.bf16.mxu0 %v1504_v25  ;;  %1369 = vmatprep.subr.bf16.mxu1 %v1506_v1 }
 0x651   :  { %986 = vmatpush1.bf16.msra.mxu0 %v1505_v14  ;;  %1370 = vmatpush3.bf16.msra.mxu1 %v1646_v20 }
 0x652   :  { %987 = vmatprep.subr.bf16.mxu0 %v1614_v15  ;;  %1371 = vmatprep.subr.bf16.mxu1 %v1506_v1  ;;  %v1139_v15 = vld [vmem:[%s2073_s0 + $0x48] sm:$0xff] }
 0x653   :  { %v862_v20 = vunpack.c.h.bf16 %v1139_v15 }
 0x655   :  { %988 = vmatpush1.bf16.msra.mxu0 %v1621_v16  ;;  %1372 = vmatpush3.bf16.msra.mxu1 %v1665_v23  ;;  %v861_v16 = vunpack.c.l.bf16 %v1139_v15 }
 0x656   :  { %989 = vmatprep.subr.bf16.mxu0 %v1633_v18  ;;  %1373 = vmatprep.subr.bf16.mxu1 %v1506_v1 }
 0x659   :  { %990 = vmatpush1.bf16.msra.mxu0 %v1640_v19  ;;  %1374 = vmatpush3.bf16.msra.mxu1 %v1674_v24 }
 0x65a   :  { %991 = vmatprep.subr.bf16.mxu0 %v1652_v21  ;;  %1375 = vmatprep.subr.bf16.mxu1 %v1506_v1 }
 0x65d   :  { %992 = vmatpush1.bf16.msra.mxu0 %v1659_v22  ;;  %1376 = vmatpush3.bf16.msra.mxu1 %v1682_v26 }
 0x713   :  { %v899_v17 = vpop.f32.mrb[24].mxu0  ;;  %v940_v18 = vpop.f32.mrb[24].mxu1 }
 0x714   :  { %v946_v23 = vadd.f32 %v899_v17, %v861_v16  ;;  %v901_v19 = vpop.f32.mrb[25].mxu0  ;;  %v1359_v27 = vpop.f32.mrb[25].mxu1  ;;  %v960_v36 = vadd.f32 %v1728_v45, %v940_v18 }
 0x715   :  { %v903_v24 = vpop.f32.mrb[26].mxu0  ;;  %v943_v28 = vpop.f32.mrb[26].mxu1  ;;  %v947_v31 = vadd.f32 %v901_v19, %v862_v20 }
 0x716   :  { %v1141_v21 = vmul.f32 -1.442695, %v946_v23  ;;  %v904_v30 = vpop.f32.mrb[27].mxu0  ;;  %v1360_v1 = vpop.f32.mrb[27].mxu1 }
 0x717   :  { %v1142_v22 = vmul.f32 -1.442695, %v947_v31 }
 0x718   :  { %1477 = vpow2.f32 %v1141_v21 }
 0x719   :  { %1479 = vpow2.f32 %v1142_v22 }
 0x722   :  { %v1478_v26 = vpop.eup %1477 }
 0x723   :  { %v954_v32 = vadd.f32 1.0, %v1478_v26  ;;  %v1480_v33 = vpop.eup %1479 }
 0x724   :  { %v955_v34 = vadd.f32 1.0, %v1480_v33 }
 0x725   :  { %1481 = vrcp.f32 %v954_v32 }
 0x726   :  { %1483 = vrcp.f32 %v955_v34 }
 0x72f   :  { %v1482_v29 = vpop.eup %1481 }
 0x730   :  { %v961_v3 = vmul.f32 %v1482_v29, %v960_v36  ;;  %v1484_v5 = vpop.eup %1483 }
 0x731   :  { %v964_v6 = vsub.f32 1.0, %v1484_v5  ;;  %v966_v10 = vmul.f32 %v1484_v5, %v1994_v58 }
 0x732   :  { %v962_v4 = vadd.f32 %v961_v3, %v863_v35 }
 0x734   :  { %1485 = vtanh.f32 %v962_v4 }
 0x73e   :  { %v1486_v7 = vpop.eup %1485 }
 0x73f   :  { %v965_v8 = vmul.f32 %v1486_v7, %v964_v6 }
 0x741   :  { %v967_v11 = vadd.f32 %v966_v10, %v965_v8 }
 0x743   :  { %1143 = vst [vmem:[%s2075_s3 + $0x30] sm:$0xff] %v967_v11  ;;  %v976_v13 = vpack.c.bf16 %v967_v11, %v967_v11 }
 0x745   :  { %1010 = vmatmul.mubr.bf16.vlgmr.msra.gmra.mrb[28].mxu0 %v976_v13  ;;  %1378 = vmatmul.mubr.bf16.vlgmr.msra.gmra.mrb[28].mxu1 %v976_v13 }
 0x818   :  { %v1011_v39 = vpop.f32.mrb[28].mxu0  ;;  %v1052_v41 = vpop.f32.mrb[28].mxu1 }
 0x819   :  { %v1058_v0 = vadd.f32 %v1011_v39, %v973_v38  ;;  %v1013_v43 = vpop.f32.mrb[29].mxu0  ;;  %v1379_v44 = vpop.f32.mrb[29].mxu1  ;;  %v1072_v58 = vadd.f32 %v1728_v45, %v1052_v41 }
 0x81a   :  { %v1015_v46 = vpop.f32.mrb[30].mxu0  ;;  %v1055_v47 = vpop.f32.mrb[30].mxu1  ;;  %v1059_v50 = vadd.f32 %v1013_v43, %v974_v42 }
 0x81b   :  { %v1146_v48 = vmul.f32 -1.442695, %v1058_v0  ;;  %v1016_v40 = vpop.f32.mrb[31].mxu0  ;;  %v1380_v49 = vpop.f32.mrb[31].mxu1 }
 0x81c   :  { %v1147_v51 = vmul.f32 -1.442695, %v1059_v50 }
 0x81d   :  { %1487 = vpow2.f32 %v1146_v48 }
 0x81e   :  { %1489 = vpow2.f32 %v1147_v51 }
 0x827   :  { %v1488_v52 = vpop.eup %1487 }
 0x828   :  { %v1066_v53 = vadd.f32 1.0, %v1488_v52  ;;  %v1490_v54 = vpop.eup %1489 }
 0x829   :  { %v1067_v56 = vadd.f32 1.0, %v1490_v54 }
 0x82a   :  { %1491 = vrcp.f32 %v1066_v53 }
 0x82b   :  { %1493 = vrcp.f32 %v1067_v56 }
 0x834   :  { %v1492_v59 = vpop.eup %1491 }
 0x835   :  { %v1073_v60 = vmul.f32 %v1492_v59, %v1072_v58  ;;  %v1494_v62 = vpop.eup %1493 }
 0x836   :  { %v1076_v9 = vsub.f32 1.0, %v1494_v62  ;;  %v1078_v12 = vmul.f32 %v1494_v62, %v967_v11 }
 0x837   :  { %v1074_v61 = vadd.f32 %v1073_v60, %v975_v57 }
 0x839   :  { %1495 = vtanh.f32 %v1074_v61 }
 0x843   :  { %v1496_v2 = vpop.eup %1495 }
 0x844   :  { %v1077_v63 = vmul.f32 %v1496_v2, %v1076_v9 }
 0x846   :  { %v1079_v25 = vadd.f32 %v1078_v12, %v1077_v63 }
 0x848   :  { %1148 = vst [vmem:[%s2075_s3 + $0x38] sm:$0xff] %v1079_v25 }

</bundles_post_ra>
